<compile_context>
chip_gen: v7x
topology: tpu7x:2x2x1
jax: 0.10.0
libtpu: 0.0.40
codegen_flags: <defaults>
</compile_context>

<pallas_src>
import math

import jax
import jax.numpy as jnp
from jax.experimental import pallas as pl
from jax.experimental.pallas import tpu as pltpu

LANE = 128          # TPU lane width; channel dims and node dim padded to this
_BN_EPS = 1e-5


# ----------------------------------------------------------------------------
# small helpers
# ----------------------------------------------------------------------------

def _full_spec(shape):
    # one grid point, block == full array
    return pl.BlockSpec(shape, lambda i: (0,) * len(shape))


def _pad2(a, rows, cols):
    """Zero-pad a 2-D array up to (rows, cols)."""
    r, c = a.shape
    return jnp.pad(a, ((0, rows - r), (0, cols - c)))


def _pair_d2(a, b):
    """Squared pairwise distances via |a|^2 + |b|^2 - 2 a b^T (MXU-friendly)."""
    aa = jnp.sum(a * a, axis=1)
    bb = jnp.sum(b * b, axis=1)
    return aa[:, None] + bb[None, :] - 2.0 * jnp.dot(a, b.T)


# ----------------------------------------------------------------------------
# Graph glue (plain JAX): radius graph, pooling ids, nearest-cluster ids.
# TODO(synk): graph construction has no clean single-Pallas-kernel equivalent
# (data-dependent argmin selection); it stays as JAX glue and should be cached
# across forward calls when positions are static.
# ----------------------------------------------------------------------------

def radius_adjacency(pos, r, max_neighbors, n_pad=None):
    """Dense, row-normalized adjacency of radius_graph(pos, r, loop=True,
    max_num_neighbors=max_neighbors): keep at most `max_neighbors` nearest
    in-radius neighbors (incl. self) per node, then mean-normalize rows.
    Optionally zero-padded to [n_pad, n_pad]."""
    n = pos.shape[0]
    d2 = _pair_d2(pos, pos)
    big = jnp.float32(1e30)
    cand = jnp.where(d2 <= r * r, d2, big)
    sel = jnp.zeros((n, n), jnp.float32)
    for _ in range(min(max_neighbors, n)):          # small static loop, no top_k
        j = jnp.argmin(cand, axis=1)
        valid = (jnp.min(cand, axis=1) < big).astype(jnp.float32)
        hot = jax.nn.one_hot(j, n, dtype=jnp.float32) * valid[:, None]
        sel = sel + hot
        cand = jnp.where(hot > 0.0, big, cand)
    deg = jnp.maximum(jnp.sum(sel, axis=1, keepdims=True), 1.0)
    adj = sel / deg
    if n_pad is not None and n_pad > n:
        adj = _pad2(adj, n_pad, n_pad)
    return adj


def build_graphs(hparams, x, adj0, sample_key):
    """Radius graphs, random-pooling ids and nearest-cluster (upsample) ids for
    every scale.  Re-usable / cacheable across forward calls when pos is static."""
    L = hparams['nb_scale']
    pool_ratio = hparams['pool_ratio']
    list_r = hparams['list_r']
    max_nb = hparams['max_neighbors']

    n = x.shape[0]
    n_pad = ((n + LANE - 1) // LANE) * LANE        # lane-dense node dimension

    # static node counts per scale (ceil(ratio * n), matching torch reference)
    n_valid = [n]
    for i in range(L - 1):
        n_valid.append(int(math.ceil(pool_ratio[i] * n_valid[-1])))

    pos = x[:, :2]
    keys = jax.random.split(sample_key, L - 1)
    adjs = [_pad2(adj0, n_pad, n_pad)]
    pos_list = [pos]
    pool_ids_raw = []
    for i in range(L - 1):
        k = n_valid[i + 1]
        ids = jax.random.permutation(keys[i], n_valid[i])[:k].astype(jnp.int32)
        pool_ids_raw.append(ids)
        pos_next = pos_list[i][ids]
        pos_list.append(pos_next)
        adjs.append(radius_adjacency(pos_next, list_r[i], max_nb, n_pad))

    up_ids_raw = []
    for i in range(L - 1):
        # nearest node of scale i+1 for every node of scale i
        d2 = _pair_d2(pos_list[i], pos_list[i + 1])
        up_ids_raw.append(jnp.argmin(d2, axis=1).astype(jnp.int32))

    def pad_ids(ids):
        v = jnp.zeros((n_pad,), jnp.int32).at[:ids.shape[0]].set(ids)
        return v[:, None]                          # [n_pad, 1] column

    return {
        'n_pad': n_pad,
        'n_valid': n_valid,
        'adjs_f32': jnp.stack(adjs),                                # [L, P, P] f32
        'pool_ids': jnp.stack([pad_ids(i) for i in pool_ids_raw]),  # [L-1, P, 1] i32
        'up_ids': jnp.stack([pad_ids(i) for i in up_ids_raw]),      # [L-1, P, 1] i32
        'pool_ids_raw': pool_ids_raw,
        'up_ids_raw': up_ids_raw,
    }


# ----------------------------------------------------------------------------
# Parameter construction (deterministic, synthetic) + packing for the kernel
# ----------------------------------------------------------------------------

def _lin_params(key, c_in, c_out):
    k1, k2 = jax.random.split(key)
    w = 0.1 * jax.random.normal(k1, (c_in, c_out), jnp.float32)
    b = 0.1 * jax.random.normal(k2, (1, c_out), jnp.float32)
    return (w, b)


def _sage_params(key, c_in, c_out):
    k1, k2, k3, k4 = jax.random.split(key, 4)
    w_self = 0.1 * jax.random.normal(k1, (c_in, c_out), jnp.float32)
    w_nei = 0.1 * jax.random.normal(k2, (c_in, c_out), jnp.float32)
    b = 0.1 * jax.random.normal(k3, (1, c_out), jnp.float32)
    gamma = 1.0 + 0.05 * jax.random.normal(k4, (1, c_out), jnp.float32)
    beta = jnp.zeros((1, c_out), jnp.float32)
    return (w_self, w_nei, b, gamma, beta)


def init_gunet_params(hparams, in_dim, out_dim, key):
    L = hparams['nb_scale']
    h = hparams['size_hidden_layers']
    dim_enc = hparams['encoder'][-1]

    keys = jax.random.split(key, 64)
    ki = iter(range(64))

    # encoder / decoder: 2-layer MLPs (the torch module takes them as args)
    enc = [_lin_params(keys[next(ki)], in_dim, 2 * dim_enc),
           _lin_params(keys[next(ki)], 2 * dim_enc, dim_enc)]
    dec = [_lin_params(keys[next(ki)], dim_enc, 2 * dim_enc),
           _lin_params(keys[next(ki)], 2 * dim_enc, out_dim)]

    # down SAGE layers: dim_enc->h, h->2h, 2h->4h, ...
    down = []
    c, o = dim_enc, h
    down.append(_sage_params(keys[next(ki)], c, o))
    for _ in range(1, L):
        c, o = o, 2 * o
        down.append(_sage_params(keys[next(ki)], c, o))

    # up SAGE layers: up[0]: 3h -> dim_enc ; up[i>=1]: 3*(2^i h) -> 2^i h
    up = []
    h_init = h
    up.append(_sage_params(keys[next(ki)], 3 * h_init, dim_enc))
    h_init *= 2
    for _ in range(1, L - 1):
        up.append(_sage_params(keys[next(ki)], 3 * h_init, h_init))
        h_init *= 2

    return {'enc': enc, 'dec': dec, 'down': down, 'up': up}


def pack_gunet_params(params, hparams):
    """Pack all weights (lane-padded, bf16) into one [R,128] slab and all
    bias/gamma/beta vectors (f32) into one [n_layers*8, 128] slab.
    Returns (w_all, vec_all, cfg) with static offsets in cfg."""
    L = hparams['nb_scale']
    h = hparams['size_hidden_layers']

    w_blocks, v_blocks = [], []
    w_off = {}
    v_off = {}
    cur = [0]

    def add_w(block):
        off = cur[0]
        w_blocks.append(block)
        cur[0] += block.shape[0]
        return off

    def add_v(rows):
        base = len(v_blocks) * 8
        blk = jnp.zeros((8, LANE), jnp.float32)
        for i, r in enumerate(rows):
            blk = blk.at[i, :r.shape[1]].set(r[0])
        v_blocks.append(blk)
        return base

    def lin_block(p):
        w, b = p
        return _pad2(w, LANE, LANE), [b]

    def sage_down_block(p):
        # packed pieces (128 rows each): [W_self, W_nei]
        w_self, w_nei, b, gamma, beta = p
        wp = jnp.concatenate([_pad2(w_self, LANE, LANE),
                              _pad2(w_nei, LANE, LANE)], axis=0)
        return wp, [b, gamma, beta]

    def sage_up_block(p, c_up):
        # up-layer input is cat([z_up, skip]); split each weight at c_up so the
        # kernel can sum per-piece K=128 dots (no concatenated operand).
        # packed pieces: [W_self_up, W_self_skip, W_nei_up, W_nei_skip]
        w_self, w_nei, b, gamma, beta = p
        wp = jnp.concatenate([_pad2(w_self[:c_up], LANE, LANE),
                              _pad2(w_self[c_up:], LANE, LANE),
                              _pad2(w_nei[:c_up], LANE, LANE),
                              _pad2(w_nei[c_up:], LANE, LANE)], axis=0)
        return wp, [b, gamma, beta]

    wp, vr = lin_block(params['enc'][0]); w_off['enc0'] = add_w(wp); v_off['enc0'] = add_v(vr)
    wp, vr = lin_block(params['enc'][1]); w_off['enc1'] = add_w(wp); v_off['enc1'] = add_v(vr)

    w_off['down'], v_off['down'] = [], []
    for p in params['down']:
        wp, vr = sage_down_block(p)
        w_off['down'].append(add_w(wp)); v_off['down'].append(add_v(vr))

    w_off['up'], v_off['up'] = [], []
    for i, p in enumerate(params['up']):
        c_up = h * (2 ** (i + 1))          # channels of the upsampled tensor
        wp, vr = sage_up_block(p, c_up)
        w_off['up'].append(add_w(wp)); v_off['up'].append(add_v(vr))

    wp, vr = lin_block(params['dec'][0]); w_off['dec0'] = add_w(wp); v_off['dec0'] = add_v(vr)
    wp, vr = lin_block(params['dec'][1]); w_off['dec1'] = add_w(wp); v_off['dec1'] = add_v(vr)

    w_all = jnp.concatenate(w_blocks, axis=0).astype(jnp.bfloat16)
    vec_all = jnp.concatenate(v_blocks, axis=0)
    cfg = {'w_off': w_off, 'v_off': v_off, 'L': L}
    return w_all, vec_all, cfg


# ----------------------------------------------------------------------------
# The fused GUNet forward kernel
# ----------------------------------------------------------------------------

def build_gunet_kernel(cfg, n_pad, n_valid, use_bn, res):
    L = cfg['L']
    w_off, v_off = cfg['w_off'], cfg['v_off']

    def kernel(x_ref, adjs_ref, pool_ids_ref, up_ids_ref, w_ref, vec_ref, o_ref):
        # ---- hoisted iotas / row masks (one compare per distinct node count) ----
        rows = jax.lax.broadcasted_iota(jnp.int32, (n_pad, 1), 0)
        masks = {}
        for nv in n_valid:
            if nv < n_pad and nv not in masks:
                masks[nv] = (rows < nv).astype(jnp.float32)
        cols = jax.lax.broadcasted_iota(jnp.int32, (n_pad, n_pad), 1)

        def vec_block(base):                        # [8,128] f32 (b/gamma/beta)
            return vec_ref[base:base + 8, :]

        def linear(x, woff, vbase, relu):
            w = w_ref[woff:woff + LANE, :]                          # bf16
            out = jnp.dot(x.astype(jnp.bfloat16), w,
                          preferred_element_type=jnp.float32)
            out = out + vec_block(vbase)[0:1, :]
            if relu:
                out = jnp.maximum(out, 0.0)
            return out

        def onehot_gather(ids_col, z):
            # z_out[i, :] = z[ids_col[i], :]; the one-hot is built in-kernel from
            # the O(N) int32 index column (no N^2 input DMA), applied on the MXU
            # in f32 so the gather is exact.
            # TODO(synk): replace with a true row gather for large N.
            sel = (cols == ids_col).astype(jnp.float32)
            return jnp.dot(sel, z, preferred_element_type=jnp.float32)

        def sage(xs, adj, woff, vbase, nv, relu):
            # out = sum_i xs[i] @ W_self_i + sum_i (A @ xs[i]) @ W_nei_i + b
            # separate K=128 dots per packed weight piece; no concat operand.
            xs_b = [x.astype(jnp.bfloat16) for x in xs]
            aggs_b = [jnp.dot(adj, xb, preferred_element_type=jnp.float32
                              ).astype(jnp.bfloat16) for xb in xs_b]
            pieces = xs_b + aggs_b          # order matches the packed weights
            out = None
            for i, p in enumerate(pieces):
                w = w_ref[woff + i * LANE: woff + (i + 1) * LANE, :]
                d = jnp.dot(p, w, preferred_element_type=jnp.float32)
                out = d if out is None else out + d
            vecs = vec_block(vbase)
            out = out + vecs[0:1, :]
            m = masks.get(nv)
            if m is not None:
                out = out * m                       # keep padded rows at zero
            if use_bn:
                # BatchNorm(track_running_stats=False): batch stats over the
                # nv valid rows, biased variance.  f32 throughout.
                inv_n = 1.0 / float(nv)
                mean = jnp.sum(out, axis=0, keepdims=True) * inv_n
                cent = out - mean
                if m is not None:
                    cent = cent * m
                var = jnp.sum(cent * cent, axis=0, keepdims=True) * inv_n
                out = cent * jax.lax.rsqrt(var + _BN_EPS) * vecs[1:2, :]
                beta = vecs[2:3, :]
                out = out + (beta * m if m is not None else beta)
            if relu:
                out = jnp.maximum(out, 0.0)
            return out

        x = x_ref[...]                              # bf16 [n_pad, 128]

        # ---- encoder MLP ----
        z = linear(x, w_off['enc0'], v_off['enc0'], relu=True)
        z = linear(z, w_off['enc1'], v_off['enc1'], relu=False)
        z_res = z

        # ---- down path ----
        z = sage([z], adjs_ref[0], w_off['down'][0], v_off['down'][0],
                 n_valid[0], True)
        z_list = [z]
        for n in range(L - 1):
            z = onehot_gather(pool_ids_ref[n], z)                 # random pooling
            z = sage([z], adjs_ref[n + 1], w_off['down'][n + 1],
                     v_off['down'][n + 1], n_valid[n + 1], True)
            z_list.append(z)

        # ---- up path ----
        for n in range(L - 1, 0, -1):
            z_up = onehot_gather(up_ids_ref[n - 1], z)            # NN upsample
            # concat([z_up, skip]) handled via the split/packed up weights
            z = sage([z_up, z_list[n - 1]], adjs_ref[n - 1],
                     w_off['up'][n - 1], v_off['up'][n - 1],
                     n_valid[n - 1], relu=(n != 1))

        if res:
            z = z + z_res

        # ---- decoder MLP ----
        z = linear(z, w_off['dec0'], v_off['dec0'], relu=True)
        z = linear(z, w_off['dec1'], v_off['dec1'], relu=False)
        o_ref[...] = z                               # lane-dense [n_pad,128] store

    return kernel


# ----------------------------------------------------------------------------
# GUNet forward: one fused pallas_call on prebuilt graph tensors
# ----------------------------------------------------------------------------

def gunet_pallas(packed, hparams, graphs, x, out_dim):
    w_all, vec_all, cfg = packed
    L = cfg['L']
    use_bn = hparams['batchnorm']
    res = hparams['res']

    n = x.shape[0]
    n_pad = graphs['n_pad']
    n_valid = tuple(graphs['n_valid'])

    # bf16 graph/feature inputs (halves the dominant DMA; MXU accumulates f32)
    x_pad = _pad2(x, n_pad, LANE).astype(jnp.bfloat16)        # [P, 128] bf16
    adjs = graphs['adjs_f32'].astype(jnp.bfloat16)            # [L, P, P] bf16
    pool_ids = graphs['pool_ids']                             # [L-1, P, 1] i32
    up_ids = graphs['up_ids']                                 # [L-1, P, 1] i32

    kernel = build_gunet_kernel(cfg, n_pad, n_valid, use_bn, res)

    # rough cost estimate for the XLA scheduler
    def mm(m, k, p):
        return 2 * m * k * p
    P = n_pad
    flops = (2 * mm(P, LANE, LANE)                                     # encoder
             + L * (mm(P, P, LANE) + 2 * mm(P, LANE, LANE))            # down SAGE
             + (L - 1) * mm(P, P, LANE)                                # pooling
             + (L - 1) * (3 * mm(P, P, LANE) + 4 * mm(P, LANE, LANE))  # up path
             + 2 * mm(P, LANE, LANE))                                  # decoder

    in_bytes = (x_pad.size * 2 + adjs.size * 2 + pool_ids.size * 4
                + up_ids.size * 4 + w_all.size * 2 + vec_all.size * 4)
    out_bytes = n_pad * LANE * 4
    # right-sized VMEM: double-buffered in/out + headroom for live activations
    # (skip tensors, in-kernel one-hots) and compiler scratch.
    vmem_limit = int(min(64 << 20, 2 * (in_bytes + out_bytes) + (8 << 20)))

    out = pl.pallas_call(
        kernel,
        grid=(1,),
        in_specs=[_full_spec(x_pad.shape), _full_spec(adjs.shape),
                  _full_spec(pool_ids.shape), _full_spec(up_ids.shape),
                  _full_spec(w_all.shape), _full_spec(vec_all.shape)],
        out_specs=_full_spec((n_pad, LANE)),
        out_shape=jax.ShapeDtypeStruct((n_pad, LANE), jnp.float32),
        compiler_params=pltpu.CompilerParams(
            dimension_semantics=("arbitrary",),
            vmem_limit_bytes=vmem_limit),
        cost_estimate=pl.CostEstimate(
            flops=int(flops),
            transcendentals=int((2 * L - 1) * LANE),
            bytes_accessed=int(in_bytes + out_bytes)),
    )(x_pad, adjs, pool_ids, up_ids, w_all, vec_all)

    return out[:n, :out_dim]


# ----------------------------------------------------------------------------
# Pure-JAX f32 reference (same graph glue) for the tolerance check
# ----------------------------------------------------------------------------

def gunet_reference(params, hparams, graphs, x):
    L = hparams['nb_scale']
    use_bn = hparams['batchnorm']
    res = hparams['res']
    n_valid = graphs['n_valid']
    adjs = [graphs['adjs_f32'][i][:n_valid[i], :n_valid[i]] for i in range(L)]
    pool_ids = graphs['pool_ids_raw']
    up_ids = graphs['up_ids_raw']

    def lin(p, h, relu):
        w, b = p
        y = jnp.dot(h, w) + b
        return jnp.maximum(y, 0.0) if relu else y

    def sage(p, h, adj, relu):
        w_self, w_nei, b, gamma, beta = p
        y = jnp.dot(h, w_self) + jnp.dot(jnp.dot(adj, h), w_nei) + b
        if use_bn:
            mean = jnp.mean(y, axis=0, keepdims=True)
            var = jnp.mean((y - mean) ** 2, axis=0, keepdims=True)
            y = (y - mean) * jax.lax.rsqrt(var + _BN_EPS) * gamma + beta
        return jnp.maximum(y, 0.0) if relu else y

    z = lin(params['enc'][0], x, True)
    z = lin(params['enc'][1], z, False)
    z_res = z
    z = sage(params['down'][0], z, adjs[0], True)
    z_list = [z]
    for n in range(L - 1):
        z = z[pool_ids[n]]
        z = sage(params['down'][n + 1], z, adjs[n + 1], True)
        z_list.append(z)
    for n in range(L - 1, 0, -1):
        z_up = z[up_ids[n - 1]]
        z = jnp.concatenate([z_up, z_list[n - 1]], axis=1)
        z = sage(params['up'][n - 1], z, adjs[n - 1], n != 1)
    if res:
        z = z + z_res
    z = lin(params['dec'][0], z, True)
    z = lin(params['dec'][1], z, False)
    return z


# ----------------------------------------------------------------------------
# Demo
# ----------------------------------------------------------------------------

if __name__ == "__main__":
    hparams = {
        'nb_scale': 3,
        'layer': 'SAGE',
        'pool': 'random',
        'pool_ratio': [0.5, 0.5],
        'list_r': [0.35, 0.55],
        'size_hidden_layers': 8,
        'max_neighbors': 8,
        'encoder': [7, 16, 8],          # last entry = dim_enc
        'batchnorm': True,
        'res': True,
    }
    N = 64
    IN_DIM = 7                          # first 2 columns are 2D positions
    OUT_DIM = 4

    root = jax.random.PRNGKey(0)
    k_pos, k_feat, k_params, k_sample = jax.random.split(root, 4)

    pos = jax.random.uniform(k_pos, (N, 2), jnp.float32)
    feat = jax.random.normal(k_feat, (N, IN_DIM - 2), jnp.float32)
    x = jnp.concatenate([pos, feat], axis=1)                 # [N, 7]

    # data.edge_index: initial graph, built here as a radius graph on positions
    adj0 = radius_adjacency(pos, 0.25, hparams['max_neighbors'])

    params = init_gunet_params(hparams, IN_DIM, OUT_DIM, k_params)
    packed = pack_gunet_params(params, hparams)

    # graph glue (cacheable across calls when positions are static)
    graphs = build_graphs(hparams, x, adj0, k_sample)

    out = gunet_pallas(packed, hparams, graphs, x, OUT_DIM)
    out = jax.block_until_ready(out)
    assert out.shape == (N, OUT_DIM)
    assert bool(jnp.all(jnp.isfinite(out)))

    # tolerance check vs. pure-JAX f32 reference (bf16 weights/adjacency ~1%)
    ref = gunet_reference(params, hparams, graphs, x)
    err = float(jnp.max(jnp.abs(out - ref)))
    scale = float(jnp.max(jnp.abs(ref))) + 1e-6
    assert err / scale < 0.08, f"kernel/reference mismatch: rel err {err / scale:.4f}"

    print("KERNEL_OK")
</pallas_src>

<mosaic_0001>
module attributes {stable_mosaic.version = 11 : i64} {
  func.func @kernel(%arg0: i32, %arg1: memref<128x128xbf16, #tpu.memory_space<vmem>>, %arg2: memref<3x128x128xbf16, #tpu.memory_space<vmem>>, %arg3: memref<2x128x1xi32, #tpu.memory_space<vmem>>, %arg4: memref<2x128x1xi32, #tpu.memory_space<vmem>>, %arg5: memref<2304x128xbf16, #tpu.memory_space<vmem>>, %arg6: memref<72x128xf32, #tpu.memory_space<vmem>>, %arg7: memref<128x128xf32, #tpu.memory_space<vmem>>) attributes {dimension_semantics = [#tpu.dimension_semantics<arbitrary>], iteration_bounds = array<i64: 1>, scalar_prefetch = 0 : i64, scratch_operands = 0 : i64, tpu.core_type = #tpu.core_type<tc>, window_params = [{pipeline_mode = #tpu.pipeline_mode<synchronous>, transform_indices = @transform_0, window_bounds = array<i64: 128, 128>}, {pipeline_mode = #tpu.pipeline_mode<synchronous>, transform_indices = @transform_1, window_bounds = array<i64: 3, 128, 128>}, {pipeline_mode = #tpu.pipeline_mode<synchronous>, transform_indices = @transform_2, window_bounds = array<i64: 2, 128, 1>}, {pipeline_mode = #tpu.pipeline_mode<synchronous>, transform_indices = @transform_3, window_bounds = array<i64: 2, 128, 1>}, {pipeline_mode = #tpu.pipeline_mode<synchronous>, transform_indices = @transform_4, window_bounds = array<i64: 2304, 128>}, {pipeline_mode = #tpu.pipeline_mode<synchronous>, transform_indices = @transform_5, window_bounds = array<i64: 72, 128>}, {pipeline_mode = #tpu.pipeline_mode<synchronous>, transform_indices = @transform_6, window_bounds = array<i64: 128, 128>}]} {
    %0 = tpu.iota {dimensions = array<i32: 0>} : vector<128x1xi32>
    %c64_i32 = arith.constant 64 : i32
    %1 = vector.broadcast %c64_i32 : i32 to vector<128x1xi32>
    %2 = arith.cmpi slt, %0, %1 : vector<128x1xi32>
    %3 = arith.extui %2 : vector<128x1xi1> to vector<128x1xi32>
    %4 = arith.sitofp %3 : vector<128x1xi32> to vector<128x1xf32>
    %c32_i32 = arith.constant 32 : i32
    %5 = vector.broadcast %c32_i32 : i32 to vector<128x1xi32>
    %6 = arith.cmpi slt, %0, %5 : vector<128x1xi32>
    %7 = arith.extui %6 : vector<128x1xi1> to vector<128x1xi32>
    %8 = arith.sitofp %7 : vector<128x1xi32> to vector<128x1xf32>
    %c16_i32 = arith.constant 16 : i32
    %9 = vector.broadcast %c16_i32 : i32 to vector<128x1xi32>
    %10 = arith.cmpi slt, %0, %9 : vector<128x1xi32>
    %11 = arith.extui %10 : vector<128x1xi1> to vector<128x1xi32>
    %12 = arith.sitofp %11 : vector<128x1xi32> to vector<128x1xf32>
    %13 = tpu.iota {dimensions = array<i32: 1>} : vector<128x128xi32>
    %c0 = arith.constant 0 : index
    %c0_0 = arith.constant 0 : index
    %14 = vector.load %arg1[%c0, %c0_0] : memref<128x128xbf16, #tpu.memory_space<vmem>>, vector<128x128xbf16>
    %c0_1 = arith.constant 0 : index
    %c0_2 = arith.constant 0 : index
    %15 = vector.load %arg5[%c0_1, %c0_2] : memref<2304x128xbf16, #tpu.memory_space<vmem>>, vector<128x128xbf16>
    %cst = arith.constant dense<0.000000e+00> : vector<128x128xf32>
    %16 = tpu.matmul %14, %15, %cst {dimension_numbers = #tpu.dot_dimension_numbers<[1], [0], [0], [1], [0, 0, 1, 1], [], []>} : vector<128x128xbf16>, vector<128x128xbf16>, vector<128x128xf32> -> vector<128x128xf32>
    %c0_3 = arith.constant 0 : index
    %c0_4 = arith.constant 0 : index
    %17 = vector.load %arg6[%c0_3, %c0_4] : memref<72x128xf32, #tpu.memory_space<vmem>>, vector<8x128xf32>
    %18 = vector.extract_strided_slice %17 {offsets = [0, 0], sizes = [1, 128], strides = [1, 1]} : vector<8x128xf32> to vector<1x128xf32>
    %19 = vector.broadcast %18 : vector<1x128xf32> to vector<128x128xf32>
    %20 = arith.addf %16, %19 : vector<128x128xf32>
    %cst_5 = arith.constant 0.000000e+00 : f32
    %21 = vector.broadcast %cst_5 : f32 to vector<128x128xf32>
    %22 = arith.maximumf %20, %21 : vector<128x128xf32>
    %c128 = arith.constant 128 : index
    %c0_6 = arith.constant 0 : index
    %23 = vector.load %arg5[%c128, %c0_6] : memref<2304x128xbf16, #tpu.memory_space<vmem>>, vector<128x128xbf16>
    %24 = arith.truncf %22 : vector<128x128xf32> to vector<128x128xbf16>
    %cst_7 = arith.constant dense<0.000000e+00> : vector<128x128xf32>
    %25 = tpu.matmul %24, %23, %cst_7 {dimension_numbers = #tpu.dot_dimension_numbers<[1], [0], [0], [1], [0, 0, 1, 1], [], []>} : vector<128x128xbf16>, vector<128x128xbf16>, vector<128x128xf32> -> vector<128x128xf32>
    %c8 = arith.constant 8 : index
    %c0_8 = arith.constant 0 : index
    %26 = vector.load %arg6[%c8, %c0_8] : memref<72x128xf32, #tpu.memory_space<vmem>>, vector<8x128xf32>
    %27 = vector.extract_strided_slice %26 {offsets = [0, 0], sizes = [1, 128], strides = [1, 1]} : vector<8x128xf32> to vector<1x128xf32>
    %28 = vector.broadcast %27 : vector<1x128xf32> to vector<128x128xf32>
    %29 = arith.addf %25, %28 : vector<128x128xf32>
    %c0_9 = arith.constant 0 : index
    %c0_10 = arith.constant 0 : index
    %c0_11 = arith.constant 0 : index
    %30 = vector.load %arg2[%c0_9, %c0_10, %c0_11] : memref<3x128x128xbf16, #tpu.memory_space<vmem>>, vector<1x128x128xbf16>
    %31 = vector.shape_cast %30 : vector<1x128x128xbf16> to vector<128x128xbf16>
    %32 = arith.truncf %29 : vector<128x128xf32> to vector<128x128xbf16>
    %cst_12 = arith.constant dense<0.000000e+00> : vector<128x128xf32>
    %33 = tpu.matmul %31, %32, %cst_12 {dimension_numbers = #tpu.dot_dimension_numbers<[1], [0], [0], [1], [0, 0, 1, 1], [], []>} : vector<128x128xbf16>, vector<128x128xbf16>, vector<128x128xf32> -> vector<128x128xf32>
    %34 = arith.truncf %33 : vector<128x128xf32> to vector<128x128xbf16>
    %c256 = arith.constant 256 : index
    %c0_13 = arith.constant 0 : index
    %35 = vector.load %arg5[%c256, %c0_13] : memref<2304x128xbf16, #tpu.memory_space<vmem>>, vector<128x128xbf16>
    %cst_14 = arith.constant dense<0.000000e+00> : vector<128x128xf32>
    %36 = tpu.matmul %32, %35, %cst_14 {dimension_numbers = #tpu.dot_dimension_numbers<[1], [0], [0], [1], [0, 0, 1, 1], [], []>} : vector<128x128xbf16>, vector<128x128xbf16>, vector<128x128xf32> -> vector<128x128xf32>
    %c384 = arith.constant 384 : index
    %c0_15 = arith.constant 0 : index
    %37 = vector.load %arg5[%c384, %c0_15] : memref<2304x128xbf16, #tpu.memory_space<vmem>>, vector<128x128xbf16>
    %cst_16 = arith.constant dense<0.000000e+00> : vector<128x128xf32>
    %38 = tpu.matmul %34, %37, %cst_16 {dimension_numbers = #tpu.dot_dimension_numbers<[1], [0], [0], [1], [0, 0, 1, 1], [], []>} : vector<128x128xbf16>, vector<128x128xbf16>, vector<128x128xf32> -> vector<128x128xf32>
    %39 = arith.addf %36, %38 : vector<128x128xf32>
    %c16 = arith.constant 16 : index
    %c0_17 = arith.constant 0 : index
    %40 = vector.load %arg6[%c16, %c0_17] : memref<72x128xf32, #tpu.memory_space<vmem>>, vector<8x128xf32>
    %41 = vector.extract_strided_slice %40 {offsets = [0, 0], sizes = [1, 128], strides = [1, 1]} : vector<8x128xf32> to vector<1x128xf32>
    %42 = vector.broadcast %41 : vector<1x128xf32> to vector<128x128xf32>
    %43 = arith.addf %39, %42 : vector<128x128xf32>
    %44 = vector.broadcast %4 : vector<128x1xf32> to vector<128x128xf32>
    %45 = arith.mulf %43, %44 : vector<128x128xf32>
    %cst_18 = arith.constant dense<0.000000e+00> : vector<128xf32>
    %46 = vector.multi_reduction <add>, %45, %cst_18 [0] : vector<128x128xf32> to vector<128xf32>
    %47 = vector.shape_cast %46 : vector<128xf32> to vector<1x128xf32>
    %cst_19 = arith.constant 1.562500e-02 : f32
    %48 = vector.broadcast %cst_19 : f32 to vector<1x128xf32>
    %49 = arith.mulf %47, %48 : vector<1x128xf32>
    %50 = vector.broadcast %49 : vector<1x128xf32> to vector<128x128xf32>
    %51 = arith.subf %45, %50 : vector<128x128xf32>
    %52 = vector.broadcast %4 : vector<128x1xf32> to vector<128x128xf32>
    %53 = arith.mulf %51, %52 : vector<128x128xf32>
    %54 = arith.mulf %53, %53 : vector<128x128xf32>
    %cst_20 = arith.constant dense<0.000000e+00> : vector<128xf32>
    %55 = vector.multi_reduction <add>, %54, %cst_20 [0] : vector<128x128xf32> to vector<128xf32>
    %56 = vector.shape_cast %55 : vector<128xf32> to vector<1x128xf32>
    %cst_21 = arith.constant 1.562500e-02 : f32
    %57 = vector.broadcast %cst_21 : f32 to vector<1x128xf32>
    %58 = arith.mulf %56, %57 : vector<1x128xf32>
    %cst_22 = arith.constant 9.99999974E-6 : f32
    %59 = vector.broadcast %cst_22 : f32 to vector<1x128xf32>
    %60 = arith.addf %58, %59 : vector<1x128xf32>
    %61 = math.rsqrt %60 : vector<1x128xf32>
    %62 = vector.broadcast %61 : vector<1x128xf32> to vector<128x128xf32>
    %63 = arith.mulf %53, %62 : vector<128x128xf32>
    %64 = vector.extract_strided_slice %40 {offsets = [1, 0], sizes = [1, 128], strides = [1, 1]} : vector<8x128xf32> to vector<1x128xf32>
    %65 = vector.broadcast %64 : vector<1x128xf32> to vector<128x128xf32>
    %66 = arith.mulf %63, %65 : vector<128x128xf32>
    %67 = vector.extract_strided_slice %40 {offsets = [2, 0], sizes = [1, 128], strides = [1, 1]} : vector<8x128xf32> to vector<1x128xf32>
    %68 = vector.broadcast %67 : vector<1x128xf32> to vector<128x128xf32>
    %69 = vector.broadcast %4 : vector<128x1xf32> to vector<128x128xf32>
    %70 = arith.mulf %68, %69 : vector<128x128xf32>
    %71 = arith.addf %66, %70 : vector<128x128xf32>
    %cst_23 = arith.constant 0.000000e+00 : f32
    %72 = vector.broadcast %cst_23 : f32 to vector<128x128xf32>
    %73 = arith.maximumf %71, %72 : vector<128x128xf32>
    %c0_24 = arith.constant 0 : index
    %c0_25 = arith.constant 0 : index
    %c0_26 = arith.constant 0 : index
    %74 = vector.load %arg3[%c0_24, %c0_25, %c0_26] : memref<2x128x1xi32, #tpu.memory_space<vmem>>, vector<1x128x1xi32>
    %75 = vector.shape_cast %74 : vector<1x128x1xi32> to vector<128x1xi32>
    %76 = vector.broadcast %75 : vector<128x1xi32> to vector<128x128xi32>
    %77 = arith.cmpi eq, %13, %76 : vector<128x128xi32>
    %78 = arith.extui %77 : vector<128x128xi1> to vector<128x128xi32>
    %79 = arith.sitofp %78 : vector<128x128xi32> to vector<128x128xf32>
    %cst_27 = arith.constant dense<0.000000e+00> : vector<128x128xf32>
    %80 = tpu.matmul %79, %73, %cst_27 {dimension_numbers = #tpu.dot_dimension_numbers<[1], [0], [0], [1], [0, 0, 1, 1], [], []>} : vector<128x128xf32>, vector<128x128xf32>, vector<128x128xf32> -> vector<128x128xf32>
    %c1 = arith.constant 1 : index
    %c0_28 = arith.constant 0 : index
    %c0_29 = arith.constant 0 : index
    %81 = vector.load %arg2[%c1, %c0_28, %c0_29] : memref<3x128x128xbf16, #tpu.memory_space<vmem>>, vector<1x128x128xbf16>
    %82 = vector.shape_cast %81 : vector<1x128x128xbf16> to vector<128x128xbf16>
    %83 = arith.truncf %80 : vector<128x128xf32> to vector<128x128xbf16>
    %cst_30 = arith.constant dense<0.000000e+00> : vector<128x128xf32>
    %84 = tpu.matmul %82, %83, %cst_30 {dimension_numbers = #tpu.dot_dimension_numbers<[1], [0], [0], [1], [0, 0, 1, 1], [], []>} : vector<128x128xbf16>, vector<128x128xbf16>, vector<128x128xf32> -> vector<128x128xf32>
    %85 = arith.truncf %84 : vector<128x128xf32> to vector<128x128xbf16>
    %c512 = arith.constant 512 : index
    %c0_31 = arith.constant 0 : index
    %86 = vector.load %arg5[%c512, %c0_31] : memref<2304x128xbf16, #tpu.memory_space<vmem>>, vector<128x128xbf16>
    %cst_32 = arith.constant dense<0.000000e+00> : vector<128x128xf32>
    %87 = tpu.matmul %83, %86, %cst_32 {dimension_numbers = #tpu.dot_dimension_numbers<[1], [0], [0], [1], [0, 0, 1, 1], [], []>} : vector<128x128xbf16>, vector<128x128xbf16>, vector<128x128xf32> -> vector<128x128xf32>
    %c640 = arith.constant 640 : index
    %c0_33 = arith.constant 0 : index
    %88 = vector.load %arg5[%c640, %c0_33] : memref<2304x128xbf16, #tpu.memory_space<vmem>>, vector<128x128xbf16>
    %cst_34 = arith.constant dense<0.000000e+00> : vector<128x128xf32>
    %89 = tpu.matmul %85, %88, %cst_34 {dimension_numbers = #tpu.dot_dimension_numbers<[1], [0], [0], [1], [0, 0, 1, 1], [], []>} : vector<128x128xbf16>, vector<128x128xbf16>, vector<128x128xf32> -> vector<128x128xf32>
    %90 = arith.addf %87, %89 : vector<128x128xf32>
    %c24 = arith.constant 24 : index
    %c0_35 = arith.constant 0 : index
    %91 = vector.load %arg6[%c24, %c0_35] : memref<72x128xf32, #tpu.memory_space<vmem>>, vector<8x128xf32>
    %92 = vector.extract_strided_slice %91 {offsets = [0, 0], sizes = [1, 128], strides = [1, 1]} : vector<8x128xf32> to vector<1x128xf32>
    %93 = vector.broadcast %92 : vector<1x128xf32> to vector<128x128xf32>
    %94 = arith.addf %90, %93 : vector<128x128xf32>
    %95 = vector.broadcast %8 : vector<128x1xf32> to vector<128x128xf32>
    %96 = arith.mulf %94, %95 : vector<128x128xf32>
    %cst_36 = arith.constant dense<0.000000e+00> : vector<128xf32>
    %97 = vector.multi_reduction <add>, %96, %cst_36 [0] : vector<128x128xf32> to vector<128xf32>
    %98 = vector.shape_cast %97 : vector<128xf32> to vector<1x128xf32>
    %cst_37 = arith.constant 3.125000e-02 : f32
    %99 = vector.broadcast %cst_37 : f32 to vector<1x128xf32>
    %100 = arith.mulf %98, %99 : vector<1x128xf32>
    %101 = vector.broadcast %100 : vector<1x128xf32> to vector<128x128xf32>
    %102 = arith.subf %96, %101 : vector<128x128xf32>
    %103 = vector.broadcast %8 : vector<128x1xf32> to vector<128x128xf32>
    %104 = arith.mulf %102, %103 : vector<128x128xf32>
    %105 = arith.mulf %104, %104 : vector<128x128xf32>
    %cst_38 = arith.constant dense<0.000000e+00> : vector<128xf32>
    %106 = vector.multi_reduction <add>, %105, %cst_38 [0] : vector<128x128xf32> to vector<128xf32>
    %107 = vector.shape_cast %106 : vector<128xf32> to vector<1x128xf32>
    %cst_39 = arith.constant 3.125000e-02 : f32
    %108 = vector.broadcast %cst_39 : f32 to vector<1x128xf32>
    %109 = arith.mulf %107, %108 : vector<1x128xf32>
    %cst_40 = arith.constant 9.99999974E-6 : f32
    %110 = vector.broadcast %cst_40 : f32 to vector<1x128xf32>
    %111 = arith.addf %109, %110 : vector<1x128xf32>
    %112 = math.rsqrt %111 : vector<1x128xf32>
    %113 = vector.broadcast %112 : vector<1x128xf32> to vector<128x128xf32>
    %114 = arith.mulf %104, %113 : vector<128x128xf32>
    %115 = vector.extract_strided_slice %91 {offsets = [1, 0], sizes = [1, 128], strides = [1, 1]} : vector<8x128xf32> to vector<1x128xf32>
    %116 = vector.broadcast %115 : vector<1x128xf32> to vector<128x128xf32>
    %117 = arith.mulf %114, %116 : vector<128x128xf32>
    %118 = vector.extract_strided_slice %91 {offsets = [2, 0], sizes = [1, 128], strides = [1, 1]} : vector<8x128xf32> to vector<1x128xf32>
    %119 = vector.broadcast %118 : vector<1x128xf32> to vector<128x128xf32>
    %120 = vector.broadcast %8 : vector<128x1xf32> to vector<128x128xf32>
    %121 = arith.mulf %119, %120 : vector<128x128xf32>
    %122 = arith.addf %117, %121 : vector<128x128xf32>
    %cst_41 = arith.constant 0.000000e+00 : f32
    %123 = vector.broadcast %cst_41 : f32 to vector<128x128xf32>
    %124 = arith.maximumf %122, %123 : vector<128x128xf32>
    %c1_42 = arith.constant 1 : index
    %c0_43 = arith.constant 0 : index
    %c0_44 = arith.constant 0 : index
    %125 = vector.load %arg3[%c1_42, %c0_43, %c0_44] : memref<2x128x1xi32, #tpu.memory_space<vmem>>, vector<1x128x1xi32>
    %126 = vector.shape_cast %125 : vector<1x128x1xi32> to vector<128x1xi32>
    %127 = vector.broadcast %126 : vector<128x1xi32> to vector<128x128xi32>
    %128 = arith.cmpi eq, %13, %127 : vector<128x128xi32>
    %129 = arith.extui %128 : vector<128x128xi1> to vector<128x128xi32>
    %130 = arith.sitofp %129 : vector<128x128xi32> to vector<128x128xf32>
    %cst_45 = arith.constant dense<0.000000e+00> : vector<128x128xf32>
    %131 = tpu.matmul %130, %124, %cst_45 {dimension_numbers = #tpu.dot_dimension_numbers<[1], [0], [0], [1], [0, 0, 1, 1], [], []>} : vector<128x128xf32>, vector<128x128xf32>, vector<128x128xf32> -> vector<128x128xf32>
    %c2 = arith.constant 2 : index
    %c0_46 = arith.constant 0 : index
    %c0_47 = arith.constant 0 : index
    %132 = vector.load %arg2[%c2, %c0_46, %c0_47] : memref<3x128x128xbf16, #tpu.memory_space<vmem>>, vector<1x128x128xbf16>
    %133 = vector.shape_cast %132 : vector<1x128x128xbf16> to vector<128x128xbf16>
    %134 = arith.truncf %131 : vector<128x128xf32> to vector<128x128xbf16>
    %cst_48 = arith.constant dense<0.000000e+00> : vector<128x128xf32>
    %135 = tpu.matmul %133, %134, %cst_48 {dimension_numbers = #tpu.dot_dimension_numbers<[1], [0], [0], [1], [0, 0, 1, 1], [], []>} : vector<128x128xbf16>, vector<128x128xbf16>, vector<128x128xf32> -> vector<128x128xf32>
    %136 = arith.truncf %135 : vector<128x128xf32> to vector<128x128xbf16>
    %c768 = arith.constant 768 : index
    %c0_49 = arith.constant 0 : index
    %137 = vector.load %arg5[%c768, %c0_49] : memref<2304x128xbf16, #tpu.memory_space<vmem>>, vector<128x128xbf16>
    %cst_50 = arith.constant dense<0.000000e+00> : vector<128x128xf32>
    %138 = tpu.matmul %134, %137, %cst_50 {dimension_numbers = #tpu.dot_dimension_numbers<[1], [0], [0], [1], [0, 0, 1, 1], [], []>} : vector<128x128xbf16>, vector<128x128xbf16>, vector<128x128xf32> -> vector<128x128xf32>
    %c896 = arith.constant 896 : index
    %c0_51 = arith.constant 0 : index
    %139 = vector.load %arg5[%c896, %c0_51] : memref<2304x128xbf16, #tpu.memory_space<vmem>>, vector<128x128xbf16>
    %cst_52 = arith.constant dense<0.000000e+00> : vector<128x128xf32>
    %140 = tpu.matmul %136, %139, %cst_52 {dimension_numbers = #tpu.dot_dimension_numbers<[1], [0], [0], [1], [0, 0, 1, 1], [], []>} : vector<128x128xbf16>, vector<128x128xbf16>, vector<128x128xf32> -> vector<128x128xf32>
    %141 = arith.addf %138, %140 : vector<128x128xf32>
    %c32 = arith.constant 32 : index
    %c0_53 = arith.constant 0 : index
    %142 = vector.load %arg6[%c32, %c0_53] : memref<72x128xf32, #tpu.memory_space<vmem>>, vector<8x128xf32>
    %143 = vector.extract_strided_slice %142 {offsets = [0, 0], sizes = [1, 128], strides = [1, 1]} : vector<8x128xf32> to vector<1x128xf32>
    %144 = vector.broadcast %143 : vector<1x128xf32> to vector<128x128xf32>
    %145 = arith.addf %141, %144 : vector<128x128xf32>
    %146 = vector.broadcast %12 : vector<128x1xf32> to vector<128x128xf32>
    %147 = arith.mulf %145, %146 : vector<128x128xf32>
    %cst_54 = arith.constant dense<0.000000e+00> : vector<128xf32>
    %148 = vector.multi_reduction <add>, %147, %cst_54 [0] : vector<128x128xf32> to vector<128xf32>
    %149 = vector.shape_cast %148 : vector<128xf32> to vector<1x128xf32>
    %cst_55 = arith.constant 6.250000e-02 : f32
    %150 = vector.broadcast %cst_55 : f32 to vector<1x128xf32>
    %151 = arith.mulf %149, %150 : vector<1x128xf32>
    %152 = vector.broadcast %151 : vector<1x128xf32> to vector<128x128xf32>
    %153 = arith.subf %147, %152 : vector<128x128xf32>
    %154 = vector.broadcast %12 : vector<128x1xf32> to vector<128x128xf32>
    %155 = arith.mulf %153, %154 : vector<128x128xf32>
    %156 = arith.mulf %155, %155 : vector<128x128xf32>
    %cst_56 = arith.constant dense<0.000000e+00> : vector<128xf32>
    %157 = vector.multi_reduction <add>, %156, %cst_56 [0] : vector<128x128xf32> to vector<128xf32>
    %158 = vector.shape_cast %157 : vector<128xf32> to vector<1x128xf32>
    %cst_57 = arith.constant 6.250000e-02 : f32
    %159 = vector.broadcast %cst_57 : f32 to vector<1x128xf32>
    %160 = arith.mulf %158, %159 : vector<1x128xf32>
    %cst_58 = arith.constant 9.99999974E-6 : f32
    %161 = vector.broadcast %cst_58 : f32 to vector<1x128xf32>
    %162 = arith.addf %160, %161 : vector<1x128xf32>
    %163 = math.rsqrt %162 : vector<1x128xf32>
    %164 = vector.broadcast %163 : vector<1x128xf32> to vector<128x128xf32>
    %165 = arith.mulf %155, %164 : vector<128x128xf32>
    %166 = vector.extract_strided_slice %142 {offsets = [1, 0], sizes = [1, 128], strides = [1, 1]} : vector<8x128xf32> to vector<1x128xf32>
    %167 = vector.broadcast %166 : vector<1x128xf32> to vector<128x128xf32>
    %168 = arith.mulf %165, %167 : vector<128x128xf32>
    %169 = vector.extract_strided_slice %142 {offsets = [2, 0], sizes = [1, 128], strides = [1, 1]} : vector<8x128xf32> to vector<1x128xf32>
    %170 = vector.broadcast %169 : vector<1x128xf32> to vector<128x128xf32>
    %171 = vector.broadcast %12 : vector<128x1xf32> to vector<128x128xf32>
    %172 = arith.mulf %170, %171 : vector<128x128xf32>
    %173 = arith.addf %168, %172 : vector<128x128xf32>
    %cst_59 = arith.constant 0.000000e+00 : f32
    %174 = vector.broadcast %cst_59 : f32 to vector<128x128xf32>
    %175 = arith.maximumf %173, %174 : vector<128x128xf32>
    %c1_60 = arith.constant 1 : index
    %c0_61 = arith.constant 0 : index
    %c0_62 = arith.constant 0 : index
    %176 = vector.load %arg4[%c1_60, %c0_61, %c0_62] : memref<2x128x1xi32, #tpu.memory_space<vmem>>, vector<1x128x1xi32>
    %177 = vector.shape_cast %176 : vector<1x128x1xi32> to vector<128x1xi32>
    %178 = vector.broadcast %177 : vector<128x1xi32> to vector<128x128xi32>
    %179 = arith.cmpi eq, %13, %178 : vector<128x128xi32>
    %180 = arith.extui %179 : vector<128x128xi1> to vector<128x128xi32>
    %181 = arith.sitofp %180 : vector<128x128xi32> to vector<128x128xf32>
    %cst_63 = arith.constant dense<0.000000e+00> : vector<128x128xf32>
    %182 = tpu.matmul %181, %175, %cst_63 {dimension_numbers = #tpu.dot_dimension_numbers<[1], [0], [0], [1], [0, 0, 1, 1], [], []>} : vector<128x128xf32>, vector<128x128xf32>, vector<128x128xf32> -> vector<128x128xf32>
    %c1_64 = arith.constant 1 : index
    %c0_65 = arith.constant 0 : index
    %c0_66 = arith.constant 0 : index
    %183 = vector.load %arg2[%c1_64, %c0_65, %c0_66] : memref<3x128x128xbf16, #tpu.memory_space<vmem>>, vector<1x128x128xbf16>
    %184 = vector.shape_cast %183 : vector<1x128x128xbf16> to vector<128x128xbf16>
    %185 = arith.truncf %182 : vector<128x128xf32> to vector<128x128xbf16>
    %186 = arith.truncf %124 : vector<128x128xf32> to vector<128x128xbf16>
    %cst_67 = arith.constant dense<0.000000e+00> : vector<128x128xf32>
    %187 = tpu.matmul %184, %185, %cst_67 {dimension_numbers = #tpu.dot_dimension_numbers<[1], [0], [0], [1], [0, 0, 1, 1], [], []>} : vector<128x128xbf16>, vector<128x128xbf16>, vector<128x128xf32> -> vector<128x128xf32>
    %188 = arith.truncf %187 : vector<128x128xf32> to vector<128x128xbf16>
    %cst_68 = arith.constant dense<0.000000e+00> : vector<128x128xf32>
    %189 = tpu.matmul %184, %186, %cst_68 {dimension_numbers = #tpu.dot_dimension_numbers<[1], [0], [0], [1], [0, 0, 1, 1], [], []>} : vector<128x128xbf16>, vector<128x128xbf16>, vector<128x128xf32> -> vector<128x128xf32>
    %190 = arith.truncf %189 : vector<128x128xf32> to vector<128x128xbf16>
    %c1536 = arith.constant 1536 : index
    %c0_69 = arith.constant 0 : index
    %191 = vector.load %arg5[%c1536, %c0_69] : memref<2304x128xbf16, #tpu.memory_space<vmem>>, vector<128x128xbf16>
    %cst_70 = arith.constant dense<0.000000e+00> : vector<128x128xf32>
    %192 = tpu.matmul %185, %191, %cst_70 {dimension_numbers = #tpu.dot_dimension_numbers<[1], [0], [0], [1], [0, 0, 1, 1], [], []>} : vector<128x128xbf16>, vector<128x128xbf16>, vector<128x128xf32> -> vector<128x128xf32>
    %c1664 = arith.constant 1664 : index
    %c0_71 = arith.constant 0 : index
    %193 = vector.load %arg5[%c1664, %c0_71] : memref<2304x128xbf16, #tpu.memory_space<vmem>>, vector<128x128xbf16>
    %cst_72 = arith.constant dense<0.000000e+00> : vector<128x128xf32>
    %194 = tpu.matmul %186, %193, %cst_72 {dimension_numbers = #tpu.dot_dimension_numbers<[1], [0], [0], [1], [0, 0, 1, 1], [], []>} : vector<128x128xbf16>, vector<128x128xbf16>, vector<128x128xf32> -> vector<128x128xf32>
    %195 = arith.addf %192, %194 : vector<128x128xf32>
    %c1792 = arith.constant 1792 : index
    %c0_73 = arith.constant 0 : index
    %196 = vector.load %arg5[%c1792, %c0_73] : memref<2304x128xbf16, #tpu.memory_space<vmem>>, vector<128x128xbf16>
    %cst_74 = arith.constant dense<0.000000e+00> : vector<128x128xf32>
    %197 = tpu.matmul %188, %196, %cst_74 {dimension_numbers = #tpu.dot_dimension_numbers<[1], [0], [0], [1], [0, 0, 1, 1], [], []>} : vector<128x128xbf16>, vector<128x128xbf16>, vector<128x128xf32> -> vector<128x128xf32>
    %198 = arith.addf %195, %197 : vector<128x128xf32>
    %c1920 = arith.constant 1920 : index
    %c0_75 = arith.constant 0 : index
    %199 = vector.load %arg5[%c1920, %c0_75] : memref<2304x128xbf16, #tpu.memory_space<vmem>>, vector<128x128xbf16>
    %cst_76 = arith.constant dense<0.000000e+00> : vector<128x128xf32>
    %200 = tpu.matmul %190, %199, %cst_76 {dimension_numbers = #tpu.dot_dimension_numbers<[1], [0], [0], [1], [0, 0, 1, 1], [], []>} : vector<128x128xbf16>, vector<128x128xbf16>, vector<128x128xf32> -> vector<128x128xf32>
    %201 = arith.addf %198, %200 : vector<128x128xf32>
    %c48 = arith.constant 48 : index
    %c0_77 = arith.constant 0 : index
    %202 = vector.load %arg6[%c48, %c0_77] : memref<72x128xf32, #tpu.memory_space<vmem>>, vector<8x128xf32>
    %203 = vector.extract_strided_slice %202 {offsets = [0, 0], sizes = [1, 128], strides = [1, 1]} : vector<8x128xf32> to vector<1x128xf32>
    %204 = vector.broadcast %203 : vector<1x128xf32> to vector<128x128xf32>
    %205 = arith.addf %201, %204 : vector<128x128xf32>
    %206 = vector.broadcast %8 : vector<128x1xf32> to vector<128x128xf32>
    %207 = arith.mulf %205, %206 : vector<128x128xf32>
    %cst_78 = arith.constant dense<0.000000e+00> : vector<128xf32>
    %208 = vector.multi_reduction <add>, %207, %cst_78 [0] : vector<128x128xf32> to vector<128xf32>
    %209 = vector.shape_cast %208 : vector<128xf32> to vector<1x128xf32>
    %cst_79 = arith.constant 3.125000e-02 : f32
    %210 = vector.broadcast %cst_79 : f32 to vector<1x128xf32>
    %211 = arith.mulf %209, %210 : vector<1x128xf32>
    %212 = vector.broadcast %211 : vector<1x128xf32> to vector<128x128xf32>
    %213 = arith.subf %207, %212 : vector<128x128xf32>
    %214 = vector.broadcast %8 : vector<128x1xf32> to vector<128x128xf32>
    %215 = arith.mulf %213, %214 : vector<128x128xf32>
    %216 = arith.mulf %215, %215 : vector<128x128xf32>
    %cst_80 = arith.constant dense<0.000000e+00> : vector<128xf32>
    %217 = vector.multi_reduction <add>, %216, %cst_80 [0] : vector<128x128xf32> to vector<128xf32>
    %218 = vector.shape_cast %217 : vector<128xf32> to vector<1x128xf32>
    %cst_81 = arith.constant 3.125000e-02 : f32
    %219 = vector.broadcast %cst_81 : f32 to vector<1x128xf32>
    %220 = arith.mulf %218, %219 : vector<1x128xf32>
    %cst_82 = arith.constant 9.99999974E-6 : f32
    %221 = vector.broadcast %cst_82 : f32 to vector<1x128xf32>
    %222 = arith.addf %220, %221 : vector<1x128xf32>
    %223 = math.rsqrt %222 : vector<1x128xf32>
    %224 = vector.broadcast %223 : vector<1x128xf32> to vector<128x128xf32>
    %225 = arith.mulf %215, %224 : vector<128x128xf32>
    %226 = vector.extract_strided_slice %202 {offsets = [1, 0], sizes = [1, 128], strides = [1, 1]} : vector<8x128xf32> to vector<1x128xf32>
    %227 = vector.broadcast %226 : vector<1x128xf32> to vector<128x128xf32>
    %228 = arith.mulf %225, %227 : vector<128x128xf32>
    %229 = vector.extract_strided_slice %202 {offsets = [2, 0], sizes = [1, 128], strides = [1, 1]} : vector<8x128xf32> to vector<1x128xf32>
    %230 = vector.broadcast %229 : vector<1x128xf32> to vector<128x128xf32>
    %231 = vector.broadcast %8 : vector<128x1xf32> to vector<128x128xf32>
    %232 = arith.mulf %230, %231 : vector<128x128xf32>
    %233 = arith.addf %228, %232 : vector<128x128xf32>
    %cst_83 = arith.constant 0.000000e+00 : f32
    %234 = vector.broadcast %cst_83 : f32 to vector<128x128xf32>
    %235 = arith.maximumf %233, %234 : vector<128x128xf32>
    %c0_84 = arith.constant 0 : index
    %c0_85 = arith.constant 0 : index
    %c0_86 = arith.constant 0 : index
    %236 = vector.load %arg4[%c0_84, %c0_85, %c0_86] : memref<2x128x1xi32, #tpu.memory_space<vmem>>, vector<1x128x1xi32>
    %237 = vector.shape_cast %236 : vector<1x128x1xi32> to vector<128x1xi32>
    %238 = vector.broadcast %237 : vector<128x1xi32> to vector<128x128xi32>
    %239 = arith.cmpi eq, %13, %238 : vector<128x128xi32>
    %240 = arith.extui %239 : vector<128x128xi1> to vector<128x128xi32>
    %241 = arith.sitofp %240 : vector<128x128xi32> to vector<128x128xf32>
    %cst_87 = arith.constant dense<0.000000e+00> : vector<128x128xf32>
    %242 = tpu.matmul %241, %235, %cst_87 {dimension_numbers = #tpu.dot_dimension_numbers<[1], [0], [0], [1], [0, 0, 1, 1], [], []>} : vector<128x128xf32>, vector<128x128xf32>, vector<128x128xf32> -> vector<128x128xf32>
    %c0_88 = arith.constant 0 : index
    %c0_89 = arith.constant 0 : index
    %c0_90 = arith.constant 0 : index
    %243 = vector.load %arg2[%c0_88, %c0_89, %c0_90] : memref<3x128x128xbf16, #tpu.memory_space<vmem>>, vector<1x128x128xbf16>
    %244 = vector.shape_cast %243 : vector<1x128x128xbf16> to vector<128x128xbf16>
    %245 = arith.truncf %242 : vector<128x128xf32> to vector<128x128xbf16>
    %246 = arith.truncf %73 : vector<128x128xf32> to vector<128x128xbf16>
    %cst_91 = arith.constant dense<0.000000e+00> : vector<128x128xf32>
    %247 = tpu.matmul %244, %245, %cst_91 {dimension_numbers = #tpu.dot_dimension_numbers<[1], [0], [0], [1], [0, 0, 1, 1], [], []>} : vector<128x128xbf16>, vector<128x128xbf16>, vector<128x128xf32> -> vector<128x128xf32>
    %248 = arith.truncf %247 : vector<128x128xf32> to vector<128x128xbf16>
    %cst_92 = arith.constant dense<0.000000e+00> : vector<128x128xf32>
    %249 = tpu.matmul %244, %246, %cst_92 {dimension_numbers = #tpu.dot_dimension_numbers<[1], [0], [0], [1], [0, 0, 1, 1], [], []>} : vector<128x128xbf16>, vector<128x128xbf16>, vector<128x128xf32> -> vector<128x128xf32>
    %250 = arith.truncf %249 : vector<128x128xf32> to vector<128x128xbf16>
    %c1024 = arith.constant 1024 : index
    %c0_93 = arith.constant 0 : index
    %251 = vector.load %arg5[%c1024, %c0_93] : memref<2304x128xbf16, #tpu.memory_space<vmem>>, vector<128x128xbf16>
    %cst_94 = arith.constant dense<0.000000e+00> : vector<128x128xf32>
    %252 = tpu.matmul %245, %251, %cst_94 {dimension_numbers = #tpu.dot_dimension_numbers<[1], [0], [0], [1], [0, 0, 1, 1], [], []>} : vector<128x128xbf16>, vector<128x128xbf16>, vector<128x128xf32> -> vector<128x128xf32>
    %c1152 = arith.constant 1152 : index
    %c0_95 = arith.constant 0 : index
    %253 = vector.load %arg5[%c1152, %c0_95] : memref<2304x128xbf16, #tpu.memory_space<vmem>>, vector<128x128xbf16>
    %cst_96 = arith.constant dense<0.000000e+00> : vector<128x128xf32>
    %254 = tpu.matmul %246, %253, %cst_96 {dimension_numbers = #tpu.dot_dimension_numbers<[1], [0], [0], [1], [0, 0, 1, 1], [], []>} : vector<128x128xbf16>, vector<128x128xbf16>, vector<128x128xf32> -> vector<128x128xf32>
    %255 = arith.addf %252, %254 : vector<128x128xf32>
    %c1280 = arith.constant 1280 : index
    %c0_97 = arith.constant 0 : index
    %256 = vector.load %arg5[%c1280, %c0_97] : memref<2304x128xbf16, #tpu.memory_space<vmem>>, vector<128x128xbf16>
    %cst_98 = arith.constant dense<0.000000e+00> : vector<128x128xf32>
    %257 = tpu.matmul %248, %256, %cst_98 {dimension_numbers = #tpu.dot_dimension_numbers<[1], [0], [0], [1], [0, 0, 1, 1], [], []>} : vector<128x128xbf16>, vector<128x128xbf16>, vector<128x128xf32> -> vector<128x128xf32>
    %258 = arith.addf %255, %257 : vector<128x128xf32>
    %c1408 = arith.constant 1408 : index
    %c0_99 = arith.constant 0 : index
    %259 = vector.load %arg5[%c1408, %c0_99] : memref<2304x128xbf16, #tpu.memory_space<vmem>>, vector<128x128xbf16>
    %cst_100 = arith.constant dense<0.000000e+00> : vector<128x128xf32>
    %260 = tpu.matmul %250, %259, %cst_100 {dimension_numbers = #tpu.dot_dimension_numbers<[1], [0], [0], [1], [0, 0, 1, 1], [], []>} : vector<128x128xbf16>, vector<128x128xbf16>, vector<128x128xf32> -> vector<128x128xf32>
    %261 = arith.addf %258, %260 : vector<128x128xf32>
    %c40 = arith.constant 40 : index
    %c0_101 = arith.constant 0 : index
    %262 = vector.load %arg6[%c40, %c0_101] : memref<72x128xf32, #tpu.memory_space<vmem>>, vector<8x128xf32>
    %263 = vector.extract_strided_slice %262 {offsets = [0, 0], sizes = [1, 128], strides = [1, 1]} : vector<8x128xf32> to vector<1x128xf32>
    %264 = vector.broadcast %263 : vector<1x128xf32> to vector<128x128xf32>
    %265 = arith.addf %261, %264 : vector<128x128xf32>
    %266 = vector.broadcast %4 : vector<128x1xf32> to vector<128x128xf32>
    %267 = arith.mulf %265, %266 : vector<128x128xf32>
    %cst_102 = arith.constant dense<0.000000e+00> : vector<128xf32>
    %268 = vector.multi_reduction <add>, %267, %cst_102 [0] : vector<128x128xf32> to vector<128xf32>
    %269 = vector.shape_cast %268 : vector<128xf32> to vector<1x128xf32>
    %cst_103 = arith.constant 1.562500e-02 : f32
    %270 = vector.broadcast %cst_103 : f32 to vector<1x128xf32>
    %271 = arith.mulf %269, %270 : vector<1x128xf32>
    %272 = vector.broadcast %271 : vector<1x128xf32> to vector<128x128xf32>
    %273 = arith.subf %267, %272 : vector<128x128xf32>
    %274 = vector.broadcast %4 : vector<128x1xf32> to vector<128x128xf32>
    %275 = arith.mulf %273, %274 : vector<128x128xf32>
    %276 = arith.mulf %275, %275 : vector<128x128xf32>
    %cst_104 = arith.constant dense<0.000000e+00> : vector<128xf32>
    %277 = vector.multi_reduction <add>, %276, %cst_104 [0] : vector<128x128xf32> to vector<128xf32>
    %278 = vector.shape_cast %277 : vector<128xf32> to vector<1x128xf32>
    %cst_105 = arith.constant 1.562500e-02 : f32
    %279 = vector.broadcast %cst_105 : f32 to vector<1x128xf32>
    %280 = arith.mulf %278, %279 : vector<1x128xf32>
    %cst_106 = arith.constant 9.99999974E-6 : f32
    %281 = vector.broadcast %cst_106 : f32 to vector<1x128xf32>
    %282 = arith.addf %280, %281 : vector<1x128xf32>
    %283 = math.rsqrt %282 : vector<1x128xf32>
    %284 = vector.broadcast %283 : vector<1x128xf32> to vector<128x128xf32>
    %285 = arith.mulf %275, %284 : vector<128x128xf32>
    %286 = vector.extract_strided_slice %262 {offsets = [1, 0], sizes = [1, 128], strides = [1, 1]} : vector<8x128xf32> to vector<1x128xf32>
    %287 = vector.broadcast %286 : vector<1x128xf32> to vector<128x128xf32>
    %288 = arith.mulf %285, %287 : vector<128x128xf32>
    %289 = vector.extract_strided_slice %262 {offsets = [2, 0], sizes = [1, 128], strides = [1, 1]} : vector<8x128xf32> to vector<1x128xf32>
    %290 = vector.broadcast %289 : vector<1x128xf32> to vector<128x128xf32>
    %291 = vector.broadcast %4 : vector<128x1xf32> to vector<128x128xf32>
    %292 = arith.mulf %290, %291 : vector<128x128xf32>
    %293 = arith.addf %288, %292 : vector<128x128xf32>
    %294 = arith.addf %293, %29 : vector<128x128xf32>
    %c2048 = arith.constant 2048 : index
    %c0_107 = arith.constant 0 : index
    %295 = vector.load %arg5[%c2048, %c0_107] : memref<2304x128xbf16, #tpu.memory_space<vmem>>, vector<128x128xbf16>
    %296 = arith.truncf %294 : vector<128x128xf32> to vector<128x128xbf16>
    %cst_108 = arith.constant dense<0.000000e+00> : vector<128x128xf32>
    %297 = tpu.matmul %296, %295, %cst_108 {dimension_numbers = #tpu.dot_dimension_numbers<[1], [0], [0], [1], [0, 0, 1, 1], [], []>} : vector<128x128xbf16>, vector<128x128xbf16>, vector<128x128xf32> -> vector<128x128xf32>
    %c56 = arith.constant 56 : index
    %c0_109 = arith.constant 0 : index
    %298 = vector.load %arg6[%c56, %c0_109] : memref<72x128xf32, #tpu.memory_space<vmem>>, vector<8x128xf32>
    %299 = vector.extract_strided_slice %298 {offsets = [0, 0], sizes = [1, 128], strides = [1, 1]} : vector<8x128xf32> to vector<1x128xf32>
    %300 = vector.broadcast %299 : vector<1x128xf32> to vector<128x128xf32>
    %301 = arith.addf %297, %300 : vector<128x128xf32>
    %cst_110 = arith.constant 0.000000e+00 : f32
    %302 = vector.broadcast %cst_110 : f32 to vector<128x128xf32>
    %303 = arith.maximumf %301, %302 : vector<128x128xf32>
    %c2176 = arith.constant 2176 : index
    %c0_111 = arith.constant 0 : index
    %304 = vector.load %arg5[%c2176, %c0_111] : memref<2304x128xbf16, #tpu.memory_space<vmem>>, vector<128x128xbf16>
    %305 = arith.truncf %303 : vector<128x128xf32> to vector<128x128xbf16>
    %cst_112 = arith.constant dense<0.000000e+00> : vector<128x128xf32>
    %306 = tpu.matmul %305, %304, %cst_112 {dimension_numbers = #tpu.dot_dimension_numbers<[1], [0], [0], [1], [0, 0, 1, 1], [], []>} : vector<128x128xbf16>, vector<128x128xbf16>, vector<128x128xf32> -> vector<128x128xf32>
    %c64 = arith.constant 64 : index
    %c0_113 = arith.constant 0 : index
    %307 = vector.load %arg6[%c64, %c0_113] : memref<72x128xf32, #tpu.memory_space<vmem>>, vector<8x128xf32>
    %308 = vector.extract_strided_slice %307 {offsets = [0, 0], sizes = [1, 128], strides = [1, 1]} : vector<8x128xf32> to vector<1x128xf32>
    %309 = vector.broadcast %308 : vector<1x128xf32> to vector<128x128xf32>
    %310 = arith.addf %306, %309 : vector<128x128xf32>
    %c0_114 = arith.constant 0 : index
    %c0_115 = arith.constant 0 : index
    %311 = vector.load %arg7[%c0_114, %c0_115] : memref<128x128xf32, #tpu.memory_space<vmem>>, vector<128x128xf32>
    tpu.vector_store %arg7[%c0_114, %c0_115], %310 {strides = array<i32>} : memref<128x128xf32, #tpu.memory_space<vmem>>, vector<128x128xf32>,
    return
  }
  func.func @transform_0(%arg0: i32) -> (i32, i32) {
    %c0_i32 = arith.constant 0 : i32
    %c0_i32_0 = arith.constant 0 : i32
    %c0_i32_1 = arith.constant 0 : i32
    return %c0_i32, %c0_i32_0 : i32, i32
  }
  func.func @transform_1(%arg0: i32) -> (i32, i32, i32) {
    %c0_i32 = arith.constant 0 : i32
    %c0_i32_0 = arith.constant 0 : i32
    %c0_i32_1 = arith.constant 0 : i32
    %c0_i32_2 = arith.constant 0 : i32
    return %c0_i32, %c0_i32_0, %c0_i32_1 : i32, i32, i32
  }
  func.func @transform_2(%arg0: i32) -> (i32, i32, i32) {
    %c0_i32 = arith.constant 0 : i32
    %c0_i32_0 = arith.constant 0 : i32
    %c0_i32_1 = arith.constant 0 : i32
    %c0_i32_2 = arith.constant 0 : i32
    return %c0_i32, %c0_i32_0, %c0_i32_1 : i32, i32, i32
  }
  func.func @transform_3(%arg0: i32) -> (i32, i32, i32) {
    %c0_i32 = arith.constant 0 : i32
    %c0_i32_0 = arith.constant 0 : i32
    %c0_i32_1 = arith.constant 0 : i32
    %c0_i32_2 = arith.constant 0 : i32
    return %c0_i32, %c0_i32_0, %c0_i32_1 : i32, i32, i32
  }
  func.func @transform_4(%arg0: i32) -> (i32, i32) {
    %c0_i32 = arith.constant 0 : i32
    %c0_i32_0 = arith.constant 0 : i32
    %c0_i32_1 = arith.constant 0 : i32
    return %c0_i32, %c0_i32_0 : i32, i32
  }
  func.func @transform_5(%arg0: i32) -> (i32, i32) {
    %c0_i32 = arith.constant 0 : i32
    %c0_i32_0 = arith.constant 0 : i32
    %c0_i32_1 = arith.constant 0 : i32
    return %c0_i32, %c0_i32_0 : i32, i32
  }
  func.func @transform_6(%arg0: i32) -> (i32, i32) {
    %c0_i32 = arith.constant 0 : i32
    %c0_i32_0 = arith.constant 0 : i32
    %c0_i32_1 = arith.constant 0 : i32
    return %c0_i32, %c0_i32_0 : i32, i32
  }
}

</mosaic_0001>

<bundles_post_ra>
// kernel: tpu_custom_call.1
= control target key start
LH: loop header
LB: loop body
LE: loop exit
PB: predicated region body
PF: predicated region fallthrough
CT: control target
= control target key end

     0   :  { %11 = vsyncpa [#allocation3], 0  ;;  %s10545_s0 = inlined_call_operand.vmem [shape: bf16[128,128], index: 0, kind: input, shape index: {}]   ;;  %s10546_s1 = inlined_call_operand.vmem [shape: bf16[3,128,128], index: 1, kind: input, shape index: {}]   ;;  %s10547_s2 = inlined_call_operand.vmem [shape: s32[2,128,1], index: 2, kind: input, shape index: {}]   ;;  %s10548_s3 = inlined_call_operand.vmem [shape: s32[2,128,1], index: 3, kind: input, shape index: {}]   ;;  %s10549_s4 = inlined_call_operand.hbm [shape: bf16[2304,128], index: 4, kind: input, shape index: {}]   ;;  %s10550_s5 = inlined_call_operand.vmem [shape: f32[72,128], index: 5, kind: input, shape index: {}]   ;;  %s10551_s6 = inlined_call_operand.hbm [shape: f32[128,128], index: 6, kind: output, shape index: {}]  }
   0x1   :  { %12 = vsyncpa [#allocation4], 0  ;;  %s8899_s21 = smov [#allocation2]   ;;  %s8851_s25 = scalar_lea.hbm %s10549_s4, 18432 }
   0x2   :  { %s26_s22 = sshll.u32 %s8899_s21, 4  ;;  %p8852_p0 = scmp.ne.s32.totalorder %s10549_s4, %s8851_s25  ;;  %s27_s22 = int_to_ptr.vmem [resolvable:$true] %s26_s22 }
   0x3   :  { %p8855_p1 = scmp.lt.u32.totalorder %s8851_s25, %s10549_s4 }
   0x5   :  { %p8857_p2 = pnand %p8855_p1, %p8852_p0 }
   0x7   :  { %8860 = shalt.err (!%p8857_p2)
}
   0x8   :  { %s8861_s30 = scalar_lea.vmem %s27_s22, 18432  ;;  %p8866_p4 = scmp.lt.s32.totalorder %s27_s22, %s27_s22 }
   0x9   :  { %p8862_p3 = scmp.ne.s32.totalorder %s27_s22, %s8861_s30  ;;  %p8867_p5 = scmp.lt.s32.totalorder %s8861_s30, %s8861_s30 }
   0xb   :  { %p8868_p6 = por %p8867_p5, %p8866_p4 }
   0xd   :  { %p8869_p7 = pnand %p8868_p6, %p8862_p3 }
   0xf   :  { %8872 = shalt.err (!%p8869_p7)
}
  0x10   :  { %s8900_s7 = smov 64   ;;  %s8901_s8 = smov 4  }
  0x11   :  { %32 = dma.hbm_to_vmem [thread:$0]  %s10549_s4, 18432, %s27_s22, [#allocation3], %s8900_s7, %s8900_s7, %s8901_s8  }
  0x12   :  { %8895 = dma.done.wait [#allocation3], 18432  }
  0x13   :  { %8896 = vsyncadd [#allocation3], 4294948864  ;;  %v8649_v0 = vld [vmem:[#allocation2] sm:$0xff]   ;;  %v8650_v1 = vld [vmem:[#allocation2 + $0x8] sm:$0xff]   ;;  %v200_v24 = vlaneseq }
  0x14   :  { %7343 = vmatprep.subr.bf16.mxu0 %v8649_v0  ;;  %v8651_v2 = vld [vmem:[#allocation2 + $0x10] sm:$0xff]   ;;  %v8652_v3 = vld [vmem:[#allocation2 + $0x18] sm:$0xff]   ;;  %v8657_v4 = vld [vmem:[%s10545_s0] sm:$0xff]  }
  0x15   :  { %7344 = vmatpush3.bf16.msra.mxu0 %v8649_v0  ;;  %7359 = vmatprep.mubr.bf16.mxu0 %v8657_v4  ;;  %v8653_v5 = vld [vmem:[#allocation2 + $0x20] sm:$0xff]   ;;  %v8654_v6 = vld [vmem:[#allocation2 + $0x28] sm:$0xff]   ;;  %v8655_v9 = vld [vmem:[#allocation2 + $0x30] sm:$0xff]   ;;  %v8979_v25 = vshrl.u32 %v200_v24, 7 }
  0x16   :  { %7345 = vmatprep.subr.bf16.mxu0 %v8650_v1  ;;  %v8665_v7 = vld [vmem:[#allocation2 + $0x40] sm:$0xff]   ;;  %v8666_v8 = vld [vmem:[#allocation2 + $0x48] sm:$0xff]   ;;  %v8667_v10 = vld [vmem:[#allocation2 + $0x50] sm:$0xff]  }
  0x17   :  { %7375 = vmatprep.subr.bf16.mxu1 %v8665_v7  ;;  %v8656_v11 = vld [vmem:[#allocation2 + $0x38] sm:$0xff]   ;;  %v8669_v13 = vld [vmem:[#allocation2 + $0x60] sm:$0xff]   ;;  %v8658_v14 = vld [vmem:[%s10545_s0 + $0x8] sm:$0xff]   ;;  %v8982_v26 = vsub.s32 0, %v8979_v25 }
  0x18   :  { %7376 = vmatpush3.bf16.msra.mxu1 %v8665_v7  ;;  %v8668_v12 = vld [vmem:[#allocation2 + $0x58] sm:$0xff]   ;;  %v8659_v15 = vld [vmem:[%s10545_s0 + $0x10] sm:$0xff]   ;;  %v8670_v16 = vld [vmem:[#allocation2 + $0x68] sm:$0xff]  }
  0x19   :  { %7346 = vmatpush3.bf16.msra.mxu0 %v8650_v1  ;;  %7377 = vmatprep.subr.bf16.mxu1 %v8666_v8  ;;  %v8660_v17 = vld [vmem:[%s10545_s0 + $0x18] sm:$0xff]   ;;  %v8661_v18 = vld [vmem:[%s10545_s0 + $0x20] sm:$0xff]   ;;  %v8662_v19 = vld [vmem:[%s10545_s0 + $0x28] sm:$0xff]   ;;  %10589 = vst [vmem:[#allocation8_spill] sm:$0xff] %v8982_v26 }
  0x1a   :  { %7347 = vmatprep.subr.bf16.mxu0 %v8651_v2  ;;  %v8663_v20 = vld [vmem:[%s10545_s0 + $0x30] sm:$0xff]   ;;  %v8664_v21 = vld [vmem:[%s10545_s0 + $0x38] sm:$0xff]   ;;  %v234_v27 = vld [vmem:[%s10550_s5] sm:$0xff] }
  0x1b   :  { %v8671_v22 = vld [vmem:[#allocation2 + $0x70] sm:$0xff]   ;;  %v8672_v23 = vld [vmem:[#allocation2 + $0x78] sm:$0xff]   ;;  %v238_v28 = vrot.slane %v234_v27, %v8982_v26 }
  0x1c   :  { %7378 = vmatpush3.bf16.msra.mxu1 %v8666_v8  ;;  %v8683_v27 = vld [vmem:[#allocation2 + $0xd0] sm:$0xff]  }
  0x1d   :  { %7348 = vmatpush3.bf16.msra.mxu0 %v8651_v2  ;;  %7379 = vmatprep.subr.bf16.mxu1 %v8667_v10 }
  0x1e   :  { %7349 = vmatprep.subr.bf16.mxu0 %v8652_v3 }
  0x20   :  { %7380 = vmatpush3.bf16.msra.mxu1 %v8667_v10 }
  0x21   :  { %7350 = vmatpush3.bf16.msra.mxu0 %v8652_v3  ;;  %7381 = vmatprep.subr.bf16.mxu1 %v8668_v12 }
  0x22   :  { %7351 = vmatprep.subr.bf16.mxu0 %v8653_v5 }
  0x24   :  { %7382 = vmatpush3.bf16.msra.mxu1 %v8668_v12 }
  0x25   :  { %7352 = vmatpush3.bf16.msra.mxu0 %v8653_v5  ;;  %7383 = vmatprep.subr.bf16.mxu1 %v8669_v13 }
  0x26   :  { %7353 = vmatprep.subr.bf16.mxu0 %v8654_v6 }
  0x28   :  { %7384 = vmatpush3.bf16.msra.mxu1 %v8669_v13 }
  0x29   :  { %7354 = vmatpush3.bf16.msra.mxu0 %v8654_v6  ;;  %7385 = vmatprep.subr.bf16.mxu1 %v8670_v16 }
  0x2a   :  { %7355 = vmatprep.subr.bf16.mxu0 %v8655_v9 }
  0x2c   :  { %7386 = vmatpush3.bf16.msra.mxu1 %v8670_v16 }
  0x2d   :  { %7356 = vmatpush3.bf16.msra.mxu0 %v8655_v9  ;;  %7387 = vmatprep.subr.bf16.mxu1 %v8671_v22 }
  0x2e   :  { %7357 = vmatprep.subr.bf16.mxu0 %v8656_v11 }
  0x30   :  { %7388 = vmatpush3.bf16.msra.mxu1 %v8671_v22  ;;  %v8681_v22 = vld [vmem:[#allocation2 + $0xc0] sm:$0xff]  }
  0x31   :  { %7358 = vmatpush3.bf16.msra.mxu0 %v8656_v11  ;;  %7389 = vmatprep.subr.bf16.mxu1 %v8672_v23 }
  0x34   :  { %7360 = vmatmul.mubr.bf16.vlgmr.msra.gmra.mrb[0].mxu0 %v8658_v14  ;;  %7390 = vmatpush3.bf16.msra.mxu1 %v8672_v23  ;;  %v8682_v23 = vld [vmem:[#allocation2 + $0xc8] sm:$0xff]  }
  0x35   :  { %7363 = vmatprep.mubr.bf16.mxu0 %v8659_v15  ;;  %7439 = vmatprep.subr.bf16.mxu1 %v8681_v22 }
  0x3c   :  { %7364 = vmatmul.mubr.bf16.gmra.mrb[4].mxu0 %v8660_v17 }
  0x3d   :  { %7367 = vmatprep.mubr.bf16.mxu0 %v8661_v18 }
  0x44   :  { %7368 = vmatmul.mubr.bf16.gmra.mrb[8].mxu0 %v8662_v19 }
  0x45   :  { %7371 = vmatprep.mubr.bf16.mxu0 %v8663_v20 }
  0x4c   :  { %7372 = vmatmul.mubr.bf16.gmra.mrb[12].mxu0 %v8664_v21  ;;  %v8673_v21 = vld [vmem:[%s10546_s1] sm:$0xff]  }
  0x4d   :  { %7423 = vmatprep.mubr.bf16.mxu0 %v8673_v21  ;;  %v8902_v21 = vmov 0  }
  0x4e   :  { %8647 = vset.pattern.permute.xlu0 %v8902_v21  ;;  %8648 = vset.pattern.permute.xlu1 %v8902_v21  ;;  %v6657_v21 = vld [vmem:[%s10548_s3 + $0x90] sm:$0xff] }
 0x107   :  { %v7361_v29 = vpop.f32.mrb[0].mxu0 }
 0x108   :  { %v378_v30 = vadd.f32 %v7361_v29, %v238_v28  ;;  %v369_v31 = vpop.f32.mrb[1].mxu0  ;;  %v8685_v29 = vld [vmem:[#allocation2 + $0xe0] sm:$0xff]  }
 0x109   :  { %v370_v32 = vadd.f32 %v369_v31, %v238_v28  ;;  %v7362_v33 = vpop.f32.mrb[2].mxu0  ;;  %v8687_v31 = vld [vmem:[#allocation2 + $0xf0] sm:$0xff]  }
 0x10a   :  { %v381_v34 = vadd.f32 %v7362_v33, %v238_v28  ;;  %v372_v35 = vpop.f32.mrb[3].mxu0  ;;  %v434_v37 = vmax.f32 %v378_v30, 0.0  ;;  %v8686_v30 = vld [vmem:[#allocation2 + $0xe8] sm:$0xff]  }
 0x10b   :  { %v373_v36 = vadd.f32 %v372_v35, %v238_v28  ;;  %v432_v39 = vmax.f32 %v370_v32, 0.0  ;;  %v472_v32 = vld [vmem:[%s10550_s5 + $0x8] sm:$0xff] }
 0x10c   :  { %v435_v38 = vmax.f32 %v381_v34, 0.0  ;;  %v476_v33 = vrot.slane %v472_v32, %v8982_v26  ;;  %v1349_v32 = vld [vmem:[%s10547_s2 + $0x48] sm:$0xff] }
 0x10d   :  { %v433_v40 = vmax.f32 %v373_v36, 0.0 }
 0x10e   :  { %v465_v41 = vpack.c.bf16 %v435_v38, %v434_v37 }
 0x10f   :  { %v7365_v42 = vpop.f32.mrb[4].mxu0  ;;  %v464_v43 = vpack.c.bf16 %v433_v40, %v432_v39 }
 0x110   :  { %v394_v44 = vadd.f32 %v7365_v42, %v238_v28  ;;  %v385_v45 = vpop.f32.mrb[5].mxu0 }
 0x111   :  { %v386_v46 = vadd.f32 %v385_v45, %v238_v28  ;;  %v7366_v47 = vpop.f32.mrb[6].mxu0  ;;  %7391 = vmatprep.mubr.bf16.mxu1 %v464_v43 }
 0x112   :  { %v397_v48 = vadd.f32 %v7366_v47, %v238_v28  ;;  %v388_v49 = vpop.f32.mrb[7].mxu0  ;;  %7392 = vmatmul.mubr.bf16.vlgmr.msra.gmra.mrb[0].mxu1 %v465_v41  ;;  %v438_v51 = vmax.f32 %v394_v44, 0.0 }
 0x113   :  { %v389_v50 = vadd.f32 %v388_v49, %v238_v28  ;;  %v436_v53 = vmax.f32 %v386_v46, 0.0  ;;  %7440 = vmatpush3.bf16.msra.mxu1 %v8681_v22  ;;  %v1341_v22 = vld [vmem:[%s10547_s2 + $0x8] sm:$0xff] }
 0x114   :  { %v439_v52 = vmax.f32 %v397_v48, 0.0  ;;  %7441 = vmatprep.subr.bf16.mxu1 %v8682_v23 }
 0x115   :  { %v437_v54 = vmax.f32 %v389_v50, 0.0 }
 0x116   :  { %v467_v55 = vpack.c.bf16 %v439_v52, %v438_v51 }
 0x117   :  { %v466_v56 = vpack.c.bf16 %v437_v54, %v436_v53  ;;  %v7369_v57 = vpop.f32.mrb[8].mxu0  ;;  %7442 = vmatpush3.bf16.msra.mxu1 %v8682_v23  ;;  %v1343_v23 = vld [vmem:[%s10547_s2 + $0x18] sm:$0xff] }
 0x118   :  { %v410_v58 = vadd.f32 %v7369_v57, %v238_v28  ;;  %v401_v59 = vpop.f32.mrb[9].mxu0  ;;  %7443 = vmatprep.subr.bf16.mxu1 %v8683_v27 }
 0x119   :  { %v402_v60 = vadd.f32 %v401_v59, %v238_v28  ;;  %v7370_v61 = vpop.f32.mrb[10].mxu0  ;;  %7395 = vmatprep.mubr.bf16.mxu1 %v466_v56 }
 0x11a   :  { %v413_v62 = vadd.f32 %v7370_v61, %v238_v28  ;;  %v404_v63 = vpop.f32.mrb[11].mxu0  ;;  %7396 = vmatmul.mubr.bf16.gmra.mrb[4].mxu1 %v467_v55  ;;  %v442_v1 = vmax.f32 %v410_v58, 0.0 }
 0x11b   :  { %v405_v0 = vadd.f32 %v404_v63, %v238_v28  ;;  %v440_v3 = vmax.f32 %v402_v60, 0.0  ;;  %7444 = vmatpush3.bf16.msra.mxu1 %v8683_v27  ;;  %v1344_v27 = vld [vmem:[%s10547_s2 + $0x20] sm:$0xff] }
 0x11c   :  { %v443_v2 = vmax.f32 %v413_v62, 0.0 }
 0x11d   :  { %v441_v4 = vmax.f32 %v405_v0, 0.0 }
 0x11e   :  { %v469_v5 = vpack.c.bf16 %v443_v2, %v442_v1 }
 0x11f   :  { %v468_v6 = vpack.c.bf16 %v441_v4, %v440_v3  ;;  %v7373_v7 = vpop.f32.mrb[12].mxu0 }
 0x120   :  { %v426_v8 = vadd.f32 %v7373_v7, %v238_v28  ;;  %v417_v9 = vpop.f32.mrb[13].mxu0 }
 0x121   :  { %v418_v10 = vadd.f32 %v417_v9, %v238_v28  ;;  %v7374_v11 = vpop.f32.mrb[14].mxu0  ;;  %7399 = vmatprep.mubr.bf16.mxu1 %v468_v6 }
 0x122   :  { %v429_v12 = vadd.f32 %v7374_v11, %v238_v28  ;;  %v420_v13 = vpop.f32.mrb[15].mxu0  ;;  %7400 = vmatmul.mubr.bf16.gmra.mrb[8].mxu1 %v469_v5  ;;  %v446_v15 = vmax.f32 %v426_v8, 0.0  ;;  %v8675_v11 = vld [vmem:[%s10546_s1 + $0x10] sm:$0xff]  }
 0x123   :  { %v421_v14 = vadd.f32 %v420_v13, %v238_v28  ;;  %v444_v17 = vmax.f32 %v418_v10, 0.0  ;;  %v8684_v28 = vld [vmem:[#allocation2 + $0xd8] sm:$0xff]   ;;  %v8674_v10 = vld [vmem:[%s10546_s1 + $0x8] sm:$0xff]   ;;  %v8677_v13 = vld [vmem:[%s10546_s1 + $0x20] sm:$0xff]  }
 0x124   :  { %v447_v16 = vmax.f32 %v429_v12, 0.0  ;;  %7445 = vmatprep.subr.bf16.mxu1 %v8684_v28  ;;  %v8676_v12 = vld [vmem:[%s10546_s1 + $0x18] sm:$0xff]  }
 0x125   :  { %v445_v18 = vmax.f32 %v421_v14, 0.0  ;;  %7446 = vmatpush3.bf16.msra.mxu1 %v8684_v28  ;;  %v8678_v14 = vld [vmem:[%s10546_s1 + $0x28] sm:$0xff]  }
 0x126   :  { %v471_v19 = vpack.c.bf16 %v447_v16, %v446_v15  ;;  %7447 = vmatprep.subr.bf16.mxu1 %v8685_v29  ;;  %v8679_v15 = vld [vmem:[%s10546_s1 + $0x30] sm:$0xff]   ;;  %v8680_v16 = vld [vmem:[%s10546_s1 + $0x38] sm:$0xff]   ;;  %v1345_v28 = vld [vmem:[%s10547_s2 + $0x28] sm:$0xff] }
 0x127   :  { %v470_v20 = vpack.c.bf16 %v445_v18, %v444_v17  ;;  %v8688_v17 = vld [vmem:[#allocation2 + $0xf8] sm:$0xff]   ;;  %v9096_v18 = vld [vmem:[#allocation2 + $0x80] sm:$0xff]  }
 0x129   :  { %7403 = vmatprep.mubr.bf16.mxu1 %v470_v20  ;;  %7448 = vmatpush3.bf16.msra.mxu1 %v8685_v29  ;;  %v1342_v20 = vld [vmem:[%s10547_s2 + $0x10] sm:$0xff] }
 0x12a   :  { %7404 = vmatmul.mubr.bf16.gmra.mrb[12].mxu1 %v471_v19  ;;  %7449 = vmatprep.subr.bf16.mxu1 %v8686_v30  ;;  %v1340_v19 = vld [vmem:[%s10547_s2] sm:$0xff]  ;;  %v1346_v29 = vld [vmem:[%s10547_s2 + $0x30] sm:$0xff] }
 0x12b   :  { %1357 = vperm.xlu0 %8647, %v1340_v19   ;;  %1363 = vperm.xlu1 %8648, %v1342_v20  }
 0x12d   :  { %7450 = vmatpush3.bf16.msra.mxu1 %v8686_v30  ;;  %v1347_v30 = vld [vmem:[%s10547_s2 + $0x38] sm:$0xff] }
 0x12e   :  { %7451 = vmatprep.subr.bf16.mxu1 %v8687_v31 }
 0x12f   :  { %1360 = vperm.xlu0 %8647, %v1341_v22   ;;  %1366 = vperm.xlu1 %8648, %v1343_v23   ;;  %v6658_v22 = vld [vmem:[%s10548_s3 + $0x98] sm:$0xff] }
 0x131   :  { %7452 = vmatpush3.bf16.msra.mxu1 %v8687_v31  ;;  %v1348_v31 = vld [vmem:[%s10547_s2 + $0x40] sm:$0xff] }
 0x132   :  { %7453 = vmatprep.subr.bf16.mxu1 %v8688_v17 }
 0x133   :  { %1369 = vperm.xlu0 %8647, %v1344_v27   ;;  %1372 = vperm.xlu1 %8648, %v1345_v28  }
 0x135   :  { %7454 = vmatpush3.bf16.msra.mxu1 %v8688_v17 }
 0x136   :  { %7471 = vmatprep.subr.bf16.mxu1 %v9096_v18 }
 0x137   :  { %1375 = vperm.xlu0 %8647, %v1346_v29   ;;  %1378 = vperm.xlu1 %8648, %v1347_v30   ;;  %v8690_v29 = vld [vmem:[#allocation2 + $0x88] sm:$0xff]   ;;  %v6659_v30 = vld [vmem:[%s10548_s3 + $0xa0] sm:$0xff] }
 0x13b   :  { %1381 = vperm.xlu0 %8647, %v1348_v31   ;;  %1384 = vperm.xlu1 %8648, %v1349_v32   ;;  %v6660_v31 = vld [vmem:[%s10548_s3 + $0xa8] sm:$0xff] }
 0x1e5   :  { %v7393_v34 = vpop.f32.mrb[0].mxu1 }
 0x1e6   :  { %v559_v35 = vpop.f32.mrb[1].mxu1  ;;  %v9001_v41 = vadd.f32 %v7393_v34, %v476_v33  ;;  %v1351_v34 = vld [vmem:[%s10547_s2 + $0x58] sm:$0xff] }
 0x1e7   :  { %v7394_v36 = vpop.f32.mrb[2].mxu1  ;;  %v8995_v38 = vadd.f32 %v559_v35, %v476_v33  ;;  %1390 = vperm.xlu1 %8648, %v1351_v34   ;;  %v1352_v35 = vld [vmem:[%s10547_s2 + $0x60] sm:$0xff]  ;;  %v8691_v34 = vld [vmem:[#allocation2 + $0x90] sm:$0xff]  }
 0x1e8   :  { %v562_v37 = vpop.f32.mrb[3].mxu1  ;;  %v8997_v39 = vadd.f32 %v7394_v36, %v476_v33  ;;  %10593 = vst [vmem:[#allocation12_spill] sm:$0xff] %v9001_v41  ;;  %v1353_v36 = vld [vmem:[%s10547_s2 + $0x68] sm:$0xff] }
 0x1e9   :  { %10590 = vst [vmem:[#allocation9_spill] sm:$0xff] %v8995_v38  ;;  %v8999_v40 = vadd.f32 %v562_v37, %v476_v33  ;;  %v1354_v37 = vld [vmem:[%s10547_s2 + $0x70] sm:$0xff] }
 0x1ea   :  { %10591 = vst [vmem:[#allocation10_spill] sm:$0xff] %v8997_v39  ;;  %v9009_v43 = vpack.c.bf16 %v8997_v39, %v9001_v41 }
 0x1eb   :  { %10592 = vst [vmem:[#allocation11_spill] sm:$0xff] %v8999_v40  ;;  %v9005_v42 = vpack.c.bf16 %v8999_v40, %v8995_v38  ;;  %1396 = vperm.xlu1 %8648, %v1353_v36   ;;  %v6661_v36 = vld [vmem:[%s10548_s3 + $0xb0] sm:$0xff] }
 0x1ed   :  { %v7397_v44 = vpop.f32.mrb[4].mxu1  ;;  %7407 = vmatprep.subr.bf16.mxu0 %v9005_v42 }
 0x1ee   :  { %v575_v45 = vpop.f32.mrb[5].mxu1  ;;  %7408 = vmatpush3.bf16.msra.mxu0 %v9005_v42  ;;  %v9021_v51 = vadd.f32 %v7397_v44, %v476_v33  ;;  %v1355_v44 = vld [vmem:[%s10547_s2 + $0x78] sm:$0xff] }
 0x1ef   :  { %v7398_v46 = vpop.f32.mrb[6].mxu1  ;;  %7409 = vmatprep.subr.bf16.mxu0 %v9009_v43  ;;  %v9014_v48 = vadd.f32 %v575_v45, %v476_v33  ;;  %1402 = vperm.xlu1 %8648, %v1355_v44   ;;  %v6567_v45 = vld [vmem:[%s10547_s2 + $0x80] sm:$0xff] }
 0x1f0   :  { %v578_v47 = vpop.f32.mrb[7].mxu1  ;;  %v9016_v49 = vadd.f32 %v7398_v46, %v476_v33  ;;  %10597 = vst [vmem:[#allocation16_spill] sm:$0xff] %v9021_v51  ;;  %v6568_v46 = vld [vmem:[%s10547_s2 + $0x88] sm:$0xff] }
 0x1f1   :  { %10594 = vst [vmem:[#allocation13_spill] sm:$0xff] %v9014_v48  ;;  %v9018_v50 = vadd.f32 %v578_v47, %v476_v33  ;;  %v6569_v47 = vld [vmem:[%s10547_s2 + $0x90] sm:$0xff] }
 0x1f2   :  { %10595 = vst [vmem:[#allocation14_spill] sm:$0xff] %v9016_v49  ;;  %7410 = vmatpush3.bf16.msra.mxu0 %v9009_v43  ;;  %v9029_v53 = vpack.c.bf16 %v9016_v49, %v9021_v51 }
 0x1f3   :  { %10596 = vst [vmem:[#allocation15_spill] sm:$0xff] %v9018_v50  ;;  %v9025_v52 = vpack.c.bf16 %v9018_v50, %v9014_v48  ;;  %2337 = vperm.xlu1 %8648, %v6568_v46  }
 0x1f5   :  { %v7401_v54 = vpop.f32.mrb[8].mxu1  ;;  %7411 = vmatprep.subr.bf16.mxu0 %v9025_v52 }
 0x1f6   :  { %v591_v55 = vpop.f32.mrb[9].mxu1  ;;  %7412 = vmatpush3.bf16.msra.mxu0 %v9025_v52  ;;  %v9041_v61 = vadd.f32 %v7401_v54, %v476_v33  ;;  %v6570_v54 = vld [vmem:[%s10547_s2 + $0x98] sm:$0xff] }
 0x1f7   :  { %v7402_v56 = vpop.f32.mrb[10].mxu1  ;;  %7413 = vmatprep.subr.bf16.mxu0 %v9029_v53  ;;  %v9034_v58 = vadd.f32 %v591_v55, %v476_v33  ;;  %2343 = vperm.xlu1 %8648, %v6570_v54   ;;  %v6571_v55 = vld [vmem:[%s10547_s2 + $0xa0] sm:$0xff]  ;;  %v6664_v54 = vld [vmem:[%s10548_s3 + $0xc8] sm:$0xff] }
 0x1f8   :  { %v594_v57 = vpop.f32.mrb[11].mxu1  ;;  %v9036_v59 = vadd.f32 %v7402_v56, %v476_v33  ;;  %10601 = vst [vmem:[#allocation20_spill] sm:$0xff] %v9041_v61  ;;  %v6572_v56 = vld [vmem:[%s10547_s2 + $0xa8] sm:$0xff] }
 0x1f9   :  { %10598 = vst [vmem:[#allocation17_spill] sm:$0xff] %v9034_v58  ;;  %v9038_v60 = vadd.f32 %v594_v57, %v476_v33  ;;  %v6573_v57 = vld [vmem:[%s10547_s2 + $0xb0] sm:$0xff] }
 0x1fa   :  { %10599 = vst [vmem:[#allocation18_spill] sm:$0xff] %v9036_v59  ;;  %7414 = vmatpush3.bf16.msra.mxu0 %v9029_v53  ;;  %v9049_v63 = vpack.c.bf16 %v9036_v59, %v9041_v61 }
 0x1fb   :  { %10600 = vst [vmem:[#allocation19_spill] sm:$0xff] %v9038_v60  ;;  %v9045_v62 = vpack.c.bf16 %v9038_v60, %v9034_v58  ;;  %2349 = vperm.xlu1 %8648, %v6572_v56  }
 0x1fd   :  { %v7405_v0 = vpop.f32.mrb[12].mxu1  ;;  %7415 = vmatprep.subr.bf16.mxu0 %v9045_v62 }
 0x1fe   :  { %v607_v1 = vpop.f32.mrb[13].mxu1  ;;  %7416 = vmatpush3.bf16.msra.mxu0 %v9045_v62  ;;  %v9061_v7 = vadd.f32 %v7405_v0, %v476_v33  ;;  %v6574_v0 = vld [vmem:[%s10547_s2 + $0xb8] sm:$0xff] }
 0x1ff   :  { %v7406_v2 = vpop.f32.mrb[14].mxu1  ;;  %7417 = vmatprep.subr.bf16.mxu0 %v9049_v63  ;;  %v9054_v4 = vadd.f32 %v607_v1, %v476_v33  ;;  %2355 = vperm.xlu1 %8648, %v6574_v0   ;;  %v6575_v1 = vld [vmem:[%s10547_s2 + $0xc0] sm:$0xff] }
 0x200   :  { %v610_v3 = vpop.f32.mrb[15].mxu1  ;;  %v9056_v5 = vadd.f32 %v7406_v2, %v476_v33  ;;  %10605 = vst [vmem:[#allocation24_spill] sm:$0xff] %v9061_v7  ;;  %v6576_v2 = vld [vmem:[%s10547_s2 + $0xc8] sm:$0xff] }
 0x201   :  { %10602 = vst [vmem:[#allocation21_spill] sm:$0xff] %v9054_v4  ;;  %v9058_v6 = vadd.f32 %v610_v3, %v476_v33  ;;  %v1350_v33 = vld [vmem:[%s10547_s2 + $0x50] sm:$0xff] }
 0x202   :  { %10603 = vst [vmem:[#allocation22_spill] sm:$0xff] %v9056_v5  ;;  %7418 = vmatpush3.bf16.msra.mxu0 %v9049_v63  ;;  %v9069_v9 = vpack.c.bf16 %v9056_v5, %v9061_v7  ;;  %1387 = vperm.xlu0 %8647, %v1350_v33   ;;  %v6577_v3 = vld [vmem:[%s10547_s2 + $0xd0] sm:$0xff] }
 0x203   :  { %10604 = vst [vmem:[#allocation23_spill] sm:$0xff] %v9058_v6  ;;  %v9065_v8 = vpack.c.bf16 %v9058_v6, %v9054_v4  ;;  %2361 = vperm.xlu1 %8648, %v6576_v2  }
 0x205   :  { %7419 = vmatprep.subr.bf16.mxu0 %v9065_v8 }
 0x206   :  { %7420 = vmatpush3.bf16.msra.mxu0 %v9065_v8  ;;  %1393 = vperm.xlu0 %8647, %v1352_v35  }
 0x207   :  { %7421 = vmatprep.subr.bf16.mxu0 %v9069_v9 }
 0x20a   :  { %7422 = vmatpush3.bf16.msra.mxu0 %v9069_v9  ;;  %1399 = vperm.xlu0 %8647, %v1354_v37  }
 0x20d   :  { %7424 = vmatmul.mubr.bf16.vlgmr.msra.gmra.mrb[16].mxu0 %v8674_v10  ;;  %v6578_v10 = vld [vmem:[%s10547_s2 + $0xd8] sm:$0xff] }
 0x20e   :  { %7427 = vmatprep.mubr.bf16.mxu0 %v8675_v11  ;;  %2334 = vperm.xlu0 %8647, %v6567_v45   ;;  %v6579_v11 = vld [vmem:[%s10547_s2 + $0xe0] sm:$0xff]  ;;  %v6662_v45 = vld [vmem:[%s10548_s3 + $0xb8] sm:$0xff] }
 0x20f   :  { %2367 = vperm.xlu1 %8648, %v6578_v10   ;;  %v6666_v10 = vld [vmem:[%s10548_s3 + $0xd8] sm:$0xff] }
 0x212   :  { %2340 = vperm.xlu0 %8647, %v6569_v47   ;;  %v6663_v47 = vld [vmem:[%s10548_s3 + $0xc0] sm:$0xff] }
 0x215   :  { %7428 = vmatmul.mubr.bf16.gmra.mrb[20].mxu0 %v8676_v12  ;;  %v6580_v12 = vld [vmem:[%s10547_s2 + $0xe8] sm:$0xff] }
 0x216   :  { %7431 = vmatprep.mubr.bf16.mxu0 %v8677_v13  ;;  %2346 = vperm.xlu0 %8647, %v6571_v55   ;;  %v6581_v13 = vld [vmem:[%s10547_s2 + $0xf0] sm:$0xff] }
 0x217   :  { %2373 = vperm.xlu1 %8648, %v6580_v12   ;;  %v8694_v12 = vld [vmem:[#allocation2 + $0xa8] sm:$0xff]  }
 0x21a   :  { %2352 = vperm.xlu0 %8647, %v6573_v57   ;;  %v8693_v57 = vld [vmem:[#allocation2 + $0xa0] sm:$0xff]  }
 0x21d   :  { %7432 = vmatmul.mubr.bf16.gmra.mrb[24].mxu0 %v8678_v14  ;;  %v6582_v14 = vld [vmem:[%s10547_s2 + $0xf8] sm:$0xff] }
 0x21e   :  { %7435 = vmatprep.mubr.bf16.mxu0 %v8679_v15  ;;  %2358 = vperm.xlu0 %8647, %v6575_v1   ;;  %v6655_v15 = vld [vmem:[%s10548_s3 + $0x80] sm:$0xff]  ;;  %v6665_v1 = vld [vmem:[%s10548_s3 + $0xd0] sm:$0xff] }
 0x21f   :  { %2379 = vperm.xlu1 %8648, %v6582_v14   ;;  %v6668_v14 = vld [vmem:[%s10548_s3 + $0xe8] sm:$0xff] }
 0x222   :  { %2364 = vperm.xlu0 %8647, %v6577_v3  }
 0x225   :  { %7436 = vmatmul.mubr.bf16.gmra.mrb[28].mxu0 %v8680_v16  ;;  %v6656_v16 = vld [vmem:[%s10548_s3 + $0x88] sm:$0xff] }
 0x226   :  { %2370 = vperm.xlu0 %8647, %v6579_v11   ;;  %3314 = vperm.xlu1 %8648, %v6656_v16  }
 0x22a   :  { %2376 = vperm.xlu0 %8647, %v6581_v13   ;;  %3320 = vperm.xlu1 %8648, %v6658_v22   ;;  %v6667_v13 = vld [vmem:[%s10548_s3 + $0xe0] sm:$0xff] }
 0x22e   :  { %3311 = vperm.xlu0 %8647, %v6655_v15   ;;  %3326 = vperm.xlu1 %8648, %v6660_v31   ;;  %v4674_v31 = vld [vmem:[%s10548_s3 + $0x10] sm:$0xff] }
 0x232   :  { %3317 = vperm.xlu0 %8647, %v6657_v21   ;;  %3332 = vperm.xlu1 %8648, %v6662_v45  }
 0x236   :  { %3323 = vperm.xlu0 %8647, %v6659_v30   ;;  %3338 = vperm.xlu1 %8648, %v6664_v54   ;;  %v4673_v30 = vld [vmem:[%s10548_s3 + $0x8] sm:$0xff] }
 0x23a   :  { %3329 = vperm.xlu0 %8647, %v6661_v36   ;;  %3344 = vperm.xlu1 %8648, %v6666_v10   ;;  %v4687_v36 = vld [vmem:[%s10548_s3 + $0x78] sm:$0xff] }
 0x23e   :  { %3335 = vperm.xlu0 %8647, %v6663_v47   ;;  %3350 = vperm.xlu1 %8648, %v6668_v14  }
 0x242   :  { %3341 = vperm.xlu0 %8647, %v6665_v1  }
 0x246   :  { %3347 = vperm.xlu0 %8647, %v6667_v13  }
 0x2e0   :  { %v7425_v17 = vpop.f32.mrb[16].mxu0 }
 0x2e1   :  { %v728_v19 = vpop.f32.mrb[17].mxu0 }
 0x2e2   :  { %v7426_v20 = vpop.f32.mrb[18].mxu0 }
 0x2e3   :  { %v792_v23 = vpack.c.bf16 %v7426_v20, %v7425_v17  ;;  %v731_v27 = vpop.f32.mrb[19].mxu0  ;;  %v8695_v17 = vld [vmem:[#allocation2 + $0xb0] sm:$0xff]  }
 0x2e4   :  { %v791_v28 = vpack.c.bf16 %v731_v27, %v728_v19  ;;  %v6669_v20 = vld [vmem:[%s10548_s3 + $0xf0] sm:$0xff] }
 0x2e5   :  { %3353 = vperm.xlu0 %8647, %v6669_v20  }
 0x2e6   :  { %7455 = vmatprep.mubr.bf16.mxu1 %v791_v28  ;;  %v8696_v28 = vld [vmem:[#allocation2 + $0xb8] sm:$0xff]  }
 0x2e7   :  { %7456 = vmatmul.mubr.bf16.vlgmr.msra.gmra.mrb[16].mxu1 %v792_v23  ;;  %v6670_v23 = vld [vmem:[%s10548_s3 + $0xf8] sm:$0xff] }
 0x2e8   :  { %v7429_v32 = vpop.f32.mrb[20].mxu0  ;;  %7472 = vmatpush3.bf16.msra.mxu1 %v9096_v18  ;;  %v8692_v18 = vld [vmem:[#allocation2 + $0x98] sm:$0xff]   ;;  %3356 = vperm.xlu1 %8648, %v6670_v23  }
 0x2e9   :  { %v744_v33 = vpop.f32.mrb[21].mxu0  ;;  %7473 = vmatprep.subr.bf16.mxu1 %v8690_v29 }
 0x2ea   :  { %v7430_v35 = vpop.f32.mrb[22].mxu0 }
 0x2eb   :  { %v794_v37 = vpack.c.bf16 %v7430_v35, %v7429_v32  ;;  %v747_v44 = vpop.f32.mrb[23].mxu0  ;;  %v4683_v32 = vld [vmem:[%s10548_s3 + $0x58] sm:$0xff]  ;;  %v4686_v35 = vld [vmem:[%s10548_s3 + $0x70] sm:$0xff] }
 0x2ec   :  { %v793_v46 = vpack.c.bf16 %v747_v44, %v744_v33  ;;  %7474 = vmatpush3.bf16.msra.mxu1 %v8690_v29  ;;  %v4672_v29 = vld [vmem:[%s10548_s3] sm:$0xff]  ;;  %4692 = vperm.xlu1 %8648, %v4673_v30  }
 0x2ed   :  { %7475 = vmatprep.subr.bf16.mxu1 %v8691_v34  ;;  %4689 = vperm.xlu0 %8647, %v4672_v29   ;;  %v4684_v33 = vld [vmem:[%s10548_s3 + $0x60] sm:$0xff] }
 0x2ee   :  { %7459 = vmatprep.mubr.bf16.mxu1 %v793_v46 }
 0x2ef   :  { %7460 = vmatmul.mubr.bf16.gmra.mrb[20].mxu1 %v794_v37  ;;  %v9303_v37 = vld [vmem:[%s10550_s5 + $0x10] sm:$0xff] }
 0x2f0   :  { %v7433_v55 = vpop.f32.mrb[24].mxu0  ;;  %7476 = vmatpush3.bf16.msra.mxu1 %v8691_v34  ;;  %v4685_v34 = vld [vmem:[%s10548_s3 + $0x68] sm:$0xff]  ;;  %v1125_v45 = vrot.slane %v9303_v37, %v8982_v26 }
 0x2f1   :  { %v760_v56 = vpop.f32.mrb[25].mxu0  ;;  %7477 = vmatprep.subr.bf16.mxu1 %v8692_v18  ;;  %4695 = vperm.xlu0 %8647, %v4674_v31  }
 0x2f2   :  { %v7434_v0 = vpop.f32.mrb[26].mxu0 }
 0x2f3   :  { %v796_v2 = vpack.c.bf16 %v7434_v0, %v7433_v55  ;;  %v763_v3 = vpop.f32.mrb[27].mxu0 }
 0x2f4   :  { %v795_v11 = vpack.c.bf16 %v763_v3, %v760_v56  ;;  %7478 = vmatpush3.bf16.msra.mxu1 %v8692_v18 }
 0x2f5   :  { %7479 = vmatprep.subr.bf16.mxu1 %v8693_v57 }
 0x2f6   :  { %7463 = vmatprep.mubr.bf16.mxu1 %v795_v11 }
 0x2f7   :  { %7464 = vmatmul.mubr.bf16.gmra.mrb[24].mxu1 %v796_v2 }
 0x2f8   :  { %v7437_v15 = vpop.f32.mrb[28].mxu0  ;;  %7480 = vmatpush3.bf16.msra.mxu1 %v8693_v57 }
 0x2f9   :  { %v776_v16 = vpop.f32.mrb[29].mxu0  ;;  %7481 = vmatprep.subr.bf16.mxu1 %v8694_v12 }
 0x2fa   :  { %v7438_v19 = vpop.f32.mrb[30].mxu0 }
 0x2fb   :  { %v798_v21 = vpack.c.bf16 %v7438_v19, %v7437_v15  ;;  %v779_v22 = vpop.f32.mrb[31].mxu0 }
 0x2fc   :  { %v797_v27 = vpack.c.bf16 %v779_v22, %v776_v16  ;;  %7482 = vmatpush3.bf16.msra.mxu1 %v8694_v12 }
 0x2fd   :  { %7483 = vmatprep.subr.bf16.mxu1 %v8695_v17 }
 0x2fe   :  { %7467 = vmatprep.mubr.bf16.mxu1 %v797_v27 }
 0x2ff   :  { %7468 = vmatmul.mubr.bf16.gmra.mrb[28].mxu1 %v798_v21 }
 0x300   :  { %7484 = vmatpush3.bf16.msra.mxu1 %v8695_v17  ;;  %7487 = vmatprep.mubr.bf16.mxu1 %v9005_v42  ;;  %v4675_v42 = vld [vmem:[%s10548_s3 + $0x18] sm:$0xff] }
 0x301   :  { %7485 = vmatprep.subr.bf16.mxu1 %v8696_v28  ;;  %4698 = vperm.xlu1 %8648, %v4675_v42  }
 0x304   :  { %7486 = vmatpush3.bf16.msra.mxu1 %v8696_v28 }
 0x307   :  { %7488 = vmatmul.mubr.bf16.vlgmr.msra.gmra.mrb[16].mxu1 %v9009_v43  ;;  %v4676_v43 = vld [vmem:[%s10548_s3 + $0x20] sm:$0xff] }
 0x308   :  { %7491 = vmatprep.mubr.bf16.mxu1 %v9025_v52  ;;  %4701 = vperm.xlu0 %8647, %v4676_v43   ;;  %v4677_v52 = vld [vmem:[%s10548_s3 + $0x28] sm:$0xff]  ;;  %v9319_v43 = vand.u32 127, %v200_v24 }
 0x309   :  { %4704 = vperm.xlu1 %8648, %v4677_v52  }
 0x30f   :  { %7492 = vmatmul.mubr.bf16.gmra.mrb[20].mxu1 %v9029_v53  ;;  %v4678_v53 = vld [vmem:[%s10548_s3 + $0x30] sm:$0xff] }
 0x310   :  { %7495 = vmatprep.mubr.bf16.mxu1 %v9045_v62  ;;  %4707 = vperm.xlu0 %8647, %v4678_v53   ;;  %v4679_v62 = vld [vmem:[%s10548_s3 + $0x38] sm:$0xff] }
 0x311   :  { %4710 = vperm.xlu1 %8648, %v4679_v62  }
 0x317   :  { %7496 = vmatmul.mubr.bf16.gmra.mrb[24].mxu1 %v9049_v63  ;;  %v4680_v63 = vld [vmem:[%s10548_s3 + $0x40] sm:$0xff] }
 0x318   :  { %7499 = vmatprep.mubr.bf16.mxu1 %v9065_v8  ;;  %4713 = vperm.xlu0 %8647, %v4680_v63   ;;  %v4681_v8 = vld [vmem:[%s10548_s3 + $0x48] sm:$0xff] }
 0x319   :  { %4716 = vperm.xlu1 %8648, %v4681_v8  }
 0x31d   :  { %4722 = vperm.xlu1 %8648, %v4683_v32   ;;  %v1358_v32 = vpop.permute.xlu0 %1357 }
 0x31e   :  { %vm1404_vm0 = vcmp.eq.s32.totalorder %v9319_v43, %v1358_v32 }
 0x31f   :  { %7500 = vmatmul.mubr.bf16.gmra.mrb[28].mxu1 %v9069_v9  ;;  %v4682_v9 = vld [vmem:[%s10548_s3 + $0x50] sm:$0xff] }
 0x320   :  { %4719 = vperm.xlu0 %8647, %v4682_v9  }
 0x321   :  { %4728 = vperm.xlu1 %8648, %v4685_v34  }
 0x324   :  { %4725 = vperm.xlu0 %8647, %v4684_v33  }
 0x325   :  { %4734 = vperm.xlu1 %8648, %v4687_v36  }
 0x328   :  { %4731 = vperm.xlu0 %8647, %v4686_v35  }
 0x3da   :  { %v7489_v44 = vpop.f32.mrb[16].mxu1 }
 0x3db   :  { %v1058_v46 = vpop.f32.mrb[17].mxu1  ;;  %v9311_v56 = vadd.f32 %v7489_v44, %v1125_v45 }
 0x3dc   :  { %v7490_v18 = vpop.f32.mrb[18].mxu1  ;;  %v9307_v54 = vadd.f32 %v1125_v45, %v1058_v46 }
 0x3dd   :  { %v1061_v47 = vpop.f32.mrb[19].mxu1  ;;  %v1129_v0 = vadd.f32 %v7490_v18, %v1125_v45 }
 0x3de   :  { %v9309_v55 = vadd.f32 %v1125_v45, %v1061_v47 }
 0x3e0   :  { %v1158_v57 = vadd.f32 %v9309_v55, %v9307_v54 }
 0x3e2   :  { %v1159_v1 = vadd.f32 %v1158_v57, %v9311_v56  ;;  %v7493_v2 = vpop.f32.mrb[20].mxu1 }
 0x3e3   :  { %v1074_v3 = vpop.f32.mrb[21].mxu1  ;;  %v1132_v16 = vadd.f32 %v7493_v2, %v1125_v45 }
 0x3e4   :  { %v1130_v10 = vadd.f32 %v1125_v45, %v1074_v3  ;;  %v1160_v11 = vadd.f32 %v1159_v1, %v1129_v0  ;;  %v7494_v12 = vpop.f32.mrb[22].mxu1  ;;  %v10552_v1 = vmov 1.0  }
 0x3e5   :  { %v1077_v13 = vpop.f32.mrb[23].mxu1  ;;  %v1133_v19 = vadd.f32 %v7494_v12, %v1125_v45  ;;  %7535 = vmatprep.mubr.msk.f32.mxu0 %vm1404_vm0, %v10552_v1 }
 0x3e6   :  { %v1161_v14 = vadd.f32 %v1160_v11, %v1130_v10  ;;  %v1131_v15 = vadd.f32 %v1125_v45, %v1077_v13 }
 0x3e8   :  { %v1162_v17 = vadd.f32 %v1161_v14, %v1131_v15 }
 0x3ea   :  { %v1163_v20 = vadd.f32 %v1162_v17, %v1132_v16  ;;  %v7497_v21 = vpop.f32.mrb[24].mxu1 }
 0x3eb   :  { %v1090_v22 = vpop.f32.mrb[25].mxu1  ;;  %v1136_v30 = vadd.f32 %v7497_v21, %v1125_v45 }
 0x3ec   :  { %v1134_v23 = vadd.f32 %v1125_v45, %v1090_v22  ;;  %v1164_v27 = vadd.f32 %v1163_v20, %v1133_v19  ;;  %v7498_v28 = vpop.f32.mrb[26].mxu1 }
 0x3ed   :  { %v1093_v29 = vpop.f32.mrb[27].mxu1  ;;  %v1137_v53 = vadd.f32 %v7498_v28, %v1125_v45  ;;  %v9322_v63 = vmul.f32 0.0, %v1136_v30 }
 0x3ee   :  { %v9316_v31 = vmul.f32 0.0, %v1134_v23  ;;  %v1135_v42 = vadd.f32 %v1125_v45, %v1093_v29 }
 0x3ef   :  { %v1153_v34 = vmul.f32 0.0, %v1137_v53 }
 0x3f0   :  { %v1165_v52 = vadd.f32 %v1164_v27, %v9316_v31  ;;  %v1151_v62 = vmul.f32 0.0, %v1135_v42 }
 0x3f2   :  { %v1166_v8 = vadd.f32 %v1165_v52, %v1151_v62  ;;  %v7501_v9 = vpop.f32.mrb[28].mxu1 }
 0x3f3   :  { %v1106_v33 = vpop.f32.mrb[29].mxu1  ;;  %v1140_v46 = vadd.f32 %v7501_v9, %v1125_v45 }
 0x3f4   :  { %v1167_v35 = vadd.f32 %v1166_v8, %v9322_v63  ;;  %v1138_v36 = vadd.f32 %v1125_v45, %v1106_v33  ;;  %v7502_v44 = vpop.f32.mrb[30].mxu1 }
 0x3f5   :  { %v1109_v24 = vpop.f32.mrb[31].mxu1  ;;  %v1141_v3 = vadd.f32 %v7502_v44, %v1125_v45  ;;  %v1156_v12 = vmul.f32 0.0, %v1140_v46 }
 0x3f6   :  { %v1154_v18 = vmul.f32 0.0, %v1138_v36  ;;  %v1168_v47 = vadd.f32 %v1167_v35, %v1153_v34  ;;  %v1139_v57 = vadd.f32 %v1125_v45, %v1109_v24 }
 0x3f7   :  { %v1157_v14 = vmul.f32 0.0, %v1141_v3 }
 0x3f8   :  { %v1169_v2 = vadd.f32 %v1168_v47, %v1154_v18  ;;  %v1155_v11 = vmul.f32 0.0, %v1139_v57 }
 0x3fa   :  { %v1170_v13 = vadd.f32 %v1169_v2, %v1155_v11 }
 0x3fc   :  { %v1171_v17 = vadd.f32 %v1170_v13, %v1156_v12 }
 0x3fe   :  { %v1172_v20 = vadd.f32 %v1171_v17, %v1157_v14 }
 0x400   :  { %v1173_v21 = vrot.slane %v1172_v20, 4 }
 0x402   :  { %v1174_v22 = vadd.f32 %v1173_v21, %v1172_v20 }
 0x404   :  { %v1175_v23 = vrot.slane %v1174_v22, 2 }
 0x406   :  { %v1176_v27 = vadd.f32 %v1175_v23, %v1174_v22 }
 0x408   :  { %v1177_v28 = vrot.slane %v1176_v27, 1 }
 0x40a   :  { %v1178_v29 = vadd.f32 %v1177_v28, %v1176_v27 }
 0x40c   :  { %v1179_v30 = vmul.f32 0.015625, %v1178_v29 }
 0x40e   :  { %v9328_v42 = vsub.f32 %v9307_v54, %v1179_v30  ;;  %v9331_v52 = vsub.f32 %v9309_v55, %v1179_v30  ;;  %v9334_v45 = vsub.f32 %v9311_v56, %v1179_v30  ;;  %v9336_v53 = vsub.f32 %v1129_v0, %v1179_v30 }
 0x40f   :  { %v9338_v8 = vsub.f32 %v1130_v10, %v1179_v30  ;;  %v9340_v9 = vsub.f32 %v1131_v15, %v1179_v30  ;;  %v9342_v32 = vsub.f32 %v1132_v16, %v1179_v30  ;;  %v9344_v33 = vsub.f32 %v1133_v19, %v1179_v30 }
 0x410   :  { %v1188_v35 = vsub.f32 %v9316_v31, %v1179_v30  ;;  %v1189_v54 = vsub.f32 %v1151_v62, %v1179_v30  ;;  %v1190_v36 = vsub.f32 %v9322_v63, %v1179_v30  ;;  %v1191_v55 = vsub.f32 %v1153_v34, %v1179_v30 }
 0x411   :  { %v1192_v44 = vsub.f32 %v1154_v18, %v1179_v30  ;;  %v1193_v46 = vsub.f32 %v1155_v11, %v1179_v30  ;;  %v1194_v56 = vsub.f32 %v1156_v12, %v1179_v30  ;;  %v1195_v24 = vsub.f32 %v1157_v14, %v1179_v30 }
 0x412   :  { %v1212_v0 = vmul.f32 %v9328_v42, %v9328_v42  ;;  %v1213_v10 = vmul.f32 %v9331_v52, %v9331_v52  ;;  %v1214_v15 = vmul.f32 %v9334_v45, %v9334_v45  ;;  %v1215_v19 = vmul.f32 %v9336_v53, %v9336_v53 }
 0x413   :  { %v1216_v62 = vmul.f32 %v9338_v8, %v9338_v8  ;;  %v1217_v34 = vmul.f32 %v9340_v9, %v9340_v9  ;;  %v9360_v47 = vmul.f32 0.0, %v1188_v35  ;;  %v1218_v57 = vmul.f32 %v9342_v32, %v9342_v32 }
 0x414   :  { %v1228_v16 = vadd.f32 %v1213_v10, %v1212_v0  ;;  %v9364_v3 = vmul.f32 0.0, %v1189_v54  ;;  %v1219_v11 = vmul.f32 %v9344_v33, %v9344_v33  ;;  %v9368_v13 = vmul.f32 0.0, %v1190_v36 }
 0x415   :  { %v1220_v14 = vmul.f32 %v9360_v47, %v9360_v47  ;;  %v1207_v20 = vmul.f32 0.0, %v1191_v55  ;;  %v1208_v23 = vmul.f32 0.0, %v1192_v44  ;;  %v1209_v29 = vmul.f32 0.0, %v1193_v46 }
 0x416   :  { %v1229_v31 = vadd.f32 %v1228_v16, %v1214_v15  ;;  %v1221_v21 = vmul.f32 %v9364_v3, %v9364_v3  ;;  %v1222_v27 = vmul.f32 %v9368_v13, %v9368_v13  ;;  %v1210_v54 = vmul.f32 0.0, %v1194_v56 }
 0x417   :  { %v1223_v30 = vmul.f32 %v1207_v20, %v1207_v20  ;;  %v1224_v36 = vmul.f32 %v1208_v23, %v1208_v23  ;;  %v1211_v10 = vmul.f32 0.0, %v1195_v24  ;;  %v1225_v15 = vmul.f32 %v1209_v29, %v1209_v29 }
 0x418   :  { %v1230_v63 = vadd.f32 %v1229_v31, %v1215_v19  ;;  %v1226_v19 = vmul.f32 %v1210_v54, %v1210_v54  ;;  %v9377_v56 = vsub.s32 2, %v8979_v25  ;;  %v9380_v24 = vsub.s32 1, %v8979_v25 }
 0x419   :  { %v1227_v31 = vmul.f32 %v1211_v10, %v1211_v10 }
 0x41a   :  { %v1231_v18 = vadd.f32 %v1230_v63, %v1216_v62 }
 0x41c   :  { %v1232_v2 = vadd.f32 %v1231_v18, %v1217_v34 }
 0x41e   :  { %v1233_v12 = vadd.f32 %v1232_v2, %v1218_v57 }
 0x420   :  { %v1234_v17 = vadd.f32 %v1233_v12, %v1219_v11 }
 0x422   :  { %v1235_v22 = vadd.f32 %v1234_v17, %v1220_v14  ;;  %v1291_v14 = vrot.slane %v9303_v37, %v9377_v56  ;;  %v1271_v17 = vrot.slane %v9303_v37, %v9380_v24 }
 0x424   :  { %v1236_v28 = vadd.f32 %v1235_v22, %v1221_v21  ;;  %v9386_v22 = vmul.f32 0.0, %v1291_v14 }
 0x426   :  { %v1237_v35 = vadd.f32 %v1236_v28, %v1222_v27 }
 0x428   :  { %v1238_v0 = vadd.f32 %v1237_v35, %v1223_v30 }
 0x42a   :  { %v1239_v16 = vadd.f32 %v1238_v0, %v1224_v36 }
 0x42c   :  { %v1240_v55 = vadd.f32 %v1239_v16, %v1225_v15 }
 0x42e   :  { %v1241_v62 = vadd.f32 %v1240_v55, %v1226_v19 }
 0x430   :  { %v1242_v63 = vadd.f32 %v1241_v62, %v1227_v31 }
 0x432   :  { %v1243_v34 = vrot.slane %v1242_v63, 4 }
 0x434   :  { %v1244_v44 = vadd.f32 %v1243_v34, %v1242_v63 }
 0x436   :  { %v1245_v18 = vrot.slane %v1244_v44, 2 }
 0x438   :  { %v1246_v57 = vadd.f32 %v1245_v18, %v1244_v44 }
 0x43a   :  { %v1247_v2 = vrot.slane %v1246_v57, 1 }
 0x43c   :  { %v1248_v11 = vadd.f32 %v1247_v2, %v1246_v57 }
 0x43e   :  { %v1249_v46 = vmul.f32 0.015625, %v1248_v11 }
 0x440   :  { %v1250_v12 = vadd.f32 1e-05, %v1249_v46 }
 0x442   :  { %8825 = vrsqrt.f32 %v1250_v12 }
 0x44c   :  { %v8826_v21 = vpop.eup %8825 }
 0x44d   :  { %v1263_v27 = vmul.f32 %v8826_v21, %v1207_v20  ;;  %v1264_v28 = vmul.f32 %v8826_v21, %v1208_v23  ;;  %v1265_v30 = vmul.f32 %v8826_v21, %v1209_v29  ;;  %v1266_v35 = vmul.f32 %v8826_v21, %v1210_v54 }
 0x44e   :  { %v1267_v36 = vmul.f32 %v8826_v21, %v1211_v10  ;;  %v1252_v0 = vmul.f32 %v8826_v21, %v9328_v42  ;;  %v1253_v15 = vmul.f32 %v8826_v21, %v9331_v52  ;;  %v1254_v25 = vmul.f32 %v8826_v21, %v9334_v45 }
 0x44f   :  { %v1285_v16 = vmul.f32 %v1271_v17, %v1265_v30  ;;  %v1255_v19 = vmul.f32 %v8826_v21, %v9336_v53  ;;  %v1256_v55 = vmul.f32 %v8826_v21, %v9338_v8  ;;  %v1257_v37 = vmul.f32 %v8826_v21, %v9340_v9 }
 0x450   :  { %v1272_v31 = vmul.f32 %v1271_v17, %v1252_v0  ;;  %v1273_v62 = vmul.f32 %v1271_v17, %v1253_v15  ;;  %v1274_v20 = vmul.f32 %v1271_v17, %v1254_v25  ;;  %v1258_v23 = vmul.f32 %v8826_v21, %v9342_v32 }
 0x451   :  { %v1321_v29 = vadd.f32 %v9386_v22, %v1285_v16  ;;  %v1275_v54 = vmul.f32 %v1271_v17, %v1255_v19  ;;  %v1276_v42 = vmul.f32 %v1271_v17, %v1256_v55  ;;  %v1277_v10 = vmul.f32 %v1271_v17, %v1257_v37 }
 0x452   :  { %v1308_v52 = vadd.f32 %v1291_v14, %v1272_v31  ;;  %v1309_v63 = vadd.f32 %v1291_v14, %v1273_v62  ;;  %v1310_v45 = vadd.f32 %v1291_v14, %v1274_v20  ;;  %v1259_v34 = vmul.f32 %v8826_v21, %v9344_v33 }
 0x453   :  { %v1337_v53 = vmax.f32 %v1321_v29, 0.0  ;;  %v1311_v44 = vadd.f32 %v1291_v14, %v1275_v54  ;;  %v1312_v8 = vadd.f32 %v1291_v14, %v1276_v42  ;;  %v1313_v18 = vadd.f32 %v1291_v14, %v1277_v10 }
 0x454   :  { %v1324_v9 = vmax.f32 %v1308_v52, 0.0  ;;  %v1325_v57 = vmax.f32 %v1309_v63, 0.0  ;;  %v1326_v2 = vmax.f32 %v1310_v45, 0.0  ;;  %v1278_v11 = vmul.f32 %v1271_v17, %v1258_v23 }
 0x455   :  { %v1327_v46 = vmax.f32 %v1311_v44, 0.0  ;;  %v1328_v32 = vmax.f32 %v1312_v8, 0.0  ;;  %v1329_v12 = vmax.f32 %v1313_v18, 0.0  ;;  %v1279_v30 = vmul.f32 %v1271_v17, %v1259_v34 }
 0x456   :  { %v9397_v0 = vpack.c.bf16 %v1325_v57, %v1324_v9  ;;  %v1314_v15 = vadd.f32 %v1291_v14, %v1278_v11  ;;  %v1260_v25 = vmul.f32 %v8826_v21, %v9360_v47  ;;  %v1261_v16 = vmul.f32 %v8826_v21, %v9364_v3  ;;  %v1361_v11 = vpop.permute.xlu0 %1360 }
 0x457   :  { %v9401_v33 = vpack.c.bf16 %v1327_v46, %v1326_v2  ;;  %v9403_v19 = vpack.c.bf16 %v1329_v12, %v1328_v32  ;;  %v1315_v55 = vadd.f32 %v1291_v14, %v1279_v30  ;;  %v1262_v37 = vmul.f32 %v8826_v21, %v9368_v13 }
 0x458   :  { %10606 = vst [vmem:[#allocation25_spill] sm:$0xff] %v9397_v0  ;;  %8368 = vmatprep.subr.bf16.mxu0 %v9397_v0  ;;  %v1330_v31 = vmax.f32 %v1314_v15, 0.0  ;;  %v1280_v62 = vmul.f32 %v1271_v17, %v1260_v25  ;;  %v1281_v20 = vmul.f32 %v1271_v17, %v1261_v16  ;;  %v1283_v23 = vmul.f32 %v1271_v17, %v1263_v27 }
 0x459   :  { %10607 = vst [vmem:[#allocation26_spill] sm:$0xff] %v9401_v33  ;;  %10608 = vst [vmem:[#allocation27_spill] sm:$0xff] %v9403_v19  ;;  %8370 = vmatpush3.bf16.msra.mxu0 %v9397_v0  ;;  %v1331_v29 = vmax.f32 %v1315_v55, 0.0  ;;  %v1282_v54 = vmul.f32 %v1271_v17, %v1262_v37  ;;  %v1284_v47 = vmul.f32 %v1271_v17, %v1264_v28 }
 0x45a   :  { %v1286_v42 = vmul.f32 %v1271_v17, %v1266_v35  ;;  %8372 = vmatprep.subr.bf16.mxu0 %v9401_v33  ;;  %v1316_v3 = vadd.f32 %v9386_v22, %v1280_v62  ;;  %v1317_v14 = vadd.f32 %v9386_v22, %v1281_v20  ;;  %v1319_v13 = vadd.f32 %v9386_v22, %v1283_v23  ;;  %v1370_v46 = vpop.permute.xlu0 %1369  ;;  %v8697_v23 = vld [vmem:[%s10546_s1 + $0x40] sm:$0xff]  }
 0x45b   :  { %v1287_v21 = vmul.f32 %v1271_v17, %v1267_v36  ;;  %v9412_v10 = vpack.c.bf16 %v1331_v29, %v1330_v31  ;;  %v1318_v52 = vadd.f32 %v9386_v22, %v1282_v54  ;;  %v1320_v27 = vadd.f32 %v9386_v22, %v1284_v47  ;;  %v8705_v29 = vld [vmem:[#allocation2 + $0x140] sm:$0xff]   ;;  %v8706_v54 = vld [vmem:[#allocation2 + $0x148] sm:$0xff]   ;;  %v8707_v47 = vld [vmem:[#allocation2 + $0x150] sm:$0xff]  }
 0x45c   :  { %v1322_v63 = vadd.f32 %v9386_v22, %v1286_v42  ;;  %v1332_v45 = vmax.f32 %v1316_v3, 0.0  ;;  %v1333_v28 = vmax.f32 %v1317_v14, 0.0  ;;  %v1335_v35 = vmax.f32 %v1319_v13, 0.0  ;;  %7591 = vmatprep.subr.bf16.mxu1 %v8705_v29  ;;  %v8708_v42 = vld [vmem:[#allocation2 + $0x158] sm:$0xff]   ;;  %v8709_v3 = vld [vmem:[#allocation2 + $0x160] sm:$0xff]   ;;  %v8710_v14 = vld [vmem:[#allocation2 + $0x168] sm:$0xff]  }
 0x45d   :  { %10609 = vst [vmem:[#allocation28_spill] sm:$0xff] %v9412_v10  ;;  %v1323_v34 = vadd.f32 %v9386_v22, %v1287_v21  ;;  %8374 = vmatpush3.bf16.msra.mxu0 %v9401_v33  ;;  %v1334_v44 = vmax.f32 %v1318_v52, 0.0  ;;  %v1336_v8 = vmax.f32 %v1320_v27, 0.0  ;;  %v1364_v22 = vpop.permute.xlu1 %1363  ;;  %vm1405_vm2 = vcmp.eq.s32.totalorder %v9319_v43, %v1361_v11  ;;  %7592 = vmatpush3.bf16.msra.mxu1 %v8705_v29  ;;  %v8711_v13 = vld [vmem:[#allocation2 + $0x170] sm:$0xff]   ;;  %v8702_v29 = vld [vmem:[%s10546_s1 + $0x68] sm:$0xff]  }
 0x45e   :  { %v1338_v18 = vmax.f32 %v1322_v63, 0.0  ;;  %8376 = vmatprep.subr.bf16.mxu0 %v9403_v19  ;;  %v9420_v17 = vpack.c.bf16 %v1333_v28, %v1332_v45  ;;  %vm1406_vm1 = vcmp.eq.s32.totalorder %v9319_v43, %v1364_v22  ;;  %v1376_v12 = vpop.permute.xlu0 %1375  ;;  %vm1408_vm4 = vcmp.eq.s32.totalorder %v9319_v43, %v1370_v46  ;;  %7593 = vmatprep.subr.bf16.mxu1 %v8706_v54 }
 0x45f   :  { %v1339_v36 = vmax.f32 %v1323_v34, 0.0  ;;  %v9422_v9 = vpack.c.bf16 %v1335_v35, %v1334_v44  ;;  %v9424_v57 = vpack.c.bf16 %v1337_v53, %v1336_v8  ;;  %vm1410_vm6 = vcmp.eq.s32.totalorder %v9319_v43, %v1376_v12 }
 0x460   :  { %10610 = vst [vmem:[#allocation29_spill] sm:$0xff] %v9420_v17 }
 0x461   :  { %10611 = vst [vmem:[#allocation30_spill] sm:$0xff] %v9422_v9  ;;  %10612 = vst [vmem:[#allocation31_spill] sm:$0xff] %v9424_v57  ;;  %v9426_v2 = vpack.c.bf16 %v1339_v36, %v1338_v18  ;;  %8378 = vmatpush3.bf16.msra.mxu0 %v9403_v19  ;;  %v1367_v53 = vpop.permute.xlu1 %1366  ;;  %7594 = vmatpush3.bf16.msra.mxu1 %v8706_v54  ;;  %v8703_v54 = vld [vmem:[%s10546_s1 + $0x70] sm:$0xff]  }
 0x462   :  { %8380 = vmatprep.subr.bf16.mxu0 %v9412_v10  ;;  %vm1407_vm3 = vcmp.eq.s32.totalorder %v9319_v43, %v1367_v53  ;;  %v1382_v15 = vpop.permute.xlu0 %1381  ;;  %7595 = vmatprep.subr.bf16.mxu1 %v8707_v47 }
 0x463   :  { %10613 = vst [vmem:[#allocation32_spill] sm:$0xff] %v9426_v2  ;;  %vm1412_vm8 = vcmp.eq.s32.totalorder %v9319_v43, %v1382_v15 }
 0x465   :  { %8382 = vmatpush3.bf16.msra.mxu0 %v9412_v10  ;;  %v1373_v32 = vpop.permute.xlu1 %1372  ;;  %7596 = vmatpush3.bf16.msra.mxu1 %v8707_v47  ;;  %v8704_v47 = vld [vmem:[%s10546_s1 + $0x78] sm:$0xff]  }
 0x466   :  { %8384 = vmatprep.subr.bf16.mxu0 %v9420_v17  ;;  %vm1409_vm5 = vcmp.eq.s32.totalorder %v9319_v43, %v1373_v32  ;;  %v1388_v16 = vpop.permute.xlu0 %1387  ;;  %7597 = vmatprep.subr.bf16.mxu1 %v8708_v42 }
 0x467   :  { %vm1414_vm10 = vcmp.eq.s32.totalorder %v9319_v43, %v1388_v16 }
 0x469   :  { %8386 = vmatpush3.bf16.msra.mxu0 %v9420_v17  ;;  %v1379_v30 = vpop.permute.xlu1 %1378  ;;  %7598 = vmatpush3.bf16.msra.mxu1 %v8708_v42 }
 0x46a   :  { %8388 = vmatprep.subr.bf16.mxu0 %v9422_v9  ;;  %vm1411_vm7 = vcmp.eq.s32.totalorder %v9319_v43, %v1379_v30  ;;  %v1394_v37 = vpop.permute.xlu0 %1393  ;;  %7599 = vmatprep.subr.bf16.mxu1 %v8709_v3 }
 0x46b   :  { %vm1416_vm12 = vcmp.eq.s32.totalorder %v9319_v43, %v1394_v37 }
 0x46d   :  { %8390 = vmatpush3.bf16.msra.mxu0 %v9422_v9  ;;  %v1385_v25 = vpop.permute.xlu1 %1384  ;;  %7600 = vmatpush3.bf16.msra.mxu1 %v8709_v3  ;;  %v8712_v3 = vld [vmem:[#allocation2 + $0x178] sm:$0xff]  }
 0x46e   :  { %8392 = vmatprep.subr.bf16.mxu0 %v9424_v57  ;;  %vm1413_vm9 = vcmp.eq.s32.totalorder %v9319_v43, %v1385_v25  ;;  %v1400_v62 = vpop.permute.xlu0 %1399  ;;  %7601 = vmatprep.subr.bf16.mxu1 %v8710_v14 }
 0x46f   :  { %vm1418_vm14 = vcmp.eq.s32.totalorder %v9319_v43, %v1400_v62  ;;  %v8699_v62 = vld [vmem:[%s10546_s1 + $0x50] sm:$0xff]  }
 0x471   :  { %8394 = vmatpush3.bf16.msra.mxu0 %v9424_v57  ;;  %v1391_v55 = vpop.permute.xlu1 %1390  ;;  %7602 = vmatpush3.bf16.msra.mxu1 %v8710_v14  ;;  %v8713_v14 = vld [vmem:[#allocation2 + $0x100] sm:$0xff]  }
 0x472   :  { %8396 = vmatprep.subr.bf16.mxu0 %v9426_v2  ;;  %vm1415_vm11 = vcmp.eq.s32.totalorder %v9319_v43, %v1391_v55  ;;  %7603 = vmatprep.subr.bf16.mxu1 %v8711_v13  ;;  %v2335_v42 = vpop.permute.xlu0 %2334 }
 0x473   :  { %vm2381_vm0 = vcmp.eq.s32.totalorder %v9319_v43, %v2335_v42 }
 0x475   :  { %8398 = vmatpush3.bf16.msra.mxu0 %v9426_v2  ;;  %v1397_v31 = vpop.permute.xlu1 %1396  ;;  %7604 = vmatpush3.bf16.msra.mxu1 %v8711_v13 }
 0x476   :  { %vm1417_vm13 = vcmp.eq.s32.totalorder %v9319_v43, %v1397_v31  ;;  %v8698_v31 = vld [vmem:[%s10546_s1 + $0x48] sm:$0xff]   ;;  %7605 = vmatprep.subr.bf16.mxu1 %v8712_v3 }
 0x478   :  { %7536 = vmatmul.mubr.msk.f32.vlgmr.msra.gmra.mrb[32].mxu0 %vm1405_vm2, %v10552_v1 }
 0x479   :  { %7538 = vmatprep.mubr.msk.f32.mxu0 %vm1406_vm1, %v10552_v1  ;;  %v1403_v20 = vpop.permute.xlu1 %1402  ;;  %7606 = vmatpush3.bf16.msra.mxu1 %v8712_v3  ;;  %v8719_v3 = vld [vmem:[#allocation2 + $0x130] sm:$0xff]  }
 0x47a   :  { %vm1419_vm15 = vcmp.eq.s32.totalorder %v9319_v43, %v1403_v20  ;;  %v8700_v20 = vld [vmem:[%s10546_s1 + $0x58] sm:$0xff]   ;;  %7623 = vmatprep.subr.bf16.mxu1 %v8713_v14 }
 0x47c   :  { %7539 = vmatmul.mubr.msk.f32.gmra.mrb[34].mxu0 %vm1407_vm3, %v10552_v1 }
 0x47d   :  { %7541 = vmatprep.mubr.msk.f32.mxu0 %vm1408_vm4, %v10552_v1 }
 0x480   :  { %7542 = vmatmul.mubr.msk.f32.gmra.mrb[36].mxu0 %vm1409_vm5, %v10552_v1 }
 0x481   :  { %7544 = vmatprep.mubr.msk.f32.mxu0 %vm1410_vm6, %v10552_v1 }
 0x484   :  { %7545 = vmatmul.mubr.msk.f32.gmra.mrb[38].mxu0 %vm1411_vm7, %v10552_v1 }
 0x485   :  { %7547 = vmatprep.mubr.msk.f32.mxu0 %vm1412_vm8, %v10552_v1 }
 0x488   :  { %7548 = vmatmul.mubr.msk.f32.gmra.mrb[40].mxu0 %vm1413_vm9, %v10552_v1 }
 0x489   :  { %7550 = vmatprep.mubr.msk.f32.mxu0 %vm1414_vm10, %v10552_v1 }
 0x48c   :  { %7551 = vmatmul.mubr.msk.f32.gmra.mrb[42].mxu0 %vm1415_vm11, %v10552_v1 }
 0x48d   :  { %7553 = vmatprep.mubr.msk.f32.mxu0 %vm1416_vm12, %v10552_v1 }
 0x490   :  { %7554 = vmatmul.mubr.msk.f32.gmra.mrb[44].mxu0 %vm1417_vm13, %v10552_v1 }
 0x491   :  { %7556 = vmatprep.mubr.msk.f32.mxu0 %vm1418_vm14, %v10552_v1 }
 0x494   :  { %7557 = vmatmul.mubr.msk.f32.gmra.mrb[46].mxu0 %vm1419_vm15, %v10552_v1 }
 0x495   :  { %7575 = vmatprep.mubr.bf16.mxu0 %v8697_v23  ;;  %v8701_v23 = vld [vmem:[%s10546_s1 + $0x60] sm:$0xff]  }
 0x54b   :  { %v7537_v21 = vpop.f32.mrb[32].mxu0 }
 0x54c   :  { %v1518_v52 = vpop.f32.mrb[33].mxu0 }
 0x54d   :  { %v9472_v27 = vpack.c.bf16 %v7537_v21, %v1518_v52 }
 0x54f   :  { %v7540_v63 = vpop.f32.mrb[34].mxu0  ;;  %7559 = vmatprep.subr.bf16.mxu0 %v9472_v27 }
 0x550   :  { %v1528_v45 = vpop.f32.mrb[35].mxu0  ;;  %7560 = vmatpush3.bf16.msra.mxu0 %v9472_v27 }
 0x551   :  { %v9476_v28 = vpack.c.bf16 %v7540_v63, %v1528_v45 }
 0x553   :  { %v7543_v35 = vpop.f32.mrb[36].mxu0  ;;  %7561 = vmatprep.subr.bf16.mxu0 %v9476_v28 }
 0x554   :  { %v1538_v34 = vpop.f32.mrb[37].mxu0  ;;  %7562 = vmatpush3.bf16.msra.mxu0 %v9476_v28 }
 0x555   :  { %v9480_v44 = vpack.c.bf16 %v7543_v35, %v1538_v34  ;;  %v8714_v34 = vld [vmem:[#allocation2 + $0x108] sm:$0xff]  }
 0x557   :  { %v7546_v8 = vpop.f32.mrb[38].mxu0  ;;  %7563 = vmatprep.subr.bf16.mxu0 %v9480_v44 }
 0x558   :  { %v1548_v18 = vpop.f32.mrb[39].mxu0  ;;  %7564 = vmatpush3.bf16.msra.mxu0 %v9480_v44 }
 0x559   :  { %v9484_v36 = vpack.c.bf16 %v7546_v8, %v1548_v18 }
 0x55b   :  { %v7549_v22 = vpop.f32.mrb[40].mxu0  ;;  %7565 = vmatprep.subr.bf16.mxu0 %v9484_v36 }
 0x55c   :  { %v1558_v11 = vpop.f32.mrb[41].mxu0  ;;  %7566 = vmatpush3.bf16.msra.mxu0 %v9484_v36 }
 0x55d   :  { %v9488_v53 = vpack.c.bf16 %v7549_v22, %v1558_v11  ;;  %v8715_v22 = vld [vmem:[#allocation2 + $0x110] sm:$0xff]  }
 0x55f   :  { %v7552_v46 = vpop.f32.mrb[42].mxu0  ;;  %7567 = vmatprep.subr.bf16.mxu0 %v9488_v53 }
 0x560   :  { %v1568_v32 = vpop.f32.mrb[43].mxu0  ;;  %7568 = vmatpush3.bf16.msra.mxu0 %v9488_v53 }
 0x561   :  { %v9492_v12 = vpack.c.bf16 %v7552_v46, %v1568_v32 }
 0x563   :  { %v7555_v30 = vpop.f32.mrb[44].mxu0  ;;  %7569 = vmatprep.subr.bf16.mxu0 %v9492_v12 }
 0x564   :  { %v1578_v15 = vpop.f32.mrb[45].mxu0  ;;  %7570 = vmatpush3.bf16.msra.mxu0 %v9492_v12 }
 0x565   :  { %v9496_v25 = vpack.c.bf16 %v7555_v30, %v1578_v15  ;;  %v8716_v15 = vld [vmem:[#allocation2 + $0x118] sm:$0xff]  }
 0x567   :  { %v7558_v16 = vpop.f32.mrb[46].mxu0  ;;  %7571 = vmatprep.subr.bf16.mxu0 %v9496_v25 }
 0x568   :  { %v1588_v55 = vpop.f32.mrb[47].mxu0  ;;  %7572 = vmatpush3.bf16.msra.mxu0 %v9496_v25 }
 0x569   :  { %v9500_v37 = vpack.c.bf16 %v7558_v16, %v1588_v55 }
 0x56b   :  { %7573 = vmatprep.subr.bf16.mxu0 %v9500_v37 }
 0x56c   :  { %7574 = vmatpush3.bf16.msra.mxu0 %v9500_v37 }
 0x56f   :  { %7576 = vmatmul.mubr.bf16.vlgmr.msra.gmra.mrb[48].mxu0 %v8698_v31  ;;  %v8717_v31 = vld [vmem:[#allocation2 + $0x120] sm:$0xff]  }
 0x570   :  { %7579 = vmatprep.mubr.bf16.mxu0 %v8699_v62 }
 0x577   :  { %7580 = vmatmul.mubr.bf16.gmra.mrb[52].mxu0 %v8700_v20 }
 0x578   :  { %7583 = vmatprep.mubr.bf16.mxu0 %v8701_v23 }
 0x57f   :  { %7584 = vmatmul.mubr.bf16.gmra.mrb[56].mxu0 %v8702_v29 }
 0x580   :  { %7587 = vmatprep.mubr.bf16.mxu0 %v8703_v54  ;;  %v8718_v54 = vld [vmem:[#allocation2 + $0x128] sm:$0xff]  }
 0x587   :  { %7588 = vmatmul.mubr.bf16.gmra.mrb[60].mxu0 %v8704_v47 }
 0x588   :  { %7687 = vmatprep.mubr.msk.f32.mxu0 %vm2381_vm0, %v10552_v1 }
 0x642   :  { %v7577_v13 = vpop.f32.mrb[48].mxu0 }
 0x643   :  { %v1704_v21 = vpop.f32.mrb[49].mxu0 }
 0x644   :  { %v7578_v52 = vpop.f32.mrb[50].mxu0 }
 0x645   :  { %v1768_v63 = vpack.c.bf16 %v7578_v52, %v7577_v13  ;;  %v1707_v45 = vpop.f32.mrb[51].mxu0 }
 0x646   :  { %v1767_v35 = vpack.c.bf16 %v1707_v45, %v1704_v21 }
 0x648   :  { %7607 = vmatprep.mubr.bf16.mxu1 %v1767_v35 }
 0x649   :  { %7608 = vmatmul.mubr.bf16.vlgmr.msra.gmra.mrb[32].mxu1 %v1768_v63  ;;  %v8720_v63 = vld [vmem:[#allocation2 + $0x138] sm:$0xff]  }
 0x64a   :  { %v7581_v8 = vpop.f32.mrb[52].mxu0  ;;  %7624 = vmatpush3.bf16.msra.mxu1 %v8713_v14 }
 0x64b   :  { %v1720_v18 = vpop.f32.mrb[53].mxu0  ;;  %7625 = vmatprep.subr.bf16.mxu1 %v8714_v34 }
 0x64c   :  { %v7582_v11 = vpop.f32.mrb[54].mxu0 }
 0x64d   :  { %v1770_v46 = vpack.c.bf16 %v7582_v11, %v7581_v8  ;;  %v1723_v32 = vpop.f32.mrb[55].mxu0 }
 0x64e   :  { %v1769_v30 = vpack.c.bf16 %v1723_v32, %v1720_v18  ;;  %7626 = vmatpush3.bf16.msra.mxu1 %v8714_v34 }
 0x64f   :  { %7627 = vmatprep.subr.bf16.mxu1 %v8715_v22 }
 0x650   :  { %7611 = vmatprep.mubr.bf16.mxu1 %v1769_v30 }
 0x651   :  { %7612 = vmatmul.mubr.bf16.gmra.mrb[36].mxu1 %v1770_v46 }
 0x652   :  { %v7585_v16 = vpop.f32.mrb[56].mxu0  ;;  %7628 = vmatpush3.bf16.msra.mxu1 %v8715_v22 }
 0x653   :  { %v1736_v55 = vpop.f32.mrb[57].mxu0  ;;  %7629 = vmatprep.subr.bf16.mxu1 %v8716_v15 }
 0x654   :  { %v7586_v62 = vpop.f32.mrb[58].mxu0 }
 0x655   :  { %v1772_v20 = vpack.c.bf16 %v7586_v62, %v7585_v16  ;;  %v1739_v23 = vpop.f32.mrb[59].mxu0 }
 0x656   :  { %v1771_v29 = vpack.c.bf16 %v1739_v23, %v1736_v55  ;;  %7630 = vmatpush3.bf16.msra.mxu1 %v8716_v15 }
 0x657   :  { %7631 = vmatprep.subr.bf16.mxu1 %v8717_v31 }
 0x658   :  { %7615 = vmatprep.mubr.bf16.mxu1 %v1771_v29 }
 0x659   :  { %7616 = vmatmul.mubr.bf16.gmra.mrb[40].mxu1 %v1772_v20 }
 0x65a   :  { %v7589_v47 = vpop.f32.mrb[60].mxu0  ;;  %7632 = vmatpush3.bf16.msra.mxu1 %v8717_v31 }
 0x65b   :  { %v1752_v42 = vpop.f32.mrb[61].mxu0  ;;  %7633 = vmatprep.subr.bf16.mxu1 %v8718_v54 }
 0x65c   :  { %v7590_v14 = vpop.f32.mrb[62].mxu0 }
 0x65d   :  { %v1774_v13 = vpack.c.bf16 %v7590_v14, %v7589_v47  ;;  %v1755_v21 = vpop.f32.mrb[63].mxu0 }
 0x65e   :  { %v1773_v52 = vpack.c.bf16 %v1755_v21, %v1752_v42  ;;  %7634 = vmatpush3.bf16.msra.mxu1 %v8718_v54 }
 0x65f   :  { %7635 = vmatprep.subr.bf16.mxu1 %v8719_v3 }
 0x660   :  { %7619 = vmatprep.mubr.bf16.mxu1 %v1773_v52 }
 0x661   :  { %7620 = vmatmul.mubr.bf16.gmra.mrb[44].mxu1 %v1774_v13 }
 0x662   :  { %7636 = vmatpush3.bf16.msra.mxu1 %v8719_v3  ;;  %7639 = vmatprep.mubr.bf16.mxu1 %v9472_v27  ;;  %v9538_v27 = vld [vmem:[%s10550_s5 + $0x18] sm:$0xff] }
 0x663   :  { %7637 = vmatprep.subr.bf16.mxu1 %v8720_v63 }
 0x666   :  { %7638 = vmatpush3.bf16.msra.mxu1 %v8720_v63 }
 0x669   :  { %7640 = vmatmul.mubr.bf16.vlgmr.msra.gmra.mrb[32].mxu1 %v9476_v28  ;;  %v2101_v28 = vrot.slane %v9538_v27, %v8982_v26 }
 0x66a   :  { %7643 = vmatprep.mubr.bf16.mxu1 %v9480_v44 }
 0x671   :  { %7644 = vmatmul.mubr.bf16.gmra.mrb[36].mxu1 %v9484_v36 }
 0x672   :  { %7647 = vmatprep.mubr.bf16.mxu1 %v9488_v53 }
 0x679   :  { %7648 = vmatmul.mubr.bf16.gmra.mrb[40].mxu1 %v9492_v12 }
 0x67a   :  { %7651 = vmatprep.mubr.bf16.mxu1 %v9496_v25 }
 0x681   :  { %7652 = vmatmul.mubr.bf16.gmra.mrb[44].mxu1 %v9500_v37 }
 0x73c   :  { %v7641_v45 = vpop.f32.mrb[32].mxu1 }
 0x73d   :  { %v2034_v44 = vpop.f32.mrb[33].mxu1  ;;  %v2104_v8 = vadd.f32 %v7641_v45, %v2101_v28 }
 0x73e   :  { %v7642_v35 = vpop.f32.mrb[34].mxu1  ;;  %v2102_v34 = vadd.f32 %v2101_v28, %v2034_v44 }
 0x73f   :  { %v2037_v36 = vpop.f32.mrb[35].mxu1  ;;  %v2105_v18 = vadd.f32 %v7642_v35, %v2101_v28 }
 0x740   :  { %v2103_v53 = vadd.f32 %v2101_v28, %v2037_v36 }
 0x742   :  { %v2134_v12 = vadd.f32 %v2103_v53, %v2102_v34 }
 0x744   :  { %v2135_v25 = vadd.f32 %v2134_v12, %v2104_v8  ;;  %v7645_v22 = vpop.f32.mrb[36].mxu1 }
 0x745   :  { %v2050_v37 = vpop.f32.mrb[37].mxu1  ;;  %v2108_v15 = vadd.f32 %v7645_v22, %v2101_v28 }
 0x746   :  { %v2106_v11 = vadd.f32 %v2101_v28, %v2050_v37  ;;  %v2136_v46 = vadd.f32 %v2135_v25, %v2105_v18  ;;  %v7646_v32 = vpop.f32.mrb[38].mxu1 }
 0x747   :  { %v2053_v30 = vpop.f32.mrb[39].mxu1  ;;  %v2109_v62 = vadd.f32 %v7646_v32, %v2101_v28  ;;  %v9547_v23 = vmul.f32 0.0, %v2108_v15 }
 0x748   :  { %v9542_v16 = vmul.f32 0.0, %v2106_v11  ;;  %v2107_v55 = vadd.f32 %v2101_v28, %v2053_v30 }
 0x749   :  { %v9550_v42 = vmul.f32 0.0, %v2109_v62 }
 0x74a   :  { %v2137_v31 = vadd.f32 %v2136_v46, %v9542_v16  ;;  %v9545_v20 = vmul.f32 0.0, %v2107_v55 }
 0x74c   :  { %v2138_v29 = vadd.f32 %v2137_v31, %v9545_v20  ;;  %v7649_v54 = vpop.f32.mrb[40].mxu1 }
 0x74d   :  { %v2066_v47 = vpop.f32.mrb[41].mxu1  ;;  %v2112_v52 = vadd.f32 %v7649_v54, %v2101_v28 }
 0x74e   :  { %v2139_v3 = vadd.f32 %v2138_v29, %v9547_v23  ;;  %v2110_v14 = vadd.f32 %v2101_v28, %v2066_v47  ;;  %v7650_v13 = vpop.f32.mrb[42].mxu1 }
 0x74f   :  { %v2069_v21 = vpop.f32.mrb[43].mxu1  ;;  %v2113_v36 = vadd.f32 %v7650_v13, %v2101_v28  ;;  %v9557_v25 = vmul.f32 0.0, %v2112_v52 }
 0x750   :  { %v9553_v63 = vmul.f32 0.0, %v2110_v14  ;;  %v2140_v45 = vadd.f32 %v2139_v3, %v9550_v42  ;;  %v2111_v44 = vadd.f32 %v2101_v28, %v2069_v21 }
 0x751   :  { %v9559_v46 = vmul.f32 0.0, %v2113_v36 }
 0x752   :  { %v2141_v35 = vadd.f32 %v2140_v45, %v9553_v63  ;;  %v2127_v12 = vmul.f32 0.0, %v2111_v44 }
 0x754   :  { %v2142_v22 = vadd.f32 %v2141_v35, %v2127_v12  ;;  %v7653_v37 = vpop.f32.mrb[44].mxu1 }
 0x755   :  { %v2082_v11 = vpop.f32.mrb[45].mxu1  ;;  %v2116_v31 = vadd.f32 %v7653_v37, %v2101_v28 }
 0x756   :  { %v2143_v32 = vadd.f32 %v2142_v22, %v9557_v25  ;;  %v2114_v30 = vadd.f32 %v2101_v28, %v2082_v11  ;;  %v7654_v15 = vpop.f32.mrb[46].mxu1 }
 0x757   :  { %v2085_v55 = vpop.f32.mrb[47].mxu1  ;;  %v2117_v3 = vadd.f32 %v7654_v15, %v2101_v28  ;;  %v2132_v13 = vmul.f32 0.0, %v2116_v31 }
 0x758   :  { %v2130_v62 = vmul.f32 0.0, %v2114_v30  ;;  %v2144_v29 = vadd.f32 %v2143_v32, %v9559_v46  ;;  %v2115_v54 = vadd.f32 %v2101_v28, %v2085_v55 }
 0x759   :  { %v2133_v52 = vmul.f32 0.0, %v2117_v3 }
 0x75a   :  { %v2145_v47 = vadd.f32 %v2144_v29, %v2130_v62  ;;  %v2131_v14 = vmul.f32 0.0, %v2115_v54 }
 0x75c   :  { %v2146_v21 = vadd.f32 %v2145_v47, %v2131_v14 }
 0x75e   :  { %v2147_v45 = vadd.f32 %v2146_v21, %v2132_v13 }
 0x760   :  { %v2148_v44 = vadd.f32 %v2147_v45, %v2133_v52 }
 0x762   :  { %v2149_v35 = vrot.slane %v2148_v44, 4 }
 0x764   :  { %v2150_v36 = vadd.f32 %v2149_v35, %v2148_v44 }
 0x766   :  { %v2151_v1 = vrot.slane %v2150_v36, 2 }
 0x768   :  { %v2152_v22 = vadd.f32 %v2151_v1, %v2150_v36 }
 0x76a   :  { %v2153_v11 = vrot.slane %v2152_v22, 1 }
 0x76c   :  { %v2154_v5 = vadd.f32 %v2153_v11, %v2152_v22 }
 0x76e   :  { %v2155_v7 = vmul.f32 0.03125, %v2154_v5 }
 0x770   :  { %v9563_v37 = vsub.f32 %v2102_v34, %v2155_v7  ;;  %v9565_v30 = vsub.f32 %v2103_v53, %v2155_v7  ;;  %v9567_v32 = vsub.f32 %v2104_v8, %v2155_v7  ;;  %v9569_v28 = vsub.f32 %v2105_v18, %v2155_v7 }
 0x771   :  { %v2160_v15 = vsub.f32 %v9542_v16, %v2155_v7  ;;  %v2161_v55 = vsub.f32 %v9545_v20, %v2155_v7  ;;  %v2162_v31 = vsub.f32 %v9547_v23, %v2155_v7  ;;  %v2163_v29 = vsub.f32 %v9550_v42, %v2155_v7 }
 0x772   :  { %v2164_v1 = vsub.f32 %v9553_v63, %v2155_v7  ;;  %v2165_v54 = vsub.f32 %v2127_v12, %v2155_v7  ;;  %v2166_v5 = vsub.f32 %v9557_v25, %v2155_v7  ;;  %v2167_v34 = vsub.f32 %v9559_v46, %v2155_v7 }
 0x773   :  { %v2168_v53 = vsub.f32 %v2130_v62, %v2155_v7  ;;  %v2169_v8 = vsub.f32 %v2131_v14, %v2155_v7  ;;  %v2170_v47 = vsub.f32 %v2132_v13, %v2155_v7  ;;  %v2171_v18 = vsub.f32 %v2133_v52, %v2155_v7 }
 0x774   :  { %v2188_v16 = vmul.f32 %v9563_v37, %v9563_v37  ;;  %v2189_v20 = vmul.f32 %v9565_v30, %v9565_v30  ;;  %v9582_v23 = vmul.f32 0.0, %v2160_v15  ;;  %v2190_v42 = vmul.f32 %v9567_v32, %v9567_v32 }
 0x775   :  { %v2177_v12 = vmul.f32 0.0, %v2161_v55  ;;  %v2191_v25 = vmul.f32 %v9569_v28, %v9569_v28  ;;  %v9588_v62 = vmul.f32 0.0, %v2162_v31  ;;  %v9592_v14 = vmul.f32 0.0, %v2163_v29 }
 0x776   :  { %v2204_v63 = vadd.f32 %v2189_v20, %v2188_v16  ;;  %v2192_v7 = vmul.f32 %v9582_v23, %v9582_v23  ;;  %v9594_v52 = vmul.f32 0.0, %v2164_v1  ;;  %v9598_v35 = vmul.f32 0.0, %v2165_v54 }
 0x777   :  { %v2193_v13 = vmul.f32 %v2177_v12, %v2177_v12  ;;  %v2194_v45 = vmul.f32 %v9588_v62, %v9588_v62  ;;  %v2195_v36 = vmul.f32 %v9592_v14, %v9592_v14  ;;  %v9602_v11 = vmul.f32 0.0, %v2166_v5 }
 0x778   :  { %v2205_v46 = vadd.f32 %v2204_v63, %v2190_v42  ;;  %v2196_v15 = vmul.f32 %v9594_v52, %v9594_v52  ;;  %v2183_v31 = vmul.f32 0.0, %v2167_v34  ;;  %v2197_v29 = vmul.f32 %v9598_v35, %v9598_v35 }
 0x779   :  { %v2184_v16 = vmul.f32 0.0, %v2168_v53  ;;  %v2198_v54 = vmul.f32 %v9602_v11, %v9602_v11  ;;  %v2185_v42 = vmul.f32 0.0, %v2169_v8 }
 0x77a   :  { %v2206_v3 = vadd.f32 %v2205_v46, %v2191_v25  ;;  %v2199_v63 = vmul.f32 %v2183_v31, %v2183_v31  ;;  %v2186_v46 = vmul.f32 0.0, %v2170_v47  ;;  %v2267_v47 = vrot.slane %v9538_v27, %v9377_v56 }
 0x77b   :  { %v2200_v5 = vmul.f32 %v2184_v16, %v2184_v16 }
 0x77c   :  { %v2207_v21 = vadd.f32 %v2206_v3, %v2192_v7  ;;  %v2187_v3 = vmul.f32 0.0, %v2171_v18  ;;  %v2247_v18 = vrot.slane %v9538_v27, %v9380_v24 }
 0x77e   :  { %v2208_v44 = vadd.f32 %v2207_v21, %v2193_v13  ;;  %v2201_v13 = vmul.f32 %v2185_v42, %v2185_v42 }
 0x780   :  { %v2209_v22 = vadd.f32 %v2208_v44, %v2194_v45  ;;  %v2202_v45 = vmul.f32 %v2186_v46, %v2186_v46  ;;  %v2203_v44 = vmul.f32 %v2187_v3, %v2187_v3 }
 0x782   :  { %v2210_v55 = vadd.f32 %v2209_v22, %v2195_v36 }
 0x784   :  { %v2211_v1 = vadd.f32 %v2210_v55, %v2196_v15 }
 0x786   :  { %v2212_v20 = vadd.f32 %v2211_v1, %v2197_v29 }
 0x788   :  { %v2213_v25 = vadd.f32 %v2212_v20, %v2198_v54  ;;  %v9614_v20 = vmul.f32 0.0, %v2267_v47 }
 0x78a   :  { %v2214_v7 = vadd.f32 %v2213_v25, %v2199_v63 }
 0x78c   :  { %v2215_v21 = vadd.f32 %v2214_v7, %v2200_v5 }
 0x78e   :  { %v2216_v34 = vadd.f32 %v2215_v21, %v2201_v13 }
 0x790   :  { %v2217_v36 = vadd.f32 %v2216_v34, %v2202_v45 }
 0x792   :  { %v2218_v22 = vadd.f32 %v2217_v36, %v2203_v44 }
 0x794   :  { %v2219_v15 = vrot.slane %v2218_v22, 4 }
 0x796   :  { %v2220_v53 = vadd.f32 %v2219_v15, %v2218_v22 }
 0x798   :  { %v2221_v55 = vrot.slane %v2220_v53, 2 }
 0x79a   :  { %v2222_v4 = vadd.f32 %v2221_v55, %v2220_v53 }
 0x79c   :  { %v2223_v59 = vrot.slane %v2222_v4, 1 }
 0x79e   :  { %v2224_v29 = vadd.f32 %v2223_v59, %v2222_v4 }
 0x7a0   :  { %v2225_v8 = vmul.f32 0.03125, %v2224_v29 }
 0x7a2   :  { %v2226_v1 = vadd.f32 1e-05, %v2225_v8 }
 0x7a4   :  { %8827 = vrsqrt.f32 %v2226_v1 }
 0x7ae   :  { %v8828_v54 = vpop.eup %8827 }
 0x7af   :  { %v2239_v63 = vmul.f32 %v8828_v54, %v2183_v31  ;;  %v2240_v25 = vmul.f32 %v8828_v54, %v2184_v16  ;;  %v2241_v5 = vmul.f32 %v8828_v54, %v2185_v42  ;;  %v2242_v7 = vmul.f32 %v8828_v54, %v2186_v46 }
 0x7b0   :  { %v2243_v13 = vmul.f32 %v8828_v54, %v2187_v3  ;;  %v2228_v21 = vmul.f32 %v8828_v54, %v9563_v37  ;;  %v2229_v59 = vmul.f32 %v8828_v54, %v9565_v30  ;;  %v2230_v4 = vmul.f32 %v8828_v54, %v9567_v32 }
 0x7b1   :  { %v2261_v45 = vmul.f32 %v2247_v18, %v2241_v5  ;;  %v2231_v34 = vmul.f32 %v8828_v54, %v9569_v28  ;;  %v2232_v44 = vmul.f32 %v8828_v54, %v9582_v23  ;;  %v2233_v27 = vmul.f32 %v8828_v54, %v2177_v12 }
 0x7b2   :  { %v2248_v36 = vmul.f32 %v2247_v18, %v2228_v21  ;;  %v2249_v22 = vmul.f32 %v2247_v18, %v2229_v59  ;;  %v2250_v15 = vmul.f32 %v2247_v18, %v2230_v4  ;;  %v2234_v31 = vmul.f32 %v8828_v54, %v9588_v62 }
 0x7b3   :  { %v2297_v16 = vadd.f32 %v9614_v20, %v2261_v45  ;;  %v2251_v42 = vmul.f32 %v2247_v18, %v2231_v34  ;;  %v2252_v46 = vmul.f32 %v2247_v18, %v2232_v44  ;;  %v2253_v37 = vmul.f32 %v2247_v18, %v2233_v27 }
 0x7b4   :  { %v2284_v3 = vadd.f32 %v2267_v47, %v2248_v36  ;;  %v2285_v30 = vadd.f32 %v2267_v47, %v2249_v22  ;;  %v2286_v53 = vadd.f32 %v2267_v47, %v2250_v15  ;;  %v2235_v32 = vmul.f32 %v8828_v54, %v9592_v14 }
 0x7b5   :  { %v2313_v55 = vmax.f32 %v2297_v16, 0.0  ;;  %v2287_v28 = vadd.f32 %v2267_v47, %v2251_v42  ;;  %v2288_v23 = vadd.f32 %v9614_v20, %v2252_v46  ;;  %v2289_v12 = vadd.f32 %v9614_v20, %v2253_v37 }
 0x7b6   :  { %v2300_v29 = vmax.f32 %v2284_v3, 0.0  ;;  %v2301_v8 = vmax.f32 %v2285_v30, 0.0  ;;  %v2302_v1 = vmax.f32 %v2286_v53, 0.0  ;;  %v2254_v62 = vmul.f32 %v2247_v18, %v2234_v31 }
 0x7b7   :  { %v2303_v5 = vmax.f32 %v2287_v28, 0.0  ;;  %v2304_v21 = vmax.f32 %v2288_v23, 0.0  ;;  %v2305_v59 = vmax.f32 %v2289_v12, 0.0  ;;  %v2255_v4 = vmul.f32 %v2247_v18, %v2235_v32 }
 0x7b8   :  { %v9626_v45 = vpack.c.bf16 %v2301_v8, %v2300_v29  ;;  %v2290_v34 = vadd.f32 %v9614_v20, %v2254_v62  ;;  %v2236_v14 = vmul.f32 %v8828_v54, %v9594_v52  ;;  %v2237_v47 = vmul.f32 %v8828_v54, %v9598_v35 }
 0x7b9   :  { %v9631_v44 = vpack.c.bf16 %v2303_v5, %v2302_v1  ;;  %v9633_v27 = vpack.c.bf16 %v2305_v59, %v2304_v21  ;;  %v2291_v36 = vadd.f32 %v9614_v20, %v2255_v4  ;;  %v2238_v22 = vmul.f32 %v8828_v54, %v9602_v11  ;;  %v2341_v59 = vpop.permute.xlu0 %2340 }
 0x7ba   :  { %8400 = vmatprep.subr.bf16.mxu0 %v9626_v45  ;;  %v2306_v15 = vmax.f32 %v2290_v34, 0.0  ;;  %v2256_v31 = vmul.f32 %v2247_v18, %v2236_v14  ;;  %v2257_v16 = vmul.f32 %v2247_v18, %v2237_v47  ;;  %v2259_v42 = vmul.f32 %v2247_v18, %v2239_v63 }
 0x7bb   :  { %8402 = vmatpush3.bf16.msra.mxu0 %v9626_v45  ;;  %v2307_v46 = vmax.f32 %v2291_v36, 0.0  ;;  %v2258_v52 = vmul.f32 %v2247_v18, %v2238_v22  ;;  %v2260_v37 = vmul.f32 %v2247_v18, %v2240_v25  ;;  %v2262_v35 = vmul.f32 %v2247_v18, %v2242_v7 }
 0x7bc   :  { %8404 = vmatprep.subr.bf16.mxu0 %v9631_v44  ;;  %v2292_v3 = vadd.f32 %v9614_v20, %v2256_v31  ;;  %v2293_v30 = vadd.f32 %v9614_v20, %v2257_v16  ;;  %v2295_v11 = vadd.f32 %v9614_v20, %v2259_v42  ;;  %v2263_v54 = vmul.f32 %v2247_v18, %v2243_v13 }
 0x7bd   :  { %v9643_v53 = vpack.c.bf16 %v2307_v46, %v2306_v15  ;;  %v2294_v32 = vadd.f32 %v9614_v20, %v2258_v52  ;;  %v2296_v63 = vadd.f32 %v9614_v20, %v2260_v37  ;;  %v2298_v28 = vadd.f32 %v9614_v20, %v2262_v35  ;;  %v2347_v4 = vpop.permute.xlu0 %2346  ;;  %v8721_v35 = vld [vmem:[%s10546_s1 + $0x80] sm:$0xff]  }
 0x7be   :  { %v2308_v23 = vmax.f32 %v2292_v3, 0.0  ;;  %v2309_v25 = vmax.f32 %v2293_v30, 0.0  ;;  %v2311_v7 = vmax.f32 %v2295_v11, 0.0  ;;  %v2299_v12 = vadd.f32 %v9614_v20, %v2263_v54  ;;  %v2338_v20 = vpop.permute.xlu1 %2337  ;;  %v8729_v3 = vld [vmem:[#allocation2 + $0x1c0] sm:$0xff]   ;;  %v8730_v30 = vld [vmem:[#allocation2 + $0x1c8] sm:$0xff]   ;;  %v8731_v11 = vld [vmem:[#allocation2 + $0x1d0] sm:$0xff]  }
 0x7bf   :  { %8406 = vmatpush3.bf16.msra.mxu0 %v9631_v44  ;;  %v2310_v29 = vmax.f32 %v2294_v32, 0.0  ;;  %v2312_v8 = vmax.f32 %v2296_v63, 0.0  ;;  %v2314_v1 = vmax.f32 %v2298_v28, 0.0  ;;  %vm2382_vm1 = vcmp.eq.s32.totalorder %v9319_v43, %v2338_v20  ;;  %7743 = vmatprep.subr.bf16.mxu1 %v8729_v3  ;;  %v8732_v54 = vld [vmem:[#allocation2 + $0x1d8] sm:$0xff]   ;;  %v8733_v32 = vld [vmem:[#allocation2 + $0x1e0] sm:$0xff]   ;;  %v8734_v63 = vld [vmem:[#allocation2 + $0x1e8] sm:$0xff]  }
 0x7c0   :  { %8408 = vmatprep.subr.bf16.mxu0 %v9633_v27  ;;  %v9651_v18 = vpack.c.bf16 %v2309_v25, %v2308_v23  ;;  %v2315_v13 = vmax.f32 %v2299_v12, 0.0  ;;  %vm2383_vm2 = vcmp.eq.s32.totalorder %v9319_v43, %v2341_v59  ;;  %v10615_v47 = vmov 1.0   ;;  %7744 = vmatpush3.bf16.msra.mxu1 %v8729_v3  ;;  %v8735_v28 = vld [vmem:[#allocation2 + $0x1f0] sm:$0xff]   ;;  %v8722_v3 = vld [vmem:[%s10546_s1 + $0x88] sm:$0xff]  }
 0x7c1   :  { %v9653_v62 = vpack.c.bf16 %v2311_v7, %v2310_v29  ;;  %v9655_v5 = vpack.c.bf16 %v2313_v55, %v2312_v8  ;;  %v2353_v14 = vpop.permute.xlu0 %2352  ;;  %vm2385_vm4 = vcmp.eq.s32.totalorder %v9319_v43, %v2347_v4  ;;  %7745 = vmatprep.subr.bf16.mxu1 %v8730_v30 }
 0x7c2   :  { %v9657_v21 = vpack.c.bf16 %v2315_v13, %v2314_v1  ;;  %v2344_v55 = vpop.permute.xlu1 %2343  ;;  %vm2387_vm6 = vcmp.eq.s32.totalorder %v9319_v43, %v2353_v14 }
 0x7c3   :  { %8410 = vmatpush3.bf16.msra.mxu0 %v9633_v27  ;;  %vm2384_vm3 = vcmp.eq.s32.totalorder %v9319_v43, %v2344_v55 }
 0x7c4   :  { %10614 = vst [vmem:[#allocation33_spill] sm:$0xff] %v9657_v21  ;;  %8412 = vmatprep.subr.bf16.mxu0 %v9643_v53  ;;  %7746 = vmatpush3.bf16.msra.mxu1 %v8730_v30  ;;  %v8723_v30 = vld [vmem:[%s10546_s1 + $0x90] sm:$0xff]  }
 0x7c5   :  { %v2359_v22 = vpop.permute.xlu0 %2358  ;;  %7747 = vmatprep.subr.bf16.mxu1 %v8731_v11 }
 0x7c6   :  { %v2350_v34 = vpop.permute.xlu1 %2349  ;;  %vm2389_vm8 = vcmp.eq.s32.totalorder %v9319_v43, %v2359_v22 }
 0x7c7   :  { %8414 = vmatpush3.bf16.msra.mxu0 %v9643_v53  ;;  %vm2386_vm5 = vcmp.eq.s32.totalorder %v9319_v43, %v2350_v34 }
 0x7c8   :  { %8416 = vmatprep.subr.bf16.mxu0 %v9651_v18  ;;  %7748 = vmatpush3.bf16.msra.mxu1 %v8731_v11  ;;  %v8724_v11 = vld [vmem:[%s10546_s1 + $0x98] sm:$0xff]  }
 0x7c9   :  { %v2365_v31 = vpop.permute.xlu0 %2364  ;;  %7749 = vmatprep.subr.bf16.mxu1 %v8732_v54 }
 0x7ca   :  { %v2356_v36 = vpop.permute.xlu1 %2355  ;;  %vm2391_vm10 = vcmp.eq.s32.totalorder %v9319_v43, %v2365_v31 }
 0x7cb   :  { %8418 = vmatpush3.bf16.msra.mxu0 %v9651_v18  ;;  %vm2388_vm7 = vcmp.eq.s32.totalorder %v9319_v43, %v2356_v36 }
 0x7cc   :  { %8420 = vmatprep.subr.bf16.mxu0 %v9653_v62  ;;  %7750 = vmatpush3.bf16.msra.mxu1 %v8732_v54  ;;  %v8725_v54 = vld [vmem:[%s10546_s1 + $0xa0] sm:$0xff]  }
 0x7cd   :  { %v2371_v42 = vpop.permute.xlu0 %2370  ;;  %7751 = vmatprep.subr.bf16.mxu1 %v8733_v32 }
 0x7ce   :  { %v2362_v15 = vpop.permute.xlu1 %2361  ;;  %vm2393_vm12 = vcmp.eq.s32.totalorder %v9319_v43, %v2371_v42 }
 0x7cf   :  { %8422 = vmatpush3.bf16.msra.mxu0 %v9653_v62  ;;  %vm2390_vm9 = vcmp.eq.s32.totalorder %v9319_v43, %v2362_v15 }
 0x7d0   :  { %8424 = vmatprep.subr.bf16.mxu0 %v9655_v5  ;;  %7752 = vmatpush3.bf16.msra.mxu1 %v8733_v32  ;;  %v8726_v32 = vld [vmem:[%s10546_s1 + $0xa8] sm:$0xff]  }
 0x7d1   :  { %v2377_v52 = vpop.permute.xlu0 %2376  ;;  %7753 = vmatprep.subr.bf16.mxu1 %v8734_v63 }
 0x7d2   :  { %v2368_v16 = vpop.permute.xlu1 %2367  ;;  %vm2395_vm14 = vcmp.eq.s32.totalorder %v9319_v43, %v2377_v52 }
 0x7d3   :  { %8426 = vmatpush3.bf16.msra.mxu0 %v9655_v5  ;;  %vm2392_vm11 = vcmp.eq.s32.totalorder %v9319_v43, %v2368_v16 }
 0x7d4   :  { %8428 = vmatprep.subr.bf16.mxu0 %v9657_v21  ;;  %7754 = vmatpush3.bf16.msra.mxu1 %v8734_v63  ;;  %v8727_v63 = vld [vmem:[%s10546_s1 + $0xb0] sm:$0xff]  }
 0x7d5   :  { %7755 = vmatprep.subr.bf16.mxu1 %v8735_v28 }
 0x7d6   :  { %v2374_v46 = vpop.permute.xlu1 %2373 }
 0x7d7   :  { %8430 = vmatpush3.bf16.msra.mxu0 %v9657_v21  ;;  %vm2394_vm13 = vcmp.eq.s32.totalorder %v9319_v43, %v2374_v46 }
 0x7d8   :  { %7756 = vmatpush3.bf16.msra.mxu1 %v8735_v28  ;;  %v8728_v28 = vld [vmem:[%s10546_s1 + $0xb8] sm:$0xff]  }
 0x7da   :  { %7688 = vmatmul.mubr.msk.f32.vlgmr.msra.gmra.mrb[64].mxu0 %vm2382_vm1, %v10615_v47  ;;  %v2380_v37 = vpop.permute.xlu1 %2379 }
 0x7db   :  { %7690 = vmatprep.mubr.msk.f32.mxu0 %vm2383_vm2, %v10615_v47  ;;  %vm2396_vm15 = vcmp.eq.s32.totalorder %v9319_v43, %v2380_v37 }
 0x7de   :  { %7691 = vmatmul.mubr.msk.f32.gmra.mrb[66].mxu0 %vm2384_vm3, %v10615_v47 }
 0x7df   :  { %7693 = vmatprep.mubr.msk.f32.mxu0 %vm2385_vm4, %v10615_v47 }
 0x7e2   :  { %7694 = vmatmul.mubr.msk.f32.gmra.mrb[68].mxu0 %vm2386_vm5, %v10615_v47 }
 0x7e3   :  { %7696 = vmatprep.mubr.msk.f32.mxu0 %vm2387_vm6, %v10615_v47 }
 0x7e6   :  { %7697 = vmatmul.mubr.msk.f32.gmra.mrb[70].mxu0 %vm2388_vm7, %v10615_v47 }
 0x7e7   :  { %7699 = vmatprep.mubr.msk.f32.mxu0 %vm2389_vm8, %v10615_v47 }
 0x7ea   :  { %7700 = vmatmul.mubr.msk.f32.gmra.mrb[72].mxu0 %vm2390_vm9, %v10615_v47 }
 0x7eb   :  { %7702 = vmatprep.mubr.msk.f32.mxu0 %vm2391_vm10, %v10615_v47 }
 0x7ee   :  { %7703 = vmatmul.mubr.msk.f32.gmra.mrb[74].mxu0 %vm2392_vm11, %v10615_v47 }
 0x7ef   :  { %7705 = vmatprep.mubr.msk.f32.mxu0 %vm2393_vm12, %v10615_v47 }
 0x7f2   :  { %7706 = vmatmul.mubr.msk.f32.gmra.mrb[76].mxu0 %vm2394_vm13, %v10615_v47 }
 0x7f3   :  { %7708 = vmatprep.mubr.msk.f32.mxu0 %vm2395_vm14, %v10615_v47 }
 0x7f6   :  { %7709 = vmatmul.mubr.msk.f32.gmra.mrb[78].mxu0 %vm2396_vm15, %v10615_v47 }
 0x7f7   :  { %7727 = vmatprep.mubr.bf16.mxu0 %v8721_v35 }
 0x8ad   :  { %v7689_v23 = vpop.f32.mrb[64].mxu0 }
 0x8ae   :  { %v2495_v25 = vpop.f32.mrb[65].mxu0 }
 0x8af   :  { %v9703_v7 = vpack.c.bf16 %v7689_v23, %v2495_v25  ;;  %v3312_v23 = vpop.permute.xlu0 %3311  ;;  %v8736_v25 = vld [vmem:[#allocation2 + $0x1f8] sm:$0xff]  }
 0x8b0   :  { %vm3358_vm0 = vcmp.eq.s32.totalorder %v9319_v43, %v3312_v23  ;;  %7757 = vmatprep.subr.bf16.mxu1 %v8736_v25 }
 0x8b1   :  { %v7692_v12 = vpop.f32.mrb[66].mxu0  ;;  %7711 = vmatprep.subr.bf16.mxu0 %v9703_v7  ;;  %7758 = vmatpush3.bf16.msra.mxu1 %v8736_v25 }
 0x8b2   :  { %v2505_v29 = vpop.f32.mrb[67].mxu0  ;;  %7712 = vmatpush3.bf16.msra.mxu0 %v9703_v7 }
 0x8b3   :  { %v9707_v8 = vpack.c.bf16 %v7692_v12, %v2505_v29  ;;  %v8737_v12 = vld [vmem:[#allocation2 + $0x180] sm:$0xff]  }
 0x8b4   :  { %7775 = vmatprep.subr.bf16.mxu1 %v8737_v12 }
 0x8b5   :  { %v7695_v1 = vpop.f32.mrb[68].mxu0  ;;  %7713 = vmatprep.subr.bf16.mxu0 %v9707_v8 }
 0x8b6   :  { %v2515_v13 = vpop.f32.mrb[69].mxu0  ;;  %7714 = vmatpush3.bf16.msra.mxu0 %v9707_v8 }
 0x8b7   :  { %v9711_v20 = vpack.c.bf16 %v7695_v1, %v2515_v13 }
 0x8b9   :  { %v7698_v59 = vpop.f32.mrb[70].mxu0  ;;  %7715 = vmatprep.subr.bf16.mxu0 %v9711_v20 }
 0x8ba   :  { %v2525_v55 = vpop.f32.mrb[71].mxu0  ;;  %7716 = vmatpush3.bf16.msra.mxu0 %v9711_v20 }
 0x8bb   :  { %v9715_v4 = vpack.c.bf16 %v7698_v59, %v2525_v55 }
 0x8bd   :  { %v7701_v34 = vpop.f32.mrb[72].mxu0  ;;  %7717 = vmatprep.subr.bf16.mxu0 %v9715_v4 }
 0x8be   :  { %v2535_v14 = vpop.f32.mrb[73].mxu0  ;;  %7718 = vmatpush3.bf16.msra.mxu0 %v9715_v4 }
 0x8bf   :  { %v9719_v36 = vpack.c.bf16 %v7701_v34, %v2535_v14  ;;  %v8738_v14 = vld [vmem:[#allocation2 + $0x188] sm:$0xff]  }
 0x8c1   :  { %v7704_v22 = vpop.f32.mrb[74].mxu0  ;;  %7719 = vmatprep.subr.bf16.mxu0 %v9719_v36 }
 0x8c2   :  { %v2545_v15 = vpop.f32.mrb[75].mxu0  ;;  %7720 = vmatpush3.bf16.msra.mxu0 %v9719_v36 }
 0x8c3   :  { %v9723_v31 = vpack.c.bf16 %v7704_v22, %v2545_v15 }
 0x8c5   :  { %v7707_v16 = vpop.f32.mrb[76].mxu0  ;;  %7721 = vmatprep.subr.bf16.mxu0 %v9723_v31 }
 0x8c6   :  { %v2555_v42 = vpop.f32.mrb[77].mxu0  ;;  %7722 = vmatpush3.bf16.msra.mxu0 %v9723_v31 }
 0x8c7   :  { %v9727_v46 = vpack.c.bf16 %v7707_v16, %v2555_v42  ;;  %v8739_v16 = vld [vmem:[#allocation2 + $0x190] sm:$0xff]  }
 0x8c9   :  { %v7710_v52 = vpop.f32.mrb[78].mxu0  ;;  %7723 = vmatprep.subr.bf16.mxu0 %v9727_v46 }
 0x8ca   :  { %v2565_v37 = vpop.f32.mrb[79].mxu0  ;;  %7724 = vmatpush3.bf16.msra.mxu0 %v9727_v46 }
 0x8cb   :  { %v9731_v35 = vpack.c.bf16 %v7710_v52, %v2565_v37 }
 0x8cd   :  { %7725 = vmatprep.subr.bf16.mxu0 %v9731_v35 }
 0x8ce   :  { %7726 = vmatpush3.bf16.msra.mxu0 %v9731_v35 }
 0x8d1   :  { %7728 = vmatmul.mubr.bf16.vlgmr.msra.gmra.mrb[80].mxu0 %v8722_v3 }
 0x8d2   :  { %7731 = vmatprep.mubr.bf16.mxu0 %v8723_v30  ;;  %v8740_v30 = vld [vmem:[#allocation2 + $0x198] sm:$0xff]  }
 0x8d9   :  { %7732 = vmatmul.mubr.bf16.gmra.mrb[84].mxu0 %v8724_v11 }
 0x8da   :  { %7735 = vmatprep.mubr.bf16.mxu0 %v8725_v54 }
 0x8e1   :  { %7736 = vmatmul.mubr.bf16.gmra.mrb[88].mxu0 %v8726_v32  ;;  %v8741_v32 = vld [vmem:[#allocation2 + $0x1a0] sm:$0xff]  }
 0x8e2   :  { %7739 = vmatprep.mubr.bf16.mxu0 %v8727_v63 }
 0x8e9   :  { %7740 = vmatmul.mubr.bf16.gmra.mrb[92].mxu0 %v8728_v28 }
 0x8ea   :  { %7839 = vmatprep.mubr.msk.f32.mxu0 %vm3358_vm0, %v10615_v47 }
 0x9a4   :  { %v7729_v29 = vpop.f32.mrb[80].mxu0 }
 0x9a5   :  { %v2681_v1 = vpop.f32.mrb[81].mxu0 }
 0x9a6   :  { %v7730_v13 = vpop.f32.mrb[82].mxu0 }
 0x9a7   :  { %v2745_v59 = vpack.c.bf16 %v7730_v13, %v7729_v29  ;;  %v2684_v55 = vpop.f32.mrb[83].mxu0  ;;  %v8743_v13 = vld [vmem:[#allocation2 + $0x1b0] sm:$0xff]  }
 0x9a8   :  { %v2744_v34 = vpack.c.bf16 %v2684_v55, %v2681_v1 }
 0x9aa   :  { %7759 = vmatprep.mubr.bf16.mxu1 %v2744_v34 }
 0x9ab   :  { %7760 = vmatmul.mubr.bf16.vlgmr.msra.gmra.mrb[48].mxu1 %v2745_v59 }
 0x9ac   :  { %7776 = vmatpush3.bf16.msra.mxu1 %v8737_v12  ;;  %v7733_v22 = vpop.f32.mrb[84].mxu0  ;;  %v8742_v12 = vld [vmem:[#allocation2 + $0x1a8] sm:$0xff]  }
 0x9ad   :  { %v2697_v15 = vpop.f32.mrb[85].mxu0  ;;  %7777 = vmatprep.subr.bf16.mxu1 %v8738_v14 }
 0x9ae   :  { %v7734_v42 = vpop.f32.mrb[86].mxu0 }
 0x9af   :  { %v2747_v52 = vpack.c.bf16 %v7734_v42, %v7733_v22  ;;  %v2700_v37 = vpop.f32.mrb[87].mxu0  ;;  %v8744_v22 = vld [vmem:[#allocation2 + $0x1b8] sm:$0xff]  }
 0x9b0   :  { %v2746_v3 = vpack.c.bf16 %v2700_v37, %v2697_v15  ;;  %7778 = vmatpush3.bf16.msra.mxu1 %v8738_v14  ;;  %v9813_v15 = vld [vmem:[%s10546_s1 + $0x58] sm:$0xff]  }
 0x9b1   :  { %7779 = vmatprep.subr.bf16.mxu1 %v8739_v16 }
 0x9b2   :  { %7763 = vmatprep.mubr.bf16.mxu1 %v2746_v3  ;;  %v9835_v3 = vld [vmem:[%s10546_s1 + $0x70] sm:$0xff]  }
 0x9b3   :  { %7764 = vmatmul.mubr.bf16.gmra.mrb[52].mxu1 %v2747_v52  ;;  %v9827_v52 = vld [vmem:[%s10546_s1 + $0x68] sm:$0xff]  }
 0x9b4   :  { %7780 = vmatpush3.bf16.msra.mxu1 %v8739_v16  ;;  %v7737_v11 = vpop.f32.mrb[88].mxu0  ;;  %v9819_v16 = vld [vmem:[%s10546_s1 + $0x60] sm:$0xff]  }
 0x9b5   :  { %v2713_v54 = vpop.f32.mrb[89].mxu0  ;;  %7781 = vmatprep.subr.bf16.mxu1 %v8740_v30 }
 0x9b6   :  { %v7738_v63 = vpop.f32.mrb[90].mxu0 }
 0x9b7   :  { %v2749_v28 = vpack.c.bf16 %v7738_v63, %v7737_v11  ;;  %v2716_v23 = vpop.f32.mrb[91].mxu0  ;;  %v9842_v11 = vld [vmem:[%s10546_s1 + $0x78] sm:$0xff]  }
 0x9b8   :  { %v2748_v25 = vpack.c.bf16 %v2716_v23, %v2713_v54  ;;  %7782 = vmatpush3.bf16.msra.mxu1 %v8740_v30  ;;  %v9849_v54 = vld [vmem:[%s10550_s5 + $0x20] sm:$0xff] }
 0x9b9   :  { %7783 = vmatprep.subr.bf16.mxu1 %v8741_v32 }
 0x9ba   :  { %7767 = vmatprep.mubr.bf16.mxu1 %v2748_v25 }
 0x9bb   :  { %7768 = vmatmul.mubr.bf16.gmra.mrb[56].mxu1 %v2749_v28 }
 0x9bc   :  { %7784 = vmatpush3.bf16.msra.mxu1 %v8741_v32  ;;  %v7741_v29 = vpop.f32.mrb[92].mxu0  ;;  %v3078_v32 = vrot.slane %v9849_v54, %v8982_v26 }
 0x9bd   :  { %v2729_v1 = vpop.f32.mrb[93].mxu0  ;;  %7785 = vmatprep.subr.bf16.mxu1 %v8742_v12 }
 0x9be   :  { %v7742_v59 = vpop.f32.mrb[94].mxu0 }
 0x9bf   :  { %v2751_v55 = vpack.c.bf16 %v7742_v59, %v7741_v29  ;;  %v2732_v34 = vpop.f32.mrb[95].mxu0 }
 0x9c0   :  { %v2750_v14 = vpack.c.bf16 %v2732_v34, %v2729_v1  ;;  %7786 = vmatpush3.bf16.msra.mxu1 %v8742_v12 }
 0x9c1   :  { %7787 = vmatprep.subr.bf16.mxu1 %v8743_v13 }
 0x9c2   :  { %7771 = vmatprep.mubr.bf16.mxu1 %v2750_v14 }
 0x9c3   :  { %7772 = vmatmul.mubr.bf16.gmra.mrb[60].mxu1 %v2751_v55 }
 0x9c4   :  { %7788 = vmatpush3.bf16.msra.mxu1 %v8743_v13  ;;  %7791 = vmatprep.mubr.bf16.mxu1 %v9703_v7  ;;  %v9770_v7 = vpop.permute.xlu0 %3317 }
 0x9c5   :  { %7789 = vmatprep.subr.bf16.mxu1 %v8744_v22  ;;  %vm3360_vm3 = vcmp.eq.s32.totalorder %v9319_v43, %v9770_v7 }
 0x9c8   :  { %7790 = vmatpush3.bf16.msra.mxu1 %v8744_v22 }
 0x9c9   :  { %7895 = vmatprep.subr.bf16.mxu1 %v9626_v45 }
 0x9cb   :  { %7792 = vmatmul.mubr.bf16.vlgmr.msra.gmra.mrb[48].mxu1 %v9707_v8  ;;  %v9778_v8 = vpop.permute.xlu0 %3323 }
 0x9cc   :  { %7896 = vmatpush3.bf16.msra.mxu1 %v9626_v45  ;;  %7795 = vmatprep.mubr.bf16.mxu1 %v9711_v20  ;;  %vm3362_vm5 = vcmp.eq.s32.totalorder %v9319_v43, %v9778_v8 }
 0x9cd   :  { %7897 = vmatprep.subr.bf16.mxu1 %v9631_v44 }
 0x9cf   :  { %v9783_v20 = vpop.permute.xlu0 %3329 }
 0x9d0   :  { %7898 = vmatpush3.bf16.msra.mxu1 %v9631_v44  ;;  %vm3364_vm7 = vcmp.eq.s32.totalorder %v9319_v43, %v9783_v20 }
 0x9d1   :  { %7899 = vmatprep.subr.bf16.mxu1 %v9633_v27 }
 0x9d3   :  { %7796 = vmatmul.mubr.bf16.gmra.mrb[52].mxu1 %v9715_v4  ;;  %v9789_v4 = vld [vmem:[%s10546_s1 + $0x40] sm:$0xff]  }
 0x9d4   :  { %7900 = vmatpush3.bf16.msra.mxu1 %v9633_v27  ;;  %7799 = vmatprep.mubr.bf16.mxu1 %v9719_v36  ;;  %v9794_v36 = vpop.permute.xlu0 %3335 }
 0x9d5   :  { %7901 = vmatprep.subr.bf16.mxu1 %v9643_v53  ;;  %vm3366_vm9 = vcmp.eq.s32.totalorder %v9319_v43, %v9794_v36 }
 0x9d8   :  { %7902 = vmatpush3.bf16.msra.mxu1 %v9643_v53 }
 0x9d9   :  { %7903 = vmatprep.subr.bf16.mxu1 %v9651_v18 }
 0x9db   :  { %7800 = vmatmul.mubr.bf16.gmra.mrb[56].mxu1 %v9723_v31  ;;  %v9799_v31 = vld [vmem:[%s10546_s1 + $0x48] sm:$0xff]  }
 0x9dc   :  { %7904 = vmatpush3.bf16.msra.mxu1 %v9651_v18  ;;  %7803 = vmatprep.mubr.bf16.mxu1 %v9727_v46  ;;  %v9805_v46 = vld [vmem:[%s10546_s1 + $0x50] sm:$0xff]  }
 0x9dd   :  { %7905 = vmatprep.subr.bf16.mxu1 %v9653_v62 }
 0x9e0   :  { %7906 = vmatpush3.bf16.msra.mxu1 %v9653_v62 }
 0x9e1   :  { %7907 = vmatprep.subr.bf16.mxu1 %v9655_v5 }
 0x9e3   :  { %7804 = vmatmul.mubr.bf16.gmra.mrb[60].mxu1 %v9731_v35  ;;  %v9808_v35 = vpop.permute.xlu0 %3341 }
 0x9e4   :  { %7908 = vmatpush3.bf16.msra.mxu1 %v9655_v5  ;;  %7911 = vmatprep.mubr.bf16.mxu1 %v9789_v4  ;;  %vm3368_vm11 = vcmp.eq.s32.totalorder %v9319_v43, %v9808_v35 }
 0x9e5   :  { %7909 = vmatprep.subr.bf16.mxu1 %v9657_v21 }
 0x9e7   :  { %v9822_v42 = vpop.permute.xlu0 %3347 }
 0x9e8   :  { %7910 = vmatpush3.bf16.msra.mxu1 %v9657_v21  ;;  %vm3370_vm13 = vcmp.eq.s32.totalorder %v9319_v43, %v9822_v42 }
 0x9eb   :  { %7912 = vmatmul.mubr.bf16.vlgmr.msra.gmra.mrb[64].mxu1 %v9799_v31  ;;  %v9830_v37 = vpop.permute.xlu0 %3353 }
 0x9ec   :  { %7915 = vmatprep.mubr.bf16.mxu1 %v9805_v46  ;;  %vm3372_vm15 = vcmp.eq.s32.totalorder %v9319_v43, %v9830_v37 }
 0x9ef   :  { %v4690_v30 = vpop.permute.xlu0 %4689 }
 0x9f0   :  { %vm4736_vm1 = vcmp.eq.s32.totalorder %v9319_v43, %v4690_v30 }
 0x9f3   :  { %7916 = vmatmul.mubr.bf16.gmra.mrb[68].mxu1 %v9813_v15 }
 0x9f4   :  { %7919 = vmatprep.mubr.bf16.mxu1 %v9819_v16 }
 0x9fb   :  { %7920 = vmatmul.mubr.bf16.gmra.mrb[72].mxu1 %v9827_v52 }
 0x9fc   :  { %7923 = vmatprep.mubr.bf16.mxu1 %v9835_v3 }
 0xa03   :  { %7924 = vmatmul.mubr.bf16.gmra.mrb[76].mxu1 %v9842_v11 }
 0xa04   :  { %8087 = vmatprep.mubr.msk.f32.mxu1 %vm4736_vm1, %v10615_v47 }
 0xa9e   :  { %v7793_v63 = vpop.f32.mrb[48].mxu1 }
 0xa9f   :  { %v3011_v28 = vpop.f32.mrb[49].mxu1  ;;  %v3081_v23 = vadd.f32 %v7793_v63, %v3078_v32 }
 0xaa0   :  { %v7794_v25 = vpop.f32.mrb[50].mxu1  ;;  %v9853_v29 = vadd.f32 %v3078_v32, %v3011_v28 }
 0xaa1   :  { %v3014_v12 = vpop.f32.mrb[51].mxu1  ;;  %v3082_v1 = vadd.f32 %v7794_v25, %v3078_v32  ;;  %v9855_v59 = vmul.f32 0.0, %v3081_v23 }
 0xaa2   :  { %v3080_v13 = vadd.f32 %v3078_v32, %v3014_v12 }
 0xaa3   :  { %v9858_v34 = vmul.f32 0.0, %v3082_v1 }
 0xaa4   :  { %v3111_v55 = vadd.f32 %v3080_v13, %v9853_v29 }
 0xaa6   :  { %v3112_v14 = vadd.f32 %v3111_v55, %v9855_v59  ;;  %v7797_v22 = vpop.f32.mrb[52].mxu1 }
 0xaa7   :  { %v3027_v30 = vpop.f32.mrb[53].mxu1  ;;  %v3085_v6 = vadd.f32 %v7797_v22, %v3078_v32 }
 0xaa8   :  { %v3083_v61 = vadd.f32 %v3078_v32, %v3027_v30  ;;  %v3113_v60 = vadd.f32 %v3112_v14, %v9858_v34  ;;  %v7798_v63 = vpop.f32.mrb[54].mxu1 }
 0xaa9   :  { %v3030_v58 = vpop.f32.mrb[55].mxu1  ;;  %v3086_v12 = vadd.f32 %v7798_v63, %v3078_v32  ;;  %v9867_v1 = vmul.f32 0.0, %v3085_v6 }
 0xaaa   :  { %v9862_v28 = vmul.f32 0.0, %v3083_v61  ;;  %v3084_v25 = vadd.f32 %v3078_v32, %v3030_v58 }
 0xaab   :  { %v9870_v30 = vmul.f32 0.0, %v3086_v12 }
 0xaac   :  { %v3114_v23 = vadd.f32 %v3113_v60, %v9862_v28  ;;  %v9865_v49 = vmul.f32 0.0, %v3084_v25 }
 0xaae   :  { %v3115_v55 = vadd.f32 %v3114_v23, %v9865_v49  ;;  %v7801_v51 = vpop.f32.mrb[56].mxu1 }
 0xaaf   :  { %v3043_v50 = vpop.f32.mrb[57].mxu1  ;;  %v3089_v39 = vadd.f32 %v7801_v51, %v3078_v32 }
 0xab0   :  { %v3116_v14 = vadd.f32 %v3115_v55, %v9867_v1  ;;  %v3087_v48 = vadd.f32 %v3078_v32, %v3043_v50  ;;  %v7802_v22 = vpop.f32.mrb[58].mxu1 }
 0xab1   :  { %v3046_v61 = vpop.f32.mrb[59].mxu1  ;;  %v3090_v25 = vadd.f32 %v7802_v22, %v3078_v32  ;;  %v9879_v23 = vmul.f32 0.0, %v3089_v39 }
 0xab2   :  { %v9873_v58 = vmul.f32 0.0, %v3087_v48  ;;  %v3117_v60 = vadd.f32 %v3116_v14, %v9870_v30  ;;  %v3088_v63 = vadd.f32 %v3078_v32, %v3046_v61 }
 0xab3   :  { %v9882_v50 = vmul.f32 0.0, %v3090_v25 }
 0xab4   :  { %v3118_v6 = vadd.f32 %v3117_v60, %v9873_v58  ;;  %v9877_v41 = vmul.f32 0.0, %v3088_v63 }
 0xab6   :  { %v3119_v12 = vadd.f32 %v3118_v6, %v9877_v41  ;;  %v7805_v40 = vpop.f32.mrb[60].mxu1 }
 0xab7   :  { %v3059_v55 = vpop.f32.mrb[61].mxu1  ;;  %v3093_v14 = vadd.f32 %v7805_v40, %v3078_v32 }
 0xab8   :  { %v3120_v51 = vadd.f32 %v3119_v12, %v9879_v23  ;;  %v3091_v48 = vadd.f32 %v3078_v32, %v3059_v55  ;;  %v7806_v38 = vpop.f32.mrb[62].mxu1 }
 0xab9   :  { %v3062_v2 = vpop.f32.mrb[63].mxu1  ;;  %v3094_v57 = vadd.f32 %v7806_v38, %v3078_v32  ;;  %v3109_v9 = vmul.f32 0.0, %v3093_v14 }
 0xaba   :  { %v3107_v61 = vmul.f32 0.0, %v3091_v48  ;;  %v3121_v60 = vadd.f32 %v3120_v51, %v9882_v50  ;;  %v3092_v22 = vadd.f32 %v3078_v32, %v3062_v2 }
 0xabb   :  { %v9886_v6 = vmul.f32 0.0, %v3094_v57 }
 0xabc   :  { %v3122_v63 = vadd.f32 %v3121_v60, %v3107_v61  ;;  %v3108_v39 = vmul.f32 0.0, %v3092_v22 }
 0xabe   :  { %v3123_v17 = vadd.f32 %v3122_v63, %v3108_v39 }
 0xac0   :  { %v3124_v10 = vadd.f32 %v3123_v17, %v3109_v9 }
 0xac2   :  { %v3125_v25 = vadd.f32 %v3124_v10, %v9886_v6 }
 0xac4   :  { %v3126_v19 = vrot.slane %v3125_v25, 4 }
 0xac6   :  { %v3127_v12 = vadd.f32 %v3126_v19, %v3125_v25 }
 0xac8   :  { %v3128_v55 = vrot.slane %v3127_v12, 2 }
 0xaca   :  { %v3129_v33 = vadd.f32 %v3128_v55, %v3127_v12 }
 0xacc   :  { %v3130_v0 = vrot.slane %v3129_v33, 1 }
 0xace   :  { %v3131_v40 = vadd.f32 %v3130_v0, %v3129_v33 }
 0xad0   :  { %v3132_v48 = vmul.f32 0.0625, %v3131_v40 }
 0xad2   :  { %v9890_v51 = vsub.f32 %v9853_v29, %v3132_v48  ;;  %v9892_v2 = vsub.f32 %v3080_v13, %v3132_v48  ;;  %v3135_v38 = vsub.f32 %v9855_v59, %v3132_v48  ;;  %v3136_v57 = vsub.f32 %v9858_v34, %v3132_v48 }
 0xad3   :  { %v3137_v17 = vsub.f32 %v9862_v28, %v3132_v48  ;;  %v3138_v10 = vsub.f32 %v9865_v49, %v3132_v48  ;;  %v3139_v19 = vsub.f32 %v9867_v1, %v3132_v48  ;;  %v3140_v32 = vsub.f32 %v9870_v30, %v3132_v48 }
 0xad4   :  { %v3141_v0 = vsub.f32 %v9873_v58, %v3132_v48  ;;  %v3142_v33 = vsub.f32 %v9877_v41, %v3132_v48  ;;  %v3143_v29 = vsub.f32 %v9879_v23, %v3132_v48  ;;  %v3144_v13 = vsub.f32 %v9882_v50, %v3132_v48 }
 0xad5   :  { %v3145_v14 = vsub.f32 %v3107_v61, %v3132_v48  ;;  %v3146_v59 = vsub.f32 %v3108_v39, %v3132_v48  ;;  %v3147_v60 = vsub.f32 %v3109_v9, %v3132_v48  ;;  %v3148_v34 = vsub.f32 %v9886_v6, %v3132_v48 }
 0xad6   :  { %v3151_v28 = vmul.f32 0.0, %v3135_v38  ;;  %v3165_v49 = vmul.f32 %v9890_v51, %v9890_v51  ;;  %v3166_v1 = vmul.f32 %v9892_v2, %v9892_v2  ;;  %v3152_v30 = vmul.f32 0.0, %v3136_v57 }
 0xad7   :  { %v3153_v22 = vmul.f32 0.0, %v3137_v17  ;;  %v3154_v63 = vmul.f32 0.0, %v3138_v10  ;;  %v3155_v50 = vmul.f32 0.0, %v3139_v19  ;;  %v3156_v9 = vmul.f32 0.0, %v3140_v32 }
 0xad8   :  { %v3167_v58 = vmul.f32 %v3151_v28, %v3151_v28  ;;  %v3181_v41 = vadd.f32 %v3166_v1, %v3165_v49  ;;  %v3168_v23 = vmul.f32 %v3152_v30, %v3152_v30  ;;  %v9909_v55 = vmul.f32 0.0, %v3141_v0 }
 0xad9   :  { %v3169_v61 = vmul.f32 %v3153_v22, %v3153_v22  ;;  %v3170_v12 = vmul.f32 %v3154_v63, %v3154_v63  ;;  %v3171_v40 = vmul.f32 %v3155_v50, %v3155_v50  ;;  %v9911_v38 = vmul.f32 0.0, %v3142_v33 }
 0xada   :  { %v3182_v25 = vadd.f32 %v3181_v41, %v3167_v58  ;;  %v3172_v26 = vmul.f32 %v3156_v9, %v3156_v9  ;;  %v9913_v21 = vmul.f32 0.0, %v3143_v29  ;;  %v3173_v17 = vmul.f32 %v9909_v55, %v9909_v55 }
 0xadb   :  { %v9917_v19 = vmul.f32 0.0, %v3144_v13  ;;  %v3174_v32 = vmul.f32 %v9911_v38, %v9911_v38  ;;  %v9921_v0 = vmul.f32 0.0, %v3145_v14  ;;  %v3162_v58 = vmul.f32 0.0, %v3146_v59 }
 0xadc   :  { %v3183_v39 = vadd.f32 %v3182_v25, %v3168_v23  ;;  %v3175_v33 = vmul.f32 %v9913_v21, %v9913_v21  ;;  %v9927_v23 = vmul.f32 0.0, %v3147_v60  ;;  %v9931_v25 = vmul.f32 0.0, %v3148_v34 }
 0xadd   :  { %v3176_v29 = vmul.f32 %v9917_v19, %v9917_v19 }
 0xade   :  { %v3184_v6 = vadd.f32 %v3183_v39, %v3169_v61  ;;  %v3178_v61 = vmul.f32 %v3162_v58, %v3162_v58  ;;  %v3179_v39 = vmul.f32 %v9927_v23, %v9927_v23  ;;  %v3180_v59 = vmul.f32 %v9931_v25, %v9931_v25 }
 0xae0   :  { %v3185_v48 = vadd.f32 %v3184_v6, %v3170_v12 }
 0xae2   :  { %v3186_v57 = vadd.f32 %v3185_v48, %v3171_v40 }
 0xae4   :  { %v3187_v10 = vadd.f32 %v3186_v57, %v3172_v26  ;;  %v3177_v26 = vmul.f32 %v9921_v0, %v9921_v0 }
 0xae6   :  { %v3188_v49 = vadd.f32 %v3187_v10, %v3173_v17 }
 0xae8   :  { %v3189_v1 = vadd.f32 %v3188_v49, %v3174_v32 }
 0xaea   :  { %v3190_v41 = vadd.f32 %v3189_v1, %v3175_v33  ;;  %v3244_v33 = vrot.slane %v9849_v54, %v9377_v56  ;;  %v9941_v1 = vrot.slane %v9849_v54, %v9380_v24 }
 0xaec   :  { %v3191_v13 = vadd.f32 %v3190_v41, %v3176_v29  ;;  %v9943_v41 = vmul.f32 0.0, %v3244_v33 }
 0xaee   :  { %v3192_v14 = vadd.f32 %v3191_v13, %v3177_v26 }
 0xaf0   :  { %v3193_v12 = vadd.f32 %v3192_v14, %v3178_v61 }
 0xaf2   :  { %v3194_v6 = vadd.f32 %v3193_v12, %v3179_v39 }
 0xaf4   :  { %v3195_v40 = vadd.f32 %v3194_v6, %v3180_v59 }
 0xaf6   :  { %v3196_v48 = vrot.slane %v3195_v40, 4 }
 0xaf8   :  { %v3197_v60 = vadd.f32 %v3196_v48, %v3195_v40 }
 0xafa   :  { %v3198_v57 = vrot.slane %v3197_v60, 2 }
 0xafc   :  { %v3199_v17 = vadd.f32 %v3198_v57, %v3197_v60 }
 0xafe   :  { %v3200_v10 = vrot.slane %v3199_v17, 1 }
 0xb00   :  { %v3201_v32 = vadd.f32 %v3200_v10, %v3199_v17 }
 0xb02   :  { %v3202_v49 = vmul.f32 0.0625, %v3201_v32 }
 0xb04   :  { %v3203_v34 = vadd.f32 1e-05, %v3202_v49 }
 0xb06   :  { %8829 = vrsqrt.f32 %v3203_v34 }
 0xb10   :  { %v8830_v29 = vpop.eup %8829 }
 0xb11   :  { %v3218_v26 = vmul.f32 %v8830_v29, %v3162_v58  ;;  %v3205_v13 = vmul.f32 %v8830_v29, %v9890_v51  ;;  %v3206_v61 = vmul.f32 %v8830_v29, %v9892_v2  ;;  %v3207_v14 = vmul.f32 %v8830_v29, %v3151_v28 }
 0xb12   :  { %v3208_v39 = vmul.f32 %v8830_v29, %v3152_v30  ;;  %v3209_v12 = vmul.f32 %v8830_v29, %v3153_v22  ;;  %v3210_v59 = vmul.f32 %v8830_v29, %v3154_v63  ;;  %v3211_v6 = vmul.f32 %v8830_v29, %v3155_v50 }
 0xb13   :  { %v3238_v40 = vmul.f32 %v9941_v1, %v3218_v26  ;;  %v3225_v48 = vmul.f32 %v9941_v1, %v3205_v13  ;;  %v3226_v54 = vmul.f32 %v9941_v1, %v3206_v61  ;;  %v3227_v60 = vmul.f32 %v9941_v1, %v3207_v14 }
 0xb14   :  { %v3228_v57 = vmul.f32 %v9941_v1, %v3208_v39  ;;  %v3229_v58 = vmul.f32 %v9941_v1, %v3209_v12  ;;  %v3230_v51 = vmul.f32 %v9941_v1, %v3210_v59  ;;  %v3212_v2 = vmul.f32 %v8830_v29, %v3156_v9 }
 0xb15   :  { %v3261_v28 = vadd.f32 %v3244_v33, %v3225_v48  ;;  %v3262_v30 = vadd.f32 %v3244_v33, %v3226_v54  ;;  %v3263_v22 = vadd.f32 %v9943_v41, %v3227_v60  ;;  %v3231_v63 = vmul.f32 %v9941_v1, %v3211_v6 }
 0xb16   :  { %v3264_v50 = vadd.f32 %v9943_v41, %v3228_v57  ;;  %v3265_v17 = vadd.f32 %v9943_v41, %v3229_v58  ;;  %v3266_v10 = vadd.f32 %v9943_v41, %v3230_v51  ;;  %v3232_v32 = vmul.f32 %v9941_v1, %v3212_v2 }
 0xb17   :  { %v3277_v49 = vmax.f32 %v3261_v28, 0.0  ;;  %v3278_v34 = vmax.f32 %v3262_v30, 0.0  ;;  %v3279_v26 = vmax.f32 %v3263_v22, 0.0  ;;  %v3267_v13 = vadd.f32 %v9943_v41, %v3231_v63 }
 0xb18   :  { %v3280_v9 = vmax.f32 %v3264_v50, 0.0  ;;  %v3281_v61 = vmax.f32 %v3265_v17, 0.0  ;;  %v3282_v33 = vmax.f32 %v3266_v10, 0.0  ;;  %v3268_v14 = vadd.f32 %v9943_v41, %v3232_v32 }
 0xb19   :  { %v8431_v39 = vpack.c.bf16 %v3278_v34, %v3277_v49  ;;  %v3283_v12 = vmax.f32 %v3267_v13, 0.0  ;;  %v3213_v59 = vmul.f32 %v8830_v29, %v9909_v55  ;;  %v3214_v6 = vmul.f32 %v8830_v29, %v9911_v38 }
 0xb1a   :  { %v8435_v48 = vpack.c.bf16 %v3280_v9, %v3279_v26  ;;  %v8439_v54 = vpack.c.bf16 %v3282_v33, %v3281_v61  ;;  %v3284_v60 = vmax.f32 %v3268_v14, 0.0  ;;  %v3215_v57 = vmul.f32 %v8830_v29, %v9913_v21 }
 0xb1b   :  { %8432 = vmatprep.subr.bf16.mxu0 %v8431_v39  ;;  %v3233_v58 = vmul.f32 %v9941_v1, %v3213_v59  ;;  %v3234_v51 = vmul.f32 %v9941_v1, %v3214_v6  ;;  %v3216_v2 = vmul.f32 %v8830_v29, %v9917_v19  ;;  %v3217_v28 = vmul.f32 %v8830_v29, %v9921_v0 }
 0xb1c   :  { %8434 = vmatpush3.bf16.msra.mxu0 %v8431_v39  ;;  %v8443_v30 = vpack.c.bf16 %v3284_v60, %v3283_v12  ;;  %v3235_v55 = vmul.f32 %v9941_v1, %v3215_v57  ;;  %v3274_v38 = vadd.f32 %v9943_v41, %v3238_v40  ;;  %v3219_v22 = vmul.f32 %v8830_v29, %v9927_v23 }
 0xb1d   :  { %8436 = vmatprep.subr.bf16.mxu0 %v8435_v48  ;;  %v3269_v21 = vadd.f32 %v9943_v41, %v3233_v58  ;;  %v3270_v63 = vadd.f32 %v9943_v41, %v3234_v51  ;;  %v3236_v50 = vmul.f32 %v9941_v1, %v3216_v2  ;;  %v3237_v17 = vmul.f32 %v9941_v1, %v3217_v28 }
 0xb1e   :  { %v3271_v19 = vadd.f32 %v9943_v41, %v3235_v55  ;;  %v3290_v0 = vmax.f32 %v3274_v38, 0.0  ;;  %v3220_v10 = vmul.f32 %v8830_v29, %v9931_v25  ;;  %v3239_v32 = vmul.f32 %v9941_v1, %v3219_v22 }
 0xb1f   :  { %v3285_v49 = vmax.f32 %v3269_v21, 0.0  ;;  %v3286_v40 = vmax.f32 %v3270_v63, 0.0  ;;  %v3272_v23 = vadd.f32 %v9943_v41, %v3236_v50  ;;  %v3273_v34 = vadd.f32 %v9943_v41, %v3237_v17 }
 0xb20   :  { %8438 = vmatpush3.bf16.msra.mxu0 %v8435_v48  ;;  %v3287_v26 = vmax.f32 %v3271_v19, 0.0  ;;  %v3240_v13 = vmul.f32 %v9941_v1, %v3220_v10  ;;  %v3275_v9 = vadd.f32 %v9943_v41, %v3239_v32  ;;  %v3315_v48 = vpop.permute.xlu1 %3314 }
 0xb21   :  { %8440 = vmatprep.subr.bf16.mxu0 %v8439_v54  ;;  %v8447_v61 = vpack.c.bf16 %v3286_v40, %v3285_v49  ;;  %v3288_v33 = vmax.f32 %v3272_v23, 0.0  ;;  %v3289_v14 = vmax.f32 %v3273_v34, 0.0  ;;  %vm3359_vm2 = vcmp.eq.s32.totalorder %v9319_v43, %v3315_v48  ;;  %v8745_v23 = vld [vmem:[#allocation2 + $0x340] sm:$0xff]   ;;  %v8746_v34 = vld [vmem:[#allocation2 + $0x348] sm:$0xff]  }
 0xb22   :  { %v3276_v25 = vadd.f32 %v9943_v41, %v3240_v13  ;;  %v3291_v29 = vmax.f32 %v3275_v9, 0.0  ;;  %v8748_v13 = vld [vmem:[#allocation2 + $0x358] sm:$0xff]   ;;  %v8749_v9 = vld [vmem:[#allocation2 + $0x360] sm:$0xff]  }
 0xb23   :  { %v8451_v39 = vpack.c.bf16 %v3288_v33, %v3287_v26  ;;  %v8455_v12 = vpack.c.bf16 %v3290_v0, %v3289_v14  ;;  %v8747_v26 = vld [vmem:[#allocation2 + $0x350] sm:$0xff]   ;;  %v10616_v33 = vld [vmem:[#allocation33_spill] sm:$0xff]  ;;  %v8765_v14 = vld [vmem:[#allocation2 + $0x3a0] sm:$0xff]  }
 0xb24   :  { %8442 = vmatpush3.bf16.msra.mxu0 %v8439_v54  ;;  %v3292_v59 = vmax.f32 %v3276_v25, 0.0  ;;  %v3321_v1 = vpop.permute.xlu1 %3320  ;;  %v8766_v25 = vld [vmem:[#allocation2 + $0x3a8] sm:$0xff]  }
 0xb25   :  { %8444 = vmatprep.subr.bf16.mxu0 %v8443_v30  ;;  %vm3361_vm4 = vcmp.eq.s32.totalorder %v9319_v43, %v3321_v1 }
 0xb26   :  { %v8459_v6 = vpack.c.bf16 %v3292_v59, %v3291_v29  ;;  %v8767_v29 = vld [vmem:[#allocation2 + $0x3b0] sm:$0xff]   ;;  %v10077_v59 = vpop.f32.mrb[64].mxu1 }
 0xb28   :  { %8446 = vmatpush3.bf16.msra.mxu0 %v8443_v30  ;;  %v3327_v60 = vpop.permute.xlu1 %3326 }
 0xb29   :  { %8448 = vmatprep.subr.bf16.mxu0 %v8447_v61  ;;  %vm3363_vm6 = vcmp.eq.s32.totalorder %v9319_v43, %v3327_v60 }
 0xb2c   :  { %8450 = vmatpush3.bf16.msra.mxu0 %v8447_v61  ;;  %v3333_v41 = vpop.permute.xlu1 %3332  ;;  %v8750_v61 = vld [vmem:[#allocation2 + $0x368] sm:$0xff]  }
 0xb2d   :  { %8452 = vmatprep.subr.bf16.mxu0 %v8451_v39  ;;  %vm3365_vm8 = vcmp.eq.s32.totalorder %v9319_v43, %v3333_v41 }
 0xb30   :  { %8454 = vmatpush3.bf16.msra.mxu0 %v8451_v39  ;;  %v3339_v7 = vpop.permute.xlu1 %3338  ;;  %v8768_v39 = vld [vmem:[#allocation2 + $0x3b8] sm:$0xff]  }
 0xb31   :  { %8456 = vmatprep.subr.bf16.mxu0 %v8455_v12  ;;  %vm3367_vm10 = vcmp.eq.s32.totalorder %v9319_v43, %v3339_v7 }
 0xb34   :  { %8458 = vmatpush3.bf16.msra.mxu0 %v8455_v12  ;;  %v3345_v8 = vpop.permute.xlu1 %3344  ;;  %v8769_v12 = vld [vmem:[#allocation2 + $0x3c0] sm:$0xff]  }
 0xb35   :  { %8460 = vmatprep.subr.bf16.mxu0 %v8459_v6  ;;  %vm3369_vm12 = vcmp.eq.s32.totalorder %v9319_v43, %v3345_v8 }
 0xb38   :  { %8462 = vmatpush3.bf16.msra.mxu0 %v8459_v6  ;;  %v3351_v20 = vpop.permute.xlu1 %3350  ;;  %v10079_v6 = vpop.f32.mrb[65].mxu1 }
 0xb39   :  { %vm3371_vm14 = vcmp.eq.s32.totalorder %v9319_v43, %v3351_v20  ;;  %v10081_v48 = vpop.f32.mrb[66].mxu1 }
 0xb3a   :  { %v3770_v1 = vpack.c.bf16 %v10081_v48, %v10077_v59  ;;  %v10085_v60 = vpop.f32.mrb[67].mxu1 }
 0xb3b   :  { %7840 = vmatmul.mubr.msk.f32.vlgmr.msra.gmra.mrb[96].mxu0 %vm3359_vm2, %v10615_v47  ;;  %v3769_v41 = vpack.c.bf16 %v10085_v60, %v10079_v6  ;;  %v10089_v7 = vpop.f32.mrb[68].mxu1 }
 0xb3c   :  { %7842 = vmatprep.mubr.msk.f32.mxu0 %vm3360_vm3, %v10615_v47  ;;  %v3357_v36 = vpop.permute.xlu1 %3356  ;;  %v10091_v8 = vpop.f32.mrb[69].mxu1 }
 0xb3d   :  { %vm3373_vm0 = vcmp.eq.s32.totalorder %v9319_v43, %v3357_v36  ;;  %v10093_v20 = vpop.f32.mrb[70].mxu1 }
 0xb3e   :  { %v3772_v36 = vpack.c.bf16 %v10093_v20, %v10089_v7 }
 0xb3f   :  { %7843 = vmatmul.mubr.msk.f32.gmra.mrb[98].mxu0 %vm3361_vm4, %v10615_v47 }
 0xb40   :  { %7845 = vmatprep.mubr.msk.f32.mxu0 %vm3362_vm5, %v10615_v47 }
 0xb43   :  { %7846 = vmatmul.mubr.msk.f32.gmra.mrb[100].mxu0 %vm3363_vm6, %v10615_v47 }
 0xb44   :  { %7848 = vmatprep.mubr.msk.f32.mxu0 %vm3364_vm7, %v10615_v47 }
 0xb47   :  { %7849 = vmatmul.mubr.msk.f32.gmra.mrb[102].mxu0 %vm3365_vm8, %v10615_v47 }
 0xb48   :  { %7851 = vmatprep.mubr.msk.f32.mxu0 %vm3366_vm9, %v10615_v47 }
 0xb4b   :  { %7852 = vmatmul.mubr.msk.f32.gmra.mrb[104].mxu0 %vm3367_vm10, %v10615_v47 }
 0xb4c   :  { %7854 = vmatprep.mubr.msk.f32.mxu0 %vm3368_vm11, %v10615_v47 }
 0xb4f   :  { %7855 = vmatmul.mubr.msk.f32.gmra.mrb[106].mxu0 %vm3369_vm12, %v10615_v47 }
 0xb50   :  { %7857 = vmatprep.mubr.msk.f32.mxu0 %vm3370_vm13, %v10615_v47 }
 0xb53   :  { %7858 = vmatmul.mubr.msk.f32.gmra.mrb[108].mxu0 %vm3371_vm14, %v10615_v47 }
 0xb54   :  { %7860 = vmatprep.mubr.msk.f32.mxu0 %vm3372_vm15, %v10615_v47 }
 0xb57   :  { %7861 = vmatmul.mubr.msk.f32.gmra.mrb[110].mxu0 %vm3373_vm0, %v10615_v47 }
 0xb58   :  { %7879 = vmatprep.mubr.bf16.mxu0 %v9789_v4 }
 0xc0e   :  { %v7841_v35 = vpop.f32.mrb[96].mxu0 }
 0xc0f   :  { %v3472_v42 = vpop.f32.mrb[97].mxu0 }
 0xc10   :  { %v10022_v54 = vpack.c.bf16 %v7841_v35, %v3472_v42  ;;  %v10097_v35 = vpop.f32.mrb[71].mxu1 }
 0xc11   :  { %v3771_v42 = vpack.c.bf16 %v10097_v35, %v10091_v8 }
 0xc12   :  { %v7844_v57 = vpop.f32.mrb[98].mxu0  ;;  %7863 = vmatprep.subr.bf16.mxu0 %v10022_v54 }
 0xc13   :  { %v3482_v58 = vpop.f32.mrb[99].mxu0  ;;  %7864 = vmatpush3.bf16.msra.mxu0 %v10022_v54 }
 0xc14   :  { %v10026_v37 = vpack.c.bf16 %v7844_v57, %v3482_v58 }
 0xc16   :  { %v7847_v51 = vpop.f32.mrb[100].mxu0  ;;  %7865 = vmatprep.subr.bf16.mxu0 %v10026_v37 }
 0xc17   :  { %v3492_v2 = vpop.f32.mrb[101].mxu0  ;;  %7866 = vmatpush3.bf16.msra.mxu0 %v10026_v37 }
 0xc18   :  { %v10030_v28 = vpack.c.bf16 %v7847_v51, %v3492_v2 }
 0xc1a   :  { %v7850_v4 = vpop.f32.mrb[102].mxu0  ;;  %7867 = vmatprep.subr.bf16.mxu0 %v10030_v28 }
 0xc1b   :  { %v3502_v30 = vpop.f32.mrb[103].mxu0  ;;  %7868 = vmatpush3.bf16.msra.mxu0 %v10030_v28 }
 0xc1c   :  { %v10034_v55 = vpack.c.bf16 %v7850_v4, %v3502_v30 }
 0xc1e   :  { %v7853_v38 = vpop.f32.mrb[104].mxu0  ;;  %7869 = vmatprep.subr.bf16.mxu0 %v10034_v55 }
 0xc1f   :  { %v3512_v22 = vpop.f32.mrb[105].mxu0  ;;  %7870 = vmatpush3.bf16.msra.mxu0 %v10034_v55 }
 0xc20   :  { %v10038_v21 = vpack.c.bf16 %v7853_v38, %v3512_v22 }
 0xc22   :  { %v7856_v63 = vpop.f32.mrb[106].mxu0  ;;  %7871 = vmatprep.subr.bf16.mxu0 %v10038_v21 }
 0xc23   :  { %v3522_v50 = vpop.f32.mrb[107].mxu0  ;;  %7872 = vmatpush3.bf16.msra.mxu0 %v10038_v21 }
 0xc24   :  { %v10042_v17 = vpack.c.bf16 %v7856_v63, %v3522_v50 }
 0xc26   :  { %v7859_v19 = vpop.f32.mrb[108].mxu0  ;;  %7873 = vmatprep.subr.bf16.mxu0 %v10042_v17 }
 0xc27   :  { %v3532_v0 = vpop.f32.mrb[109].mxu0  ;;  %7874 = vmatpush3.bf16.msra.mxu0 %v10042_v17 }
 0xc28   :  { %v10046_v10 = vpack.c.bf16 %v7859_v19, %v3532_v0 }
 0xc2a   :  { %v7862_v32 = vpop.f32.mrb[110].mxu0  ;;  %7875 = vmatprep.subr.bf16.mxu0 %v10046_v10 }
 0xc2b   :  { %v3542_v49 = vpop.f32.mrb[111].mxu0  ;;  %7876 = vmatpush3.bf16.msra.mxu0 %v10046_v10 }
 0xc2c   :  { %v10050_v40 = vpack.c.bf16 %v7862_v32, %v3542_v49 }
 0xc2e   :  { %7877 = vmatprep.subr.bf16.mxu0 %v10050_v40 }
 0xc2f   :  { %7878 = vmatpush3.bf16.msra.mxu0 %v10050_v40 }
 0xc30   :  { %7927 = vmatprep.subr.bf16.mxu0 %v8745_v23 }
 0xc32   :  { %7880 = vmatmul.mubr.bf16.vlgmr.msra.gmra.mrb[112].mxu0 %v9799_v31  ;;  %v8751_v31 = vld [vmem:[#allocation2 + $0x370] sm:$0xff]  }
 0xc33   :  { %7928 = vmatpush3.bf16.msra.mxu0 %v8745_v23  ;;  %7883 = vmatprep.mubr.bf16.mxu0 %v9805_v46  ;;  %v8752_v46 = vld [vmem:[#allocation2 + $0x378] sm:$0xff]  }
 0xc34   :  { %7929 = vmatprep.subr.bf16.mxu0 %v8746_v34 }
 0xc37   :  { %7930 = vmatpush3.bf16.msra.mxu0 %v8746_v34 }
 0xc38   :  { %7931 = vmatprep.subr.bf16.mxu0 %v8747_v26 }
 0xc3a   :  { %7884 = vmatmul.mubr.bf16.gmra.mrb[116].mxu0 %v9813_v15  ;;  %v8753_v15 = vld [vmem:[#allocation2 + $0x300] sm:$0xff]  }
 0xc3b   :  { %7932 = vmatpush3.bf16.msra.mxu0 %v8747_v26  ;;  %7887 = vmatprep.mubr.bf16.mxu0 %v9819_v16  ;;  %v8754_v16 = vld [vmem:[#allocation2 + $0x308] sm:$0xff]  }
 0xc3c   :  { %7933 = vmatprep.subr.bf16.mxu0 %v8748_v13 }
 0xc3f   :  { %7934 = vmatpush3.bf16.msra.mxu0 %v8748_v13 }
 0xc40   :  { %7935 = vmatprep.subr.bf16.mxu0 %v8749_v9 }
 0xc42   :  { %7888 = vmatmul.mubr.bf16.gmra.mrb[120].mxu0 %v9827_v52  ;;  %v8755_v52 = vld [vmem:[#allocation2 + $0x310] sm:$0xff]  }
 0xc43   :  { %7936 = vmatpush3.bf16.msra.mxu0 %v8749_v9  ;;  %7891 = vmatprep.mubr.bf16.mxu0 %v9835_v3  ;;  %v8756_v3 = vld [vmem:[#allocation2 + $0x318] sm:$0xff]  }
 0xc44   :  { %7937 = vmatprep.subr.bf16.mxu0 %v8750_v61  ;;  %v8772_v9 = vld [vmem:[#allocation2 + $0x3d8] sm:$0xff]  }
 0xc47   :  { %7938 = vmatpush3.bf16.msra.mxu0 %v8750_v61 }
 0xc48   :  { %7939 = vmatprep.subr.bf16.mxu0 %v8751_v31 }
 0xc4a   :  { %7892 = vmatmul.mubr.bf16.gmra.mrb[124].mxu0 %v9842_v11  ;;  %v8758_v11 = vld [vmem:[#allocation2 + $0x328] sm:$0xff]  }
 0xc4b   :  { %7940 = vmatpush3.bf16.msra.mxu0 %v8751_v31  ;;  %7943 = vmatprep.mubr.bf16.mxu0 %v9626_v45  ;;  %v8757_v45 = vld [vmem:[#allocation2 + $0x320] sm:$0xff]  }
 0xc4c   :  { %7941 = vmatprep.subr.bf16.mxu0 %v8752_v46 }
 0xc4f   :  { %7942 = vmatpush3.bf16.msra.mxu0 %v8752_v46  ;;  %v8773_v46 = vld [vmem:[#allocation2 + $0x3e0] sm:$0xff]  }
 0xc50   :  { %7959 = vmatprep.subr.bf16.mxu0 %v8753_v15 }
 0xc52   :  { %7944 = vmatmul.mubr.bf16.vlgmr.msra.gmra.mrb[128].mxu0 %v9631_v44  ;;  %v8759_v44 = vld [vmem:[#allocation2 + $0x330] sm:$0xff]  }
 0xc53   :  { %7947 = vmatprep.mubr.bf16.mxu0 %v9633_v27  ;;  %7960 = vmatpush3.bf16.msra.mxu0 %v8753_v15  ;;  %v8760_v27 = vld [vmem:[#allocation2 + $0x338] sm:$0xff]  }
 0xc54   :  { %7961 = vmatprep.subr.bf16.mxu0 %v8754_v16 }
 0xc57   :  { %7962 = vmatpush3.bf16.msra.mxu0 %v8754_v16 }
 0xc58   :  { %7963 = vmatprep.subr.bf16.mxu0 %v8755_v52 }
 0xc5a   :  { %7948 = vmatmul.mubr.bf16.gmra.mrb[132].mxu0 %v9643_v53  ;;  %v8761_v53 = vld [vmem:[#allocation2 + $0x380] sm:$0xff]  }
 0xc5b   :  { %7951 = vmatprep.mubr.bf16.mxu0 %v9651_v18  ;;  %7964 = vmatpush3.bf16.msra.mxu0 %v8755_v52  ;;  %v8762_v18 = vld [vmem:[#allocation2 + $0x388] sm:$0xff]  }
 0xc5c   :  { %7965 = vmatprep.subr.bf16.mxu0 %v8756_v3 }
 0xc5f   :  { %7966 = vmatpush3.bf16.msra.mxu0 %v8756_v3 }
 0xc60   :  { %7967 = vmatprep.subr.bf16.mxu0 %v8757_v45 }
 0xc62   :  { %7952 = vmatmul.mubr.bf16.gmra.mrb[136].mxu0 %v9653_v62  ;;  %v8763_v62 = vld [vmem:[#allocation2 + $0x390] sm:$0xff]  }
 0xc63   :  { %7955 = vmatprep.mubr.bf16.mxu0 %v9655_v5  ;;  %7968 = vmatpush3.bf16.msra.mxu0 %v8757_v45  ;;  %v8764_v5 = vld [vmem:[#allocation2 + $0x398] sm:$0xff]   ;;  %v8774_v45 = vld [vmem:[#allocation2 + $0x3e8] sm:$0xff]  }
 0xc64   :  { %7969 = vmatprep.subr.bf16.mxu0 %v8758_v11 }
 0xc67   :  { %7970 = vmatpush3.bf16.msra.mxu0 %v8758_v11 }
 0xc68   :  { %7971 = vmatprep.subr.bf16.mxu0 %v8759_v44 }
 0xc6a   :  { %7956 = vmatmul.mubr.bf16.gmra.mrb[140].mxu0 %v10616_v33 }
 0xc6b   :  { %7972 = vmatpush3.bf16.msra.mxu0 %v8759_v44  ;;  %7975 = vmatprep.mubr.bf16.mxu0 %v10022_v54  ;;  %v10101_v54 = vpop.f32.mrb[72].mxu1 }
 0xc6c   :  { %7973 = vmatprep.subr.bf16.mxu0 %v8760_v27  ;;  %v10103_v57 = vpop.f32.mrb[73].mxu1 }
 0xc6d   :  { %v10105_v58 = vpop.f32.mrb[74].mxu1 }
 0xc6e   :  { %v10109_v51 = vpop.f32.mrb[75].mxu1 }
 0xc6f   :  { %7974 = vmatpush3.bf16.msra.mxu0 %v8760_v27  ;;  %v3773_v2 = vpack.c.bf16 %v10109_v51, %v10103_v57  ;;  %v8775_v27 = vld [vmem:[#allocation2 + $0x3f0] sm:$0xff]  }
 0xc70   :  { %7991 = vmatprep.subr.bf16.mxu0 %v8761_v53 }
 0xc72   :  { %7976 = vmatmul.mubr.bf16.vlgmr.msra.gmra.mrb[128].mxu0 %v10026_v37  ;;  %v3774_v37 = vpack.c.bf16 %v10105_v58, %v10101_v54 }
 0xc73   :  { %7979 = vmatprep.mubr.bf16.mxu0 %v10030_v28  ;;  %7992 = vmatpush3.bf16.msra.mxu0 %v8761_v53  ;;  %v10113_v28 = vpop.f32.mrb[76].mxu1 }
 0xc74   :  { %7993 = vmatprep.subr.bf16.mxu0 %v8762_v18  ;;  %v10115_v4 = vpop.f32.mrb[77].mxu1 }
 0xc75   :  { %v10117_v30 = vpop.f32.mrb[78].mxu1 }
 0xc76   :  { %v3757_v38 = vpop.f32.mrb[79].mxu1 }
 0xc77   :  { %7994 = vmatpush3.bf16.msra.mxu0 %v8762_v18  ;;  %v3775_v22 = vpack.c.bf16 %v3757_v38, %v10115_v4 }
 0xc78   :  { %7995 = vmatprep.subr.bf16.mxu0 %v8763_v62 }
 0xc7a   :  { %7980 = vmatmul.mubr.bf16.gmra.mrb[132].mxu0 %v10034_v55  ;;  %v3776_v55 = vpack.c.bf16 %v10117_v30, %v10113_v28 }
 0xc7b   :  { %7983 = vmatprep.mubr.bf16.mxu0 %v10038_v21  ;;  %7996 = vmatpush3.bf16.msra.mxu0 %v8763_v62 }
 0xc7c   :  { %7997 = vmatprep.subr.bf16.mxu0 %v8764_v5 }
 0xc7f   :  { %7998 = vmatpush3.bf16.msra.mxu0 %v8764_v5  ;;  %v8776_v5 = vld [vmem:[#allocation2 + $0x3f8] sm:$0xff]  }
 0xc80   :  { %7999 = vmatprep.subr.bf16.mxu0 %v8765_v14 }
 0xc82   :  { %7984 = vmatmul.mubr.bf16.gmra.mrb[136].mxu0 %v10042_v17 }
 0xc83   :  { %7987 = vmatprep.mubr.bf16.mxu0 %v10046_v10  ;;  %8000 = vmatpush3.bf16.msra.mxu0 %v8765_v14  ;;  %v8770_v10 = vld [vmem:[#allocation2 + $0x3c8] sm:$0xff]   ;;  %v10146_v14 = vld [vmem:[%s10550_s5 + $0x30] sm:$0xff] }
 0xc84   :  { %8001 = vmatprep.subr.bf16.mxu0 %v8766_v25 }
 0xc87   :  { %8002 = vmatpush3.bf16.msra.mxu0 %v8766_v25 }
 0xc88   :  { %8003 = vmatprep.subr.bf16.mxu0 %v8767_v29 }
 0xc8a   :  { %7988 = vmatmul.mubr.bf16.gmra.mrb[140].mxu0 %v10050_v40  ;;  %v8771_v40 = vld [vmem:[#allocation2 + $0x3d0] sm:$0xff]  }
 0xc8b   :  { %8004 = vmatpush3.bf16.msra.mxu0 %v8767_v29  ;;  %v10617_v29 = vld [vmem:[#allocation8_spill] sm:$0xff] }
 0xc8c   :  { %8005 = vmatprep.subr.bf16.mxu0 %v8768_v39 }
 0xc8f   :  { %8006 = vmatpush3.bf16.msra.mxu0 %v8768_v39  ;;  %v4457_v39 = vrot.slane %v10146_v14, %v10617_v29 }
 0xc90   :  { %8023 = vmatprep.subr.bf16.mxu0 %v8769_v12 }
 0xd05   :  { %v7881_v21 = vpop.f32.mrb[112].mxu0 }
 0xd06   :  { %v3601_v63 = vpop.f32.mrb[113].mxu0 }
 0xd07   :  { %v7882_v50 = vpop.f32.mrb[114].mxu0 }
 0xd08   :  { %v3665_v17 = vpack.c.bf16 %v7882_v50, %v7881_v21  ;;  %v3604_v19 = vpop.f32.mrb[115].mxu0 }
 0xd09   :  { %v3664_v0 = vpack.c.bf16 %v3604_v19, %v3601_v63 }
 0xd0b   :  { %8007 = vmatprep.mubr.bf16.mxu0 %v3664_v0 }
 0xd0c   :  { %8008 = vmatmul.mubr.bf16.vlgmr.msra.gmra.mrb[128].mxu0 %v3665_v17 }
 0xd0d   :  { %v7885_v32 = vpop.f32.mrb[116].mxu0  ;;  %8024 = vmatpush3.bf16.msra.mxu0 %v8769_v12 }
 0xd0e   :  { %v3617_v49 = vpop.f32.mrb[117].mxu0  ;;  %8025 = vmatprep.subr.bf16.mxu0 %v8770_v10 }
 0xd0f   :  { %v7886_v23 = vpop.f32.mrb[118].mxu0 }
 0xd10   :  { %v3667_v34 = vpack.c.bf16 %v7886_v23, %v7885_v32  ;;  %v3620_v26 = vpop.f32.mrb[119].mxu0 }
 0xd11   :  { %v3666_v13 = vpack.c.bf16 %v3620_v26, %v3617_v49  ;;  %8026 = vmatpush3.bf16.msra.mxu0 %v8770_v10 }
 0xd12   :  { %8027 = vmatprep.subr.bf16.mxu0 %v8771_v40 }
 0xd13   :  { %8011 = vmatprep.mubr.bf16.mxu0 %v3666_v13 }
 0xd14   :  { %8012 = vmatmul.mubr.bf16.gmra.mrb[132].mxu0 %v3667_v34 }
 0xd15   :  { %v7889_v61 = vpop.f32.mrb[120].mxu0  ;;  %8028 = vmatpush3.bf16.msra.mxu0 %v8771_v40 }
 0xd16   :  { %v3633_v31 = vpop.f32.mrb[121].mxu0  ;;  %8029 = vmatprep.subr.bf16.mxu0 %v8772_v9 }
 0xd17   :  { %v7890_v15 = vpop.f32.mrb[122].mxu0 }
 0xd18   :  { %v3669_v16 = vpack.c.bf16 %v7890_v15, %v7889_v61  ;;  %v3636_v52 = vpop.f32.mrb[123].mxu0 }
 0xd19   :  { %v3668_v3 = vpack.c.bf16 %v3636_v52, %v3633_v31  ;;  %8030 = vmatpush3.bf16.msra.mxu0 %v8772_v9 }
 0xd1a   :  { %8031 = vmatprep.subr.bf16.mxu0 %v8773_v46 }
 0xd1b   :  { %8015 = vmatprep.mubr.bf16.mxu0 %v3668_v3 }
 0xd1c   :  { %8016 = vmatmul.mubr.bf16.gmra.mrb[136].mxu0 %v3669_v16 }
 0xd1d   :  { %v7893_v11 = vpop.f32.mrb[124].mxu0  ;;  %8032 = vmatpush3.bf16.msra.mxu0 %v8773_v46 }
 0xd1e   :  { %v3649_v44 = vpop.f32.mrb[125].mxu0  ;;  %8033 = vmatprep.subr.bf16.mxu0 %v8774_v45 }
 0xd1f   :  { %v7894_v33 = vpop.f32.mrb[126].mxu0 }
 0xd20   :  { %v3671_v53 = vpack.c.bf16 %v7894_v33, %v7893_v11  ;;  %v3652_v18 = vpop.f32.mrb[127].mxu0 }
 0xd21   :  { %v3670_v62 = vpack.c.bf16 %v3652_v18, %v3649_v44  ;;  %8034 = vmatpush3.bf16.msra.mxu0 %v8774_v45 }
 0xd22   :  { %8035 = vmatprep.subr.bf16.mxu0 %v8775_v27 }
 0xd23   :  { %8019 = vmatprep.mubr.bf16.mxu0 %v3670_v62 }
 0xd24   :  { %8020 = vmatmul.mubr.bf16.gmra.mrb[140].mxu0 %v3671_v53 }
 0xd25   :  { %8036 = vmatpush3.bf16.msra.mxu0 %v8775_v27  ;;  %8039 = vmatprep.mubr.bf16.mxu0 %v3769_v41 }
 0xd26   :  { %8037 = vmatprep.subr.bf16.mxu0 %v8776_v5 }
 0xd29   :  { %8038 = vmatpush3.bf16.msra.mxu0 %v8776_v5 }
 0xd2c   :  { %8040 = vmatmul.mubr.bf16.vlgmr.msra.gmra.mrb[128].mxu0 %v3770_v1 }
 0xd2d   :  { %8043 = vmatprep.mubr.bf16.mxu0 %v3771_v42 }
 0xd34   :  { %8044 = vmatmul.mubr.bf16.gmra.mrb[132].mxu0 %v3772_v36 }
 0xd35   :  { %8047 = vmatprep.mubr.bf16.mxu0 %v3773_v2 }
 0xd3c   :  { %8048 = vmatmul.mubr.bf16.gmra.mrb[136].mxu0 %v3774_v37 }
 0xd3d   :  { %8051 = vmatprep.mubr.bf16.mxu0 %v3775_v22 }
 0xd44   :  { %8052 = vmatmul.mubr.bf16.gmra.mrb[140].mxu0 %v3776_v55 }
 0xdff   :  { %v8041_v25 = vpop.f32.mrb[128].mxu0 }
 0xe00   :  { %v4374_v12 = vpop.f32.mrb[129].mxu0  ;;  %v4460_v60 = vadd.f32 %v8041_v25, %v4457_v39 }
 0xe01   :  { %v8042_v59 = vpop.f32.mrb[130].mxu0  ;;  %v4458_v48 = vadd.f32 %v4457_v39, %v4374_v12 }
 0xe02   :  { %v4377_v6 = vpop.f32.mrb[131].mxu0  ;;  %v4461_v7 = vadd.f32 %v8042_v59, %v4457_v39 }
 0xe03   :  { %v4459_v1 = vadd.f32 %v4457_v39, %v4377_v6 }
 0xe05   :  { %v4490_v41 = vadd.f32 %v4459_v1, %v4458_v48 }
 0xe07   :  { %v4491_v8 = vadd.f32 %v4490_v41, %v4460_v60  ;;  %v8045_v20 = vpop.f32.mrb[132].mxu0 }
 0xe08   :  { %v4390_v36 = vpop.f32.mrb[133].mxu0  ;;  %v4464_v58 = vadd.f32 %v8045_v20, %v4457_v39 }
 0xe09   :  { %v4462_v35 = vadd.f32 %v4457_v39, %v4390_v36  ;;  %v4492_v42 = vadd.f32 %v4491_v8, %v4461_v7  ;;  %v8046_v54 = vpop.f32.mrb[134].mxu0 }
 0xe0a   :  { %v4393_v57 = vpop.f32.mrb[135].mxu0  ;;  %v4465_v28 = vadd.f32 %v8046_v54, %v4457_v39  ;;  %v10155_v30 = vmul.f32 0.0, %v4464_v58 }
 0xe0b   :  { %v10150_v37 = vmul.f32 0.0, %v4462_v35  ;;  %v4463_v51 = vadd.f32 %v4457_v39, %v4393_v57 }
 0xe0c   :  { %v10158_v21 = vmul.f32 0.0, %v4465_v28 }
 0xe0d   :  { %v4493_v2 = vadd.f32 %v4492_v42, %v10150_v37  ;;  %v10153_v4 = vmul.f32 0.0, %v4463_v51 }
 0xe0f   :  { %v4494_v55 = vadd.f32 %v4493_v2, %v10153_v4  ;;  %v8049_v38 = vpop.f32.mrb[136].mxu0 }
 0xe10   :  { %v4406_v22 = vpop.f32.mrb[137].mxu0  ;;  %v4468_v0 = vadd.f32 %v8049_v38, %v4457_v39 }
 0xe11   :  { %v4495_v63 = vadd.f32 %v4494_v55, %v10155_v30  ;;  %v4466_v50 = vadd.f32 %v4457_v39, %v4406_v22  ;;  %v8050_v17 = vpop.f32.mrb[138].mxu0 }
 0xe12   :  { %v4409_v19 = vpop.f32.mrb[139].mxu0  ;;  %v4469_v23 = vadd.f32 %v8050_v17, %v4457_v39  ;;  %v10165_v26 = vmul.f32 0.0, %v4468_v0 }
 0xe13   :  { %v10161_v10 = vmul.f32 0.0, %v4466_v50  ;;  %v4496_v32 = vadd.f32 %v4495_v63, %v10158_v21  ;;  %v4467_v49 = vadd.f32 %v4457_v39, %v4409_v19 }
 0xe14   :  { %v10167_v31 = vmul.f32 0.0, %v4469_v23 }
 0xe15   :  { %v4497_v40 = vadd.f32 %v4496_v32, %v10161_v10  ;;  %v4483_v34 = vmul.f32 0.0, %v4467_v49 }
 0xe17   :  { %v4498_v13 = vadd.f32 %v4497_v40, %v4483_v34  ;;  %v8053_v9 = vpop.f32.mrb[140].mxu0 }
 0xe18   :  { %v4422_v61 = vpop.f32.mrb[141].mxu0  ;;  %v4472_v3 = vadd.f32 %v8053_v9, %v4457_v39 }
 0xe19   :  { %v4499_v46 = vadd.f32 %v4498_v13, %v10165_v26  ;;  %v4470_v15 = vadd.f32 %v4457_v39, %v4422_v61  ;;  %v8054_v16 = vpop.f32.mrb[142].mxu0 }
 0xe1a   :  { %v4425_v52 = vpop.f32.mrb[143].mxu0  ;;  %v4473_v33 = vadd.f32 %v8054_v16, %v4457_v39  ;;  %v4488_v18 = vmul.f32 0.0, %v4472_v3 }
 0xe1b   :  { %v4486_v45 = vmul.f32 0.0, %v4470_v15  ;;  %v4500_v11 = vadd.f32 %v4499_v46, %v10167_v31  ;;  %v4471_v44 = vadd.f32 %v4457_v39, %v4425_v52 }
 0xe1c   :  { %v4489_v5 = vmul.f32 0.0, %v4473_v33 }
 0xe1d   :  { %v4501_v27 = vadd.f32 %v4500_v11, %v4486_v45  ;;  %v4487_v53 = vmul.f32 0.0, %v4471_v44 }
 0xe1f   :  { %v4502_v62 = vadd.f32 %v4501_v27, %v4487_v53 }
 0xe21   :  { %v4503_v25 = vadd.f32 %v4502_v62, %v4488_v18 }
 0xe23   :  { %v4504_v12 = vadd.f32 %v4503_v25, %v4489_v5 }
 0xe25   :  { %v4505_v59 = vrot.slane %v4504_v12, 4 }
 0xe27   :  { %v4506_v6 = vadd.f32 %v4505_v59, %v4504_v12 }
 0xe29   :  { %v4507_v41 = vrot.slane %v4506_v6, 2 }
 0xe2b   :  { %v4508_v8 = vadd.f32 %v4507_v41, %v4506_v6 }
 0xe2d   :  { %v4509_v20 = vrot.slane %v4508_v8, 1 }
 0xe2f   :  { %v4510_v36 = vadd.f32 %v4509_v20, %v4508_v8 }
 0xe31   :  { %v4511_v35 = vmul.f32 0.03125, %v4510_v36 }
 0xe33   :  { %v10171_v42 = vsub.f32 %v4458_v48, %v4511_v35  ;;  %v10173_v54 = vsub.f32 %v4459_v1, %v4511_v35  ;;  %v10175_v57 = vsub.f32 %v4460_v60, %v4511_v35  ;;  %v10177_v39 = vsub.f32 %v4461_v7, %v4511_v35 }
 0xe34   :  { %v4516_v58 = vsub.f32 %v10150_v37, %v4511_v35  ;;  %v4517_v51 = vsub.f32 %v10153_v4, %v4511_v35  ;;  %v4518_v2 = vsub.f32 %v10155_v30, %v4511_v35  ;;  %v4519_v28 = vsub.f32 %v10158_v21, %v4511_v35 }
 0xe35   :  { %v4520_v55 = vsub.f32 %v10161_v10, %v4511_v35  ;;  %v4521_v38 = vsub.f32 %v4483_v34, %v4511_v35  ;;  %v4522_v48 = vsub.f32 %v10165_v26, %v4511_v35  ;;  %v4523_v1 = vsub.f32 %v10167_v31, %v4511_v35 }
 0xe36   :  { %v4524_v22 = vsub.f32 %v4486_v45, %v4511_v35  ;;  %v4525_v60 = vsub.f32 %v4487_v53, %v4511_v35  ;;  %v4526_v63 = vsub.f32 %v4488_v18, %v4511_v35  ;;  %v4527_v7 = vsub.f32 %v4489_v5, %v4511_v35 }
 0xe37   :  { %v4544_v37 = vmul.f32 %v10171_v42, %v10171_v42  ;;  %v4545_v4 = vmul.f32 %v10173_v54, %v10173_v54  ;;  %v4532_v30 = vmul.f32 0.0, %v4516_v58  ;;  %v4546_v21 = vmul.f32 %v10175_v57, %v10175_v57 }
 0xe38   :  { %v4533_v17 = vmul.f32 0.0, %v4517_v51  ;;  %v4547_v19 = vmul.f32 %v10177_v39, %v10177_v39  ;;  %v4534_v10 = vmul.f32 0.0, %v4518_v2  ;;  %v4535_v40 = vmul.f32 0.0, %v4519_v28 }
 0xe39   :  { %v4560_v50 = vadd.f32 %v4545_v4, %v4544_v37  ;;  %v4548_v32 = vmul.f32 %v4532_v30, %v4532_v30  ;;  %v10194_v26 = vmul.f32 0.0, %v4520_v55  ;;  %v10196_v61 = vmul.f32 0.0, %v4521_v38 }
 0xe3a   :  { %v4549_v23 = vmul.f32 %v4533_v17, %v4533_v17  ;;  %v4550_v13 = vmul.f32 %v4534_v10, %v4534_v10  ;;  %v4551_v31 = vmul.f32 %v4535_v40, %v4535_v40  ;;  %v10198_v15 = vmul.f32 0.0, %v4522_v48 }
 0xe3b   :  { %v4561_v0 = vadd.f32 %v4560_v50, %v4546_v21  ;;  %v4552_v16 = vmul.f32 %v10194_v26, %v10194_v26  ;;  %v10202_v3 = vmul.f32 0.0, %v4523_v1  ;;  %v4553_v45 = vmul.f32 %v10196_v61, %v10196_v61 }
 0xe3c   :  { %v10206_v44 = vmul.f32 0.0, %v4524_v22  ;;  %v4554_v27 = vmul.f32 %v10198_v15, %v10198_v15  ;;  %v4541_v53 = vmul.f32 0.0, %v4525_v60  ;;  %v10212_v5 = vmul.f32 0.0, %v4526_v63 }
 0xe3d   :  { %v4562_v49 = vadd.f32 %v4561_v0, %v4547_v19  ;;  %v4555_v18 = vmul.f32 %v10202_v3, %v10202_v3  ;;  %v10216_v59 = vmul.f32 0.0, %v4527_v7  ;;  %v4623_v60 = vrot.slane %v10146_v14, %v9377_v56 }
 0xe3e   :  { %v4556_v25 = vmul.f32 %v10206_v44, %v10206_v44  ;;  %v4557_v6 = vmul.f32 %v4541_v53, %v4541_v53  ;;  %v4558_v8 = vmul.f32 %v10212_v5, %v10212_v5  ;;  %v10226_v63 = vrot.slane %v10146_v14, %v9380_v24 }
 0xe3f   :  { %v4563_v34 = vadd.f32 %v4562_v49, %v4548_v32  ;;  %v4559_v36 = vmul.f32 %v10216_v59, %v10216_v59  ;;  %v10228_v37 = vmul.f32 0.0, %v4623_v60 }
 0xe41   :  { %v4564_v9 = vadd.f32 %v4563_v34, %v4549_v23 }
 0xe43   :  { %v4565_v46 = vadd.f32 %v4564_v9, %v4550_v13 }
 0xe45   :  { %v4566_v52 = vadd.f32 %v4565_v46, %v4551_v31 }
 0xe47   :  { %v4567_v11 = vadd.f32 %v4566_v52, %v4552_v16 }
 0xe49   :  { %v4568_v33 = vadd.f32 %v4567_v11, %v4553_v45 }
 0xe4b   :  { %v4569_v62 = vadd.f32 %v4568_v33, %v4554_v27 }
 0xe4d   :  { %v4570_v12 = vadd.f32 %v4569_v62, %v4555_v18 }
 0xe4f   :  { %v4571_v41 = vadd.f32 %v4570_v12, %v4556_v25 }
 0xe51   :  { %v4572_v20 = vadd.f32 %v4571_v41, %v4557_v6 }
 0xe53   :  { %v4573_v35 = vadd.f32 %v4572_v20, %v4558_v8 }
 0xe55   :  { %v4574_v58 = vadd.f32 %v4573_v35, %v4559_v36 }
 0xe57   :  { %v4575_v51 = vrot.slane %v4574_v58, 4 }
 0xe59   :  { %v4576_v2 = vadd.f32 %v4575_v51, %v4574_v58 }
 0xe5b   :  { %v4577_v28 = vrot.slane %v4576_v2, 2 }
 0xe5d   :  { %v4578_v55 = vadd.f32 %v4577_v28, %v4576_v2 }
 0xe5f   :  { %v4579_v38 = vrot.slane %v4578_v55, 1 }
 0xe61   :  { %v4580_v48 = vadd.f32 %v4579_v38, %v4578_v55 }
 0xe63   :  { %v4581_v1 = vmul.f32 0.03125, %v4580_v48 }
 0xe65   :  { %v4582_v22 = vadd.f32 1e-05, %v4581_v1 }
 0xe67   :  { %8831 = vrsqrt.f32 %v4582_v22 }
 0xe71   :  { %v8832_v7 = vpop.eup %8831 }
 0xe72   :  { %v4597_v4 = vmul.f32 %v8832_v7, %v4541_v53  ;;  %v4584_v21 = vmul.f32 %v8832_v7, %v10171_v42  ;;  %v4585_v50 = vmul.f32 %v8832_v7, %v10173_v54  ;;  %v4586_v19 = vmul.f32 %v8832_v7, %v10175_v57 }
 0xe73   :  { %v4587_v0 = vmul.f32 %v8832_v7, %v10177_v39  ;;  %v4588_v32 = vmul.f32 %v8832_v7, %v4532_v30  ;;  %v4589_v49 = vmul.f32 %v8832_v7, %v4533_v17  ;;  %v4590_v23 = vmul.f32 %v8832_v7, %v4534_v10 }
 0xe74   :  { %v4617_v34 = vmul.f32 %v10226_v63, %v4597_v4  ;;  %v4604_v14 = vmul.f32 %v10226_v63, %v4584_v21  ;;  %v4605_v13 = vmul.f32 %v10226_v63, %v4585_v50  ;;  %v4606_v9 = vmul.f32 %v10226_v63, %v4586_v19 }
 0xe75   :  { %v4607_v31 = vmul.f32 %v10226_v63, %v4587_v0  ;;  %v4608_v42 = vmul.f32 %v10226_v63, %v4588_v32  ;;  %v4609_v54 = vmul.f32 %v10226_v63, %v4589_v49  ;;  %v4591_v57 = vmul.f32 %v8832_v7, %v4535_v40 }
 0xe76   :  { %v4640_v46 = vadd.f32 %v4623_v60, %v4604_v14  ;;  %v4641_v39 = vadd.f32 %v4623_v60, %v4605_v13  ;;  %v4642_v30 = vadd.f32 %v4623_v60, %v4606_v9  ;;  %v4610_v17 = vmul.f32 %v10226_v63, %v4590_v23 }
 0xe77   :  { %v4643_v10 = vadd.f32 %v4623_v60, %v4607_v31  ;;  %v4644_v16 = vadd.f32 %v10228_v37, %v4608_v42  ;;  %v4645_v52 = vadd.f32 %v10228_v37, %v4609_v54  ;;  %v4611_v45 = vmul.f32 %v10226_v63, %v4591_v57  ;;  %v4693_v57 = vpop.permute.xlu1 %4692 }
 0xe78   :  { %v4656_v11 = vmax.f32 %v4640_v46, 0.0  ;;  %v4657_v27 = vmax.f32 %v4641_v39, 0.0  ;;  %v4658_v33 = vmax.f32 %v4642_v30, 0.0  ;;  %v4646_v53 = vadd.f32 %v10228_v37, %v4610_v17  ;;  %v4696_v46 = vpop.permute.xlu0 %4695 }
 0xe79   :  { %v4659_v18 = vmax.f32 %v4643_v10, 0.0  ;;  %v4660_v62 = vmax.f32 %v4644_v16, 0.0  ;;  %v4661_v40 = vmax.f32 %v4645_v52, 0.0  ;;  %v4647_v25 = vadd.f32 %v10228_v37, %v4611_v45 }
 0xe7a   :  { %v8463_v12 = vpack.c.bf16 %v4657_v27, %v4656_v11  ;;  %v4662_v6 = vmax.f32 %v4646_v53, 0.0  ;;  %v4592_v41 = vmul.f32 %v8832_v7, %v10194_v26  ;;  %v4593_v8 = vmul.f32 %v8832_v7, %v10196_v61 }
 0xe7b   :  { %v8467_v20 = vpack.c.bf16 %v4659_v18, %v4658_v33  ;;  %v8471_v36 = vpack.c.bf16 %v4661_v40, %v4660_v62  ;;  %v4663_v35 = vmax.f32 %v4647_v25, 0.0  ;;  %v4594_v58 = vmul.f32 %v8832_v7, %v10198_v15  ;;  %v10302_v18 = vld [vmem:[%s10546_s1] sm:$0xff]  }
 0xe7c   :  { %8464 = vmatprep.subr.bf16.mxu1 %v8463_v12  ;;  %v4612_v51 = vmul.f32 %v10226_v63, %v4592_v41  ;;  %v4613_v2 = vmul.f32 %v10226_v63, %v4593_v8  ;;  %v4595_v28 = vmul.f32 %v8832_v7, %v10202_v3  ;;  %v4596_v55 = vmul.f32 %v8832_v7, %v10206_v44  ;;  %v4702_v39 = vpop.permute.xlu0 %4701 }
 0xe7d   :  { %8466 = vmatpush3.bf16.msra.mxu1 %v8463_v12  ;;  %v8475_v38 = vpack.c.bf16 %v4663_v35, %v4662_v6  ;;  %v4614_v26 = vmul.f32 %v10226_v63, %v4594_v58  ;;  %v4653_v61 = vadd.f32 %v10228_v37, %v4617_v34  ;;  %v4598_v48 = vmul.f32 %v8832_v7, %v10212_v5 }
 0xe7e   :  { %8468 = vmatprep.subr.bf16.mxu1 %v8467_v20  ;;  %v4648_v15 = vadd.f32 %v10228_v37, %v4612_v51  ;;  %v4649_v1 = vadd.f32 %v10228_v37, %v4613_v2  ;;  %v4615_v22 = vmul.f32 %v10226_v63, %v4595_v28  ;;  %v4616_v60 = vmul.f32 %v10226_v63, %v4596_v55 }
 0xe7f   :  { %v4650_v3 = vadd.f32 %v10228_v37, %v4614_v26  ;;  %v4669_v44 = vmax.f32 %v4653_v61, 0.0  ;;  %v4599_v4 = vmul.f32 %v8832_v7, %v10216_v59  ;;  %v4618_v21 = vmul.f32 %v10226_v63, %v4598_v48 }
 0xe80   :  { %v4664_v50 = vmax.f32 %v4648_v15, 0.0  ;;  %v4665_v19 = vmax.f32 %v4649_v1, 0.0  ;;  %v4651_v5 = vadd.f32 %v10228_v37, %v4615_v22  ;;  %v4652_v0 = vadd.f32 %v10228_v37, %v4616_v60  ;;  %v10618_v60 = vld [vmem:[#allocation25_spill] sm:$0xff] }
 0xe81   :  { %8470 = vmatpush3.bf16.msra.mxu1 %v8467_v20  ;;  %v4666_v32 = vmax.f32 %v4650_v3, 0.0  ;;  %v4619_v49 = vmul.f32 %v10226_v63, %v4599_v4  ;;  %v4654_v23 = vadd.f32 %v10228_v37, %v4618_v21  ;;  %v4699_v63 = vpop.permute.xlu1 %4698  ;;  %vm4737_vm1 = vcmp.eq.s32.totalorder %v9319_v43, %v4693_v57  ;;  %v8844_v3 = vld [vmem:[%s10546_s1 + $0x8] sm:$0xff]   ;;  %v10619_v4 = vld [vmem:[#allocation26_spill] sm:$0xff]  ;;  %v10620_v21 = vld [vmem:[#allocation27_spill] sm:$0xff] }
 0xe82   :  { %8472 = vmatprep.subr.bf16.mxu1 %v8471_v36  ;;  %v8479_v34 = vpack.c.bf16 %v4665_v19, %v4664_v50  ;;  %v4667_v14 = vmax.f32 %v4651_v5, 0.0  ;;  %v4668_v13 = vmax.f32 %v4652_v0, 0.0  ;;  %vm4738_vm2 = vcmp.eq.s32.totalorder %v9319_v43, %v4696_v46  ;;  %v8846_v50 = vld [vmem:[%s10546_s1 + $0x18] sm:$0xff]   ;;  %v8847_v19 = vld [vmem:[%s10546_s1 + $0x20] sm:$0xff]   ;;  %v10622_v0 = vld [vmem:[#allocation29_spill] sm:$0xff] }
 0xe83   :  { %v4655_v59 = vadd.f32 %v10228_v37, %v4619_v49  ;;  %v4670_v7 = vmax.f32 %v4654_v23, 0.0  ;;  %v4708_v37 = vpop.permute.xlu0 %4707  ;;  %vm4739_vm3 = vcmp.eq.s32.totalorder %v9319_v43, %v4699_v63  ;;  %vm4740_vm4 = vcmp.eq.s32.totalorder %v9319_v43, %v4702_v39  ;;  %v10621_v5 = vld [vmem:[#allocation28_spill] sm:$0xff]  ;;  %v8849_v49 = vld [vmem:[%s10546_s1 + $0x30] sm:$0xff]   ;;  %v8784_v46 = vld [vmem:[#allocation2 + $0x278] sm:$0xff]  }
 0xe84   :  { %v8483_v9 = vpack.c.bf16 %v4667_v14, %v4666_v32  ;;  %v8487_v31 = vpack.c.bf16 %v4669_v44, %v4668_v13  ;;  %vm4742_vm6 = vcmp.eq.s32.totalorder %v9319_v43, %v4708_v37  ;;  %v8845_v44 = vld [vmem:[%s10546_s1 + $0x10] sm:$0xff]   ;;  %v8848_v32 = vld [vmem:[%s10546_s1 + $0x28] sm:$0xff]   ;;  %v8850_v14 = vld [vmem:[%s10546_s1 + $0x38] sm:$0xff]  }
 0xe85   :  { %8474 = vmatpush3.bf16.msra.mxu1 %v8471_v36  ;;  %v4671_v42 = vmax.f32 %v4655_v59, 0.0  ;;  %v4705_v30 = vpop.permute.xlu1 %4704  ;;  %v10623_v23 = vld [vmem:[#allocation30_spill] sm:$0xff]  ;;  %v10625_v13 = vld [vmem:[#allocation32_spill] sm:$0xff]  ;;  %v8786_v39 = vld [vmem:[#allocation2 + $0x208] sm:$0xff]  }
 0xe86   :  { %8476 = vmatprep.subr.bf16.mxu1 %v8475_v38  ;;  %vm4741_vm5 = vcmp.eq.s32.totalorder %v9319_v43, %v4705_v30  ;;  %v8777_v59 = vld [vmem:[#allocation2 + $0x240] sm:$0xff]   ;;  %v8783_v57 = vld [vmem:[#allocation2 + $0x270] sm:$0xff]   ;;  %v8788_v37 = vld [vmem:[#allocation2 + $0x218] sm:$0xff]  }
 0xe87   :  { %v8491_v54 = vpack.c.bf16 %v4671_v42, %v4670_v7  ;;  %v4714_v10 = vpop.permute.xlu0 %4713  ;;  %v8778_v7 = vld [vmem:[#allocation2 + $0x248] sm:$0xff]   ;;  %v8781_v42 = vld [vmem:[#allocation2 + $0x260] sm:$0xff]   ;;  %v8787_v30 = vld [vmem:[#allocation2 + $0x210] sm:$0xff]  }
 0xe88   :  { %vm4744_vm8 = vcmp.eq.s32.totalorder %v9319_v43, %v4714_v10  ;;  %v8785_v63 = vld [vmem:[#allocation2 + $0x200] sm:$0xff]   ;;  %v8790_v10 = vld [vmem:[#allocation2 + $0x228] sm:$0xff]  }
 0xe89   :  { %8478 = vmatpush3.bf16.msra.mxu1 %v8475_v38  ;;  %v4711_v17 = vpop.permute.xlu1 %4710 }
 0xe8a   :  { %8480 = vmatprep.subr.bf16.mxu1 %v8479_v34  ;;  %vm4743_vm7 = vcmp.eq.s32.totalorder %v9319_v43, %v4711_v17  ;;  %v8789_v17 = vld [vmem:[#allocation2 + $0x220] sm:$0xff]  }
 0xe8b   :  { %v4720_v52 = vpop.permute.xlu0 %4719 }
 0xe8c   :  { %vm4746_vm10 = vcmp.eq.s32.totalorder %v9319_v43, %v4720_v52  ;;  %v8792_v52 = vld [vmem:[#allocation2 + $0x238] sm:$0xff]  }
 0xe8d   :  { %8482 = vmatpush3.bf16.msra.mxu1 %v8479_v34  ;;  %v4717_v16 = vpop.permute.xlu1 %4716  ;;  %v10624_v34 = vld [vmem:[#allocation31_spill] sm:$0xff] }
 0xe8e   :  { %8484 = vmatprep.subr.bf16.mxu1 %v8483_v9  ;;  %vm4745_vm9 = vcmp.eq.s32.totalorder %v9319_v43, %v4717_v16  ;;  %v8791_v16 = vld [vmem:[#allocation2 + $0x230] sm:$0xff]  }
 0xe8f   :  { %v4726_v11 = vpop.permute.xlu0 %4725 }
 0xe90   :  { %vm4748_vm12 = vcmp.eq.s32.totalorder %v9319_v43, %v4726_v11  ;;  %v8794_v11 = vld [vmem:[#allocation2 + $0x288] sm:$0xff]  }
 0xe91   :  { %8486 = vmatpush3.bf16.msra.mxu1 %v8483_v9  ;;  %v4723_v45 = vpop.permute.xlu1 %4722  ;;  %v8779_v9 = vld [vmem:[#allocation2 + $0x250] sm:$0xff]  }
 0xe92   :  { %8488 = vmatprep.subr.bf16.mxu1 %v8487_v31  ;;  %vm4747_vm11 = vcmp.eq.s32.totalorder %v9319_v43, %v4723_v45  ;;  %v8793_v45 = vld [vmem:[#allocation2 + $0x280] sm:$0xff]  }
 0xe93   :  { %v4732_v33 = vpop.permute.xlu0 %4731 }
 0xe94   :  { %vm4750_vm14 = vcmp.eq.s32.totalorder %v9319_v43, %v4732_v33  ;;  %v8796_v33 = vld [vmem:[#allocation2 + $0x298] sm:$0xff]  }
 0xe95   :  { %8490 = vmatpush3.bf16.msra.mxu1 %v8487_v31  ;;  %v4729_v27 = vpop.permute.xlu1 %4728  ;;  %v8780_v31 = vld [vmem:[#allocation2 + $0x258] sm:$0xff]  }
 0xe96   :  { %8492 = vmatprep.subr.bf16.mxu1 %v8491_v54  ;;  %vm4749_vm13 = vcmp.eq.s32.totalorder %v9319_v43, %v4729_v27  ;;  %v8795_v27 = vld [vmem:[#allocation2 + $0x290] sm:$0xff]  }
 0xe99   :  { %8494 = vmatpush3.bf16.msra.mxu1 %v8491_v54  ;;  %v4735_v53 = vpop.permute.xlu1 %4734  ;;  %v8782_v54 = vld [vmem:[#allocation2 + $0x268] sm:$0xff]  }
 0xe9a   :  { %vm4751_vm15 = vcmp.eq.s32.totalorder %v9319_v43, %v4735_v53  ;;  %v8797_v53 = vld [vmem:[#allocation2 + $0x2a0] sm:$0xff]  }
 0xe9c   :  { %8088 = vmatmul.mubr.msk.f32.vlgmr.msra.gmra.mrb[80].mxu1 %vm4737_vm1, %v10615_v47 }
 0xe9d   :  { %8090 = vmatprep.mubr.msk.f32.mxu1 %vm4738_vm2, %v10615_v47 }
 0xea0   :  { %8091 = vmatmul.mubr.msk.f32.gmra.mrb[82].mxu1 %vm4739_vm3, %v10615_v47 }
 0xea1   :  { %8093 = vmatprep.mubr.msk.f32.mxu1 %vm4740_vm4, %v10615_v47 }
 0xea4   :  { %8094 = vmatmul.mubr.msk.f32.gmra.mrb[84].mxu1 %vm4741_vm5, %v10615_v47 }
 0xea5   :  { %8096 = vmatprep.mubr.msk.f32.mxu1 %vm4742_vm6, %v10615_v47 }
 0xea8   :  { %8097 = vmatmul.mubr.msk.f32.gmra.mrb[86].mxu1 %vm4743_vm7, %v10615_v47 }
 0xea9   :  { %8099 = vmatprep.mubr.msk.f32.mxu1 %vm4744_vm8, %v10615_v47 }
 0xeac   :  { %8100 = vmatmul.mubr.msk.f32.gmra.mrb[88].mxu1 %vm4745_vm9, %v10615_v47 }
 0xead   :  { %8102 = vmatprep.mubr.msk.f32.mxu1 %vm4746_vm10, %v10615_v47 }
 0xeb0   :  { %8103 = vmatmul.mubr.msk.f32.gmra.mrb[90].mxu1 %vm4747_vm11, %v10615_v47 }
 0xeb1   :  { %8105 = vmatprep.mubr.msk.f32.mxu1 %vm4748_vm12, %v10615_v47 }
 0xeb4   :  { %8106 = vmatmul.mubr.msk.f32.gmra.mrb[92].mxu1 %vm4749_vm13, %v10615_v47 }
 0xeb5   :  { %8108 = vmatprep.mubr.msk.f32.mxu1 %vm4750_vm14, %v10615_v47 }
 0xeb8   :  { %8109 = vmatmul.mubr.msk.f32.gmra.mrb[94].mxu1 %vm4751_vm15, %v10615_v47 }
 0xeb9   :  { %8127 = vmatprep.mubr.bf16.mxu1 %v10302_v18 }
 0xf6f   :  { %v8089_v62 = vpop.f32.mrb[80].mxu1 }
 0xf70   :  { %v4850_v40 = vpop.f32.mrb[81].mxu1 }
 0xf71   :  { %v10305_v25 = vpack.c.bf16 %v8089_v62, %v4850_v40  ;;  %v8799_v62 = vld [vmem:[#allocation2 + $0x2b0] sm:$0xff]   ;;  %v8800_v40 = vld [vmem:[#allocation2 + $0x2b8] sm:$0xff]  }
 0xf73   :  { %v8092_v12 = vpop.f32.mrb[82].mxu1  ;;  %8111 = vmatprep.subr.bf16.mxu1 %v10305_v25 }
 0xf74   :  { %v4860_v6 = vpop.f32.mrb[83].mxu1  ;;  %8112 = vmatpush3.bf16.msra.mxu1 %v10305_v25 }
 0xf75   :  { %v10309_v43 = vpack.c.bf16 %v8092_v12, %v4860_v6 }
 0xf77   :  { %v8095_v47 = vpop.f32.mrb[84].mxu1  ;;  %8113 = vmatprep.subr.bf16.mxu1 %v10309_v43 }
 0xf78   :  { %v4870_v41 = vpop.f32.mrb[85].mxu1  ;;  %8114 = vmatpush3.bf16.msra.mxu1 %v10309_v43 }
 0xf79   :  { %v10313_v8 = vpack.c.bf16 %v8095_v47, %v4870_v41 }
 0xf7b   :  { %v8098_v20 = vpop.f32.mrb[86].mxu1  ;;  %8115 = vmatprep.subr.bf16.mxu1 %v10313_v8 }
 0xf7c   :  { %v4880_v36 = vpop.f32.mrb[87].mxu1  ;;  %8116 = vmatpush3.bf16.msra.mxu1 %v10313_v8 }
 0xf7d   :  { %v10317_v35 = vpack.c.bf16 %v8098_v20, %v4880_v36  ;;  %v8802_v20 = vld [vmem:[#allocation2 + $0x2c8] sm:$0xff]  }
 0xf7f   :  { %v8101_v58 = vpop.f32.mrb[88].mxu1  ;;  %8117 = vmatprep.subr.bf16.mxu1 %v10317_v35 }
 0xf80   :  { %v4890_v51 = vpop.f32.mrb[89].mxu1  ;;  %8118 = vmatpush3.bf16.msra.mxu1 %v10317_v35 }
 0xf81   :  { %v10321_v2 = vpack.c.bf16 %v8101_v58, %v4890_v51  ;;  %v8803_v58 = vld [vmem:[#allocation2 + $0x2d0] sm:$0xff]  }
 0xf83   :  { %v8104_v28 = vpop.f32.mrb[90].mxu1  ;;  %8119 = vmatprep.subr.bf16.mxu1 %v10321_v2 }
 0xf84   :  { %v4900_v55 = vpop.f32.mrb[91].mxu1  ;;  %8120 = vmatpush3.bf16.msra.mxu1 %v10321_v2 }
 0xf85   :  { %v10325_v38 = vpack.c.bf16 %v8104_v28, %v4900_v55 }
 0xf87   :  { %v8107_v26 = vpop.f32.mrb[92].mxu1  ;;  %8121 = vmatprep.subr.bf16.mxu1 %v10325_v38 }
 0xf88   :  { %v4910_v61 = vpop.f32.mrb[93].mxu1  ;;  %8122 = vmatpush3.bf16.msra.mxu1 %v10325_v38 }
 0xf89   :  { %v10329_v48 = vpack.c.bf16 %v8107_v26, %v4910_v61 }
 0xf8b   :  { %v8110_v15 = vpop.f32.mrb[94].mxu1  ;;  %8123 = vmatprep.subr.bf16.mxu1 %v10329_v48 }
 0xf8c   :  { %v4920_v1 = vpop.f32.mrb[95].mxu1  ;;  %8124 = vmatpush3.bf16.msra.mxu1 %v10329_v48 }
 0xf8d   :  { %v10333_v22 = vpack.c.bf16 %v8110_v15, %v4920_v1 }
 0xf8f   :  { %8125 = vmatprep.subr.bf16.mxu1 %v10333_v22 }
 0xf90   :  { %8126 = vmatpush3.bf16.msra.mxu1 %v10333_v22 }
 0xf91   :  { %8143 = vmatprep.subr.bf16.mxu1 %v10618_v60 }
 0xf93   :  { %8128 = vmatmul.mubr.bf16.vlgmr.msra.gmra.mrb[96].mxu1 %v8844_v3 }
 0xf94   :  { %8144 = vmatpush3.bf16.msra.mxu1 %v10618_v60  ;;  %8131 = vmatprep.mubr.bf16.mxu1 %v8845_v44 }
 0xf95   :  { %8145 = vmatprep.subr.bf16.mxu1 %v10619_v4 }
 0xf98   :  { %8146 = vmatpush3.bf16.msra.mxu1 %v10619_v4 }
 0xf99   :  { %8147 = vmatprep.subr.bf16.mxu1 %v10620_v21 }
 0xf9b   :  { %8132 = vmatmul.mubr.bf16.gmra.mrb[100].mxu1 %v8846_v50 }
 0xf9c   :  { %8148 = vmatpush3.bf16.msra.mxu1 %v10620_v21  ;;  %8135 = vmatprep.mubr.bf16.mxu1 %v8847_v19 }
 0xf9d   :  { %8149 = vmatprep.subr.bf16.mxu1 %v10621_v5 }
 0xfa0   :  { %8150 = vmatpush3.bf16.msra.mxu1 %v10621_v5 }
 0xfa1   :  { %8151 = vmatprep.subr.bf16.mxu1 %v10622_v0 }
 0xfa3   :  { %8136 = vmatmul.mubr.bf16.gmra.mrb[104].mxu1 %v8848_v32 }
 0xfa4   :  { %8152 = vmatpush3.bf16.msra.mxu1 %v10622_v0  ;;  %8139 = vmatprep.mubr.bf16.mxu1 %v8849_v49 }
 0xfa5   :  { %8153 = vmatprep.subr.bf16.mxu1 %v10623_v23 }
 0xfa8   :  { %8154 = vmatpush3.bf16.msra.mxu1 %v10623_v23 }
 0xfa9   :  { %8155 = vmatprep.subr.bf16.mxu1 %v10624_v34 }
 0xfab   :  { %8140 = vmatmul.mubr.bf16.gmra.mrb[108].mxu1 %v8850_v14 }
 0xfac   :  { %8156 = vmatpush3.bf16.msra.mxu1 %v10624_v34  ;;  %8159 = vmatprep.mubr.bf16.mxu1 %v10302_v18  ;;  %v8798_v18 = vld [vmem:[#allocation2 + $0x2a8] sm:$0xff]  }
 0xfad   :  { %8157 = vmatprep.subr.bf16.mxu1 %v10625_v13 }
 0xfb0   :  { %8158 = vmatpush3.bf16.msra.mxu1 %v10625_v13 }
 0xfb1   :  { %8175 = vmatprep.subr.bf16.mxu1 %v8777_v59 }
 0xfb3   :  { %8160 = vmatmul.mubr.bf16.vlgmr.msra.gmra.mrb[112].mxu1 %v8844_v3  ;;  %v8806_v3 = vld [vmem:[#allocation2 + $0x2e8] sm:$0xff]  }
 0xfb4   :  { %8176 = vmatpush3.bf16.msra.mxu1 %v8777_v59  ;;  %8163 = vmatprep.mubr.bf16.mxu1 %v8845_v44 }
 0xfb5   :  { %8177 = vmatprep.subr.bf16.mxu1 %v8778_v7 }
 0xfb8   :  { %8178 = vmatpush3.bf16.msra.mxu1 %v8778_v7 }
 0xfb9   :  { %8179 = vmatprep.subr.bf16.mxu1 %v8779_v9 }
 0xfbb   :  { %8164 = vmatmul.mubr.bf16.gmra.mrb[116].mxu1 %v8846_v50 }
 0xfbc   :  { %8180 = vmatpush3.bf16.msra.mxu1 %v8779_v9  ;;  %8167 = vmatprep.mubr.bf16.mxu1 %v8847_v19 }
 0xfbd   :  { %8181 = vmatprep.subr.bf16.mxu1 %v8780_v31 }
 0xfc0   :  { %8182 = vmatpush3.bf16.msra.mxu1 %v8780_v31 }
 0xfc1   :  { %8183 = vmatprep.subr.bf16.mxu1 %v8781_v42 }
 0xfc3   :  { %8168 = vmatmul.mubr.bf16.gmra.mrb[120].mxu1 %v8848_v32  ;;  %v8808_v32 = vld [vmem:[#allocation2 + $0x2f8] sm:$0xff]  }
 0xfc4   :  { %8184 = vmatpush3.bf16.msra.mxu1 %v8781_v42  ;;  %8171 = vmatprep.mubr.bf16.mxu1 %v8849_v49 }
 0xfc5   :  { %8185 = vmatprep.subr.bf16.mxu1 %v8782_v54 }
 0xfc8   :  { %8186 = vmatpush3.bf16.msra.mxu1 %v8782_v54 }
 0xfc9   :  { %8187 = vmatprep.subr.bf16.mxu1 %v8783_v57 }
 0xfcb   :  { %8172 = vmatmul.mubr.bf16.gmra.mrb[124].mxu1 %v8850_v14 }
 0xfcc   :  { %8188 = vmatpush3.bf16.msra.mxu1 %v8783_v57  ;;  %8191 = vmatprep.mubr.bf16.mxu1 %v10618_v60 }
 0xfcd   :  { %8189 = vmatprep.subr.bf16.mxu1 %v8784_v46 }
 0xfd0   :  { %8190 = vmatpush3.bf16.msra.mxu1 %v8784_v46 }
 0xfd1   :  { %8207 = vmatprep.subr.bf16.mxu1 %v8785_v63 }
 0xfd3   :  { %8192 = vmatmul.mubr.bf16.vlgmr.msra.gmra.mrb[128].mxu1 %v10619_v4 }
 0xfd4   :  { %8195 = vmatprep.mubr.bf16.mxu1 %v10620_v21  ;;  %8208 = vmatpush3.bf16.msra.mxu1 %v8785_v63  ;;  %v8807_v21 = vld [vmem:[#allocation2 + $0x2f0] sm:$0xff]  }
 0xfd5   :  { %8209 = vmatprep.subr.bf16.mxu1 %v8786_v39 }
 0xfd8   :  { %8210 = vmatpush3.bf16.msra.mxu1 %v8786_v39 }
 0xfd9   :  { %8211 = vmatprep.subr.bf16.mxu1 %v8787_v30 }
 0xfdb   :  { %8196 = vmatmul.mubr.bf16.gmra.mrb[132].mxu1 %v10621_v5 }
 0xfdc   :  { %8199 = vmatprep.mubr.bf16.mxu1 %v10622_v0  ;;  %8212 = vmatpush3.bf16.msra.mxu1 %v8787_v30 }
 0xfdd   :  { %8213 = vmatprep.subr.bf16.mxu1 %v8788_v37 }
 0xfe0   :  { %8214 = vmatpush3.bf16.msra.mxu1 %v8788_v37 }
 0xfe1   :  { %8215 = vmatprep.subr.bf16.mxu1 %v8789_v17 }
 0xfe3   :  { %8200 = vmatmul.mubr.bf16.gmra.mrb[136].mxu1 %v10623_v23 }
 0xfe4   :  { %8203 = vmatprep.mubr.bf16.mxu1 %v10624_v34  ;;  %8216 = vmatpush3.bf16.msra.mxu1 %v8789_v17 }
 0xfe5   :  { %8217 = vmatprep.subr.bf16.mxu1 %v8790_v10 }
 0xfe8   :  { %8218 = vmatpush3.bf16.msra.mxu1 %v8790_v10 }
 0xfe9   :  { %8219 = vmatprep.subr.bf16.mxu1 %v8791_v16 }
 0xfeb   :  { %8204 = vmatmul.mubr.bf16.gmra.mrb[140].mxu1 %v10625_v13 }
 0xfec   :  { %8220 = vmatpush3.bf16.msra.mxu1 %v8791_v16  ;;  %8223 = vmatprep.mubr.bf16.mxu1 %v10305_v25  ;;  %v8801_v25 = vld [vmem:[#allocation2 + $0x2c0] sm:$0xff]  }
 0xfed   :  { %8221 = vmatprep.subr.bf16.mxu1 %v8792_v52 }
 0xff0   :  { %8222 = vmatpush3.bf16.msra.mxu1 %v8792_v52 }
 0xff1   :  { %8239 = vmatprep.subr.bf16.mxu1 %v8793_v45 }
 0xff3   :  { %8224 = vmatmul.mubr.bf16.vlgmr.msra.gmra.mrb[128].mxu1 %v10309_v43 }
 0xff4   :  { %8227 = vmatprep.mubr.bf16.mxu1 %v10313_v8  ;;  %8240 = vmatpush3.bf16.msra.mxu1 %v8793_v45 }
 0xff5   :  { %8241 = vmatprep.subr.bf16.mxu1 %v8794_v11 }
 0xff8   :  { %8242 = vmatpush3.bf16.msra.mxu1 %v8794_v11 }
 0xff9   :  { %8243 = vmatprep.subr.bf16.mxu1 %v8795_v27 }
 0xffb   :  { %8228 = vmatmul.mubr.bf16.gmra.mrb[132].mxu1 %v10317_v35 }
 0xffc   :  { %8231 = vmatprep.mubr.bf16.mxu1 %v10321_v2  ;;  %8244 = vmatpush3.bf16.msra.mxu1 %v8795_v27 }
 0xffd   :  { %8245 = vmatprep.subr.bf16.mxu1 %v8796_v33 }
0x1000   :  { %8246 = vmatpush3.bf16.msra.mxu1 %v8796_v33  ;;  %v8809_v33 = vld [vmem:[#allocation2 + $0x400] sm:$0xff]  }
0x1001   :  { %8247 = vmatprep.subr.bf16.mxu1 %v8797_v53  ;;  %8303 = vmatprep.subr.bf16.mxu0 %v8809_v33 }
0x1002   :  { %8304 = vmatpush3.bf16.msra.mxu0 %v8809_v33 }
0x1003   :  { %8232 = vmatmul.mubr.bf16.gmra.mrb[136].mxu1 %v10325_v38  ;;  %v8804_v38 = vld [vmem:[#allocation2 + $0x2d8] sm:$0xff]  }
0x1004   :  { %8235 = vmatprep.mubr.bf16.mxu1 %v10329_v48  ;;  %8248 = vmatpush3.bf16.msra.mxu1 %v8797_v53  ;;  %v8805_v48 = vld [vmem:[#allocation2 + $0x2e0] sm:$0xff]   ;;  %v8810_v53 = vld [vmem:[#allocation2 + $0x408] sm:$0xff]  }
0x1005   :  { %8249 = vmatprep.subr.bf16.mxu1 %v8798_v18  ;;  %8305 = vmatprep.subr.bf16.mxu0 %v8810_v53 }
0x1006   :  { %8306 = vmatpush3.bf16.msra.mxu0 %v8810_v53 }
0x1008   :  { %8250 = vmatpush3.bf16.msra.mxu1 %v8798_v18  ;;  %v8811_v18 = vld [vmem:[#allocation2 + $0x410] sm:$0xff]  }
0x1009   :  { %8251 = vmatprep.subr.bf16.mxu1 %v8799_v62  ;;  %8307 = vmatprep.subr.bf16.mxu0 %v8811_v18 }
0x100a   :  { %8308 = vmatpush3.bf16.msra.mxu0 %v8811_v18 }
0x100b   :  { %8236 = vmatmul.mubr.bf16.gmra.mrb[140].mxu1 %v10333_v22 }
0x100c   :  { %8252 = vmatpush3.bf16.msra.mxu1 %v8799_v62  ;;  %v8812_v62 = vld [vmem:[#allocation2 + $0x418] sm:$0xff]  }
0x100d   :  { %8253 = vmatprep.subr.bf16.mxu1 %v8800_v40  ;;  %8309 = vmatprep.subr.bf16.mxu0 %v8812_v62 }
0x100e   :  { %8310 = vmatpush3.bf16.msra.mxu0 %v8812_v62 }
0x1010   :  { %8254 = vmatpush3.bf16.msra.mxu1 %v8800_v40  ;;  %v8813_v40 = vld [vmem:[#allocation2 + $0x420] sm:$0xff]  }
0x1011   :  { %8271 = vmatprep.subr.bf16.mxu1 %v8801_v25  ;;  %8311 = vmatprep.subr.bf16.mxu0 %v8813_v40 }
0x1012   :  { %8312 = vmatpush3.bf16.msra.mxu0 %v8813_v40 }
0x1066   :  { %v8129_v12 = vpop.f32.mrb[96].mxu1 }
0x1067   :  { %v4979_v6 = vpop.f32.mrb[97].mxu1 }
0x1068   :  { %v8130_v43 = vpop.f32.mrb[98].mxu1 }
0x1069   :  { %v5043_v47 = vpack.c.bf16 %v8130_v43, %v8129_v12  ;;  %v4982_v41 = vpop.f32.mrb[99].mxu1  ;;  %v8815_v12 = vld [vmem:[#allocation2 + $0x430] sm:$0xff]   ;;  %v8816_v43 = vld [vmem:[#allocation2 + $0x438] sm:$0xff]  }
0x106a   :  { %v5042_v8 = vpack.c.bf16 %v4982_v41, %v4979_v6  ;;  %v10394_v6 = vld [vmem:[%s10550_s5 + $0x28] sm:$0xff] }
0x106b   :  { %v5835_v41 = vrot.slane %v10394_v6, %v10617_v29 }
0x106c   :  { %8255 = vmatprep.mubr.bf16.mxu1 %v5042_v8 }
0x106d   :  { %8256 = vmatmul.mubr.bf16.vlgmr.msra.gmra.mrb[128].mxu1 %v5043_v47 }
0x106e   :  { %v8133_v36 = vpop.f32.mrb[100].mxu1  ;;  %8272 = vmatpush3.bf16.msra.mxu1 %v8801_v25  ;;  %v8814_v25 = vld [vmem:[#allocation2 + $0x428] sm:$0xff]  }
0x106f   :  { %v4995_v35 = vpop.f32.mrb[101].mxu1  ;;  %8273 = vmatprep.subr.bf16.mxu1 %v8802_v20  ;;  %8313 = vmatprep.subr.bf16.mxu0 %v8814_v25 }
0x1070   :  { %v8134_v51 = vpop.f32.mrb[102].mxu1  ;;  %8314 = vmatpush3.bf16.msra.mxu0 %v8814_v25 }
0x1071   :  { %v5045_v2 = vpack.c.bf16 %v8134_v51, %v8133_v36  ;;  %v4998_v28 = vpop.f32.mrb[103].mxu1  ;;  %8315 = vmatprep.subr.bf16.mxu0 %v8815_v12 }
0x1072   :  { %v5044_v55 = vpack.c.bf16 %v4998_v28, %v4995_v35  ;;  %8274 = vmatpush3.bf16.msra.mxu1 %v8802_v20 }
0x1073   :  { %8275 = vmatprep.subr.bf16.mxu1 %v8803_v58 }
0x1074   :  { %8259 = vmatprep.mubr.bf16.mxu1 %v5044_v55  ;;  %8316 = vmatpush3.bf16.msra.mxu0 %v8815_v12 }
0x1075   :  { %8260 = vmatmul.mubr.bf16.gmra.mrb[132].mxu1 %v5045_v2  ;;  %8317 = vmatprep.subr.bf16.mxu0 %v8816_v43 }
0x1076   :  { %v8137_v26 = vpop.f32.mrb[104].mxu1  ;;  %8276 = vmatpush3.bf16.msra.mxu1 %v8803_v58 }
0x1077   :  { %v5011_v61 = vpop.f32.mrb[105].mxu1  ;;  %8277 = vmatprep.subr.bf16.mxu1 %v8804_v38 }
0x1078   :  { %v8138_v15 = vpop.f32.mrb[106].mxu1  ;;  %8318 = vmatpush3.bf16.msra.mxu0 %v8816_v43 }
0x1079   :  { %v5047_v1 = vpack.c.bf16 %v8138_v15, %v8137_v26  ;;  %v5014_v22 = vpop.f32.mrb[107].mxu1 }
0x107a   :  { %v5046_v60 = vpack.c.bf16 %v5014_v22, %v5011_v61  ;;  %8278 = vmatpush3.bf16.msra.mxu1 %v8804_v38 }
0x107b   :  { %8279 = vmatprep.subr.bf16.mxu1 %v8805_v48 }
0x107c   :  { %8263 = vmatprep.mubr.bf16.mxu1 %v5046_v60 }
0x107d   :  { %8264 = vmatmul.mubr.bf16.gmra.mrb[136].mxu1 %v5047_v1 }
0x107e   :  { %v8141_v44 = vpop.f32.mrb[108].mxu1  ;;  %8280 = vmatpush3.bf16.msra.mxu1 %v8805_v48 }
0x107f   :  { %v5027_v4 = vpop.f32.mrb[109].mxu1  ;;  %8281 = vmatprep.subr.bf16.mxu1 %v8806_v3 }
0x1080   :  { %v8142_v50 = vpop.f32.mrb[110].mxu1 }
0x1081   :  { %v5049_v19 = vpack.c.bf16 %v8142_v50, %v8141_v44  ;;  %v5030_v5 = vpop.f32.mrb[111].mxu1 }
0x1082   :  { %v5048_v0 = vpack.c.bf16 %v5030_v5, %v5027_v4  ;;  %8282 = vmatpush3.bf16.msra.mxu1 %v8806_v3 }
0x1083   :  { %8283 = vmatprep.subr.bf16.mxu1 %v8807_v21 }
0x1084   :  { %8267 = vmatprep.mubr.bf16.mxu1 %v5048_v0 }
0x1085   :  { %8268 = vmatmul.mubr.bf16.gmra.mrb[140].mxu1 %v5049_v19 }
0x1086   :  { %v8161_v49 = vpop.f32.mrb[112].mxu1  ;;  %8284 = vmatpush3.bf16.msra.mxu1 %v8807_v21 }
0x1087   :  { %v5084_v23 = vpop.f32.mrb[113].mxu1  ;;  %8285 = vmatprep.subr.bf16.mxu1 %v8808_v32 }
0x1088   :  { %v8162_v34 = vpop.f32.mrb[114].mxu1 }
0x1089   :  { %v5148_v14 = vpack.c.bf16 %v8162_v34, %v8161_v49  ;;  %v5087_v13 = vpop.f32.mrb[115].mxu1 }
0x108a   :  { %v5147_v59 = vpack.c.bf16 %v5087_v13, %v5084_v23  ;;  %8286 = vmatpush3.bf16.msra.mxu1 %v8808_v32 }
0x108c   :  { %8287 = vmatprep.mubr.bf16.mxu1 %v5147_v59 }
0x108d   :  { %8288 = vmatmul.mubr.bf16.vlgmr.msra.gmra.mrb[128].mxu1 %v5148_v14 }
0x108e   :  { %v8165_v7 = vpop.f32.mrb[116].mxu1 }
0x108f   :  { %v5100_v9 = vpop.f32.mrb[117].mxu1 }
0x1090   :  { %v8166_v31 = vpop.f32.mrb[118].mxu1 }
0x1091   :  { %v5150_v42 = vpack.c.bf16 %v8166_v31, %v8165_v7  ;;  %v5103_v54 = vpop.f32.mrb[119].mxu1 }
0x1092   :  { %v5149_v57 = vpack.c.bf16 %v5103_v54, %v5100_v9 }
0x1094   :  { %8291 = vmatprep.mubr.bf16.mxu1 %v5149_v57 }
0x1095   :  { %8292 = vmatmul.mubr.bf16.gmra.mrb[132].mxu1 %v5150_v42 }
0x1096   :  { %v8169_v46 = vpop.f32.mrb[120].mxu1 }
0x1097   :  { %v5116_v63 = vpop.f32.mrb[121].mxu1 }
0x1098   :  { %v8170_v39 = vpop.f32.mrb[122].mxu1 }
0x1099   :  { %v5152_v30 = vpack.c.bf16 %v8170_v39, %v8169_v46  ;;  %v5119_v37 = vpop.f32.mrb[123].mxu1 }
0x109a   :  { %v5151_v17 = vpack.c.bf16 %v5119_v37, %v5116_v63 }
0x109c   :  { %8295 = vmatprep.mubr.bf16.mxu1 %v5151_v17 }
0x109d   :  { %8296 = vmatmul.mubr.bf16.gmra.mrb[136].mxu1 %v5152_v30  ;;  %v10398_v30 = vld [vmem:[#allocation2 + $0x440] sm:$0xff]  }
0x109e   :  { %v8173_v10 = vpop.f32.mrb[124].mxu1  ;;  %8335 = vmatprep.subr.bf16.mxu0 %v10398_v30 }
0x109f   :  { %v5132_v16 = vpop.f32.mrb[125].mxu1 }
0x10a0   :  { %v8174_v52 = vpop.f32.mrb[126].mxu1 }
0x10a1   :  { %v5154_v45 = vpack.c.bf16 %v8174_v52, %v8173_v10  ;;  %v5135_v11 = vpop.f32.mrb[127].mxu1 }
0x10a2   :  { %v5153_v27 = vpack.c.bf16 %v5135_v11, %v5132_v16 }
0x10a4   :  { %8299 = vmatprep.mubr.bf16.mxu1 %v5153_v27 }
0x10a5   :  { %8300 = vmatmul.mubr.bf16.gmra.mrb[140].mxu1 %v5154_v45 }
0x1160   :  { %v8289_v47 = vpop.f32.mrb[128].mxu1 }
0x1161   :  { %v5752_v8 = vpop.f32.mrb[129].mxu1  ;;  %v5838_v51 = vadd.f32 %v8289_v47, %v5835_v41 }
0x1162   :  { %v8290_v20 = vpop.f32.mrb[130].mxu1  ;;  %v5836_v35 = vadd.f32 %v5835_v41, %v5752_v8 }
0x1163   :  { %v5755_v36 = vpop.f32.mrb[131].mxu1  ;;  %v5839_v28 = vadd.f32 %v8290_v20, %v5835_v41 }
0x1164   :  { %v5837_v58 = vadd.f32 %v5835_v41, %v5755_v36 }
0x1166   :  { %v5868_v2 = vadd.f32 %v5837_v58, %v5836_v35 }
0x1168   :  { %v5869_v55 = vadd.f32 %v5868_v2, %v5838_v51  ;;  %v8293_v38 = vpop.f32.mrb[132].mxu1 }
0x1169   :  { %v5768_v26 = vpop.f32.mrb[133].mxu1  ;;  %v5842_v3 = vadd.f32 %v8293_v38, %v5835_v41 }
0x116a   :  { %v5840_v61 = vadd.f32 %v5835_v41, %v5768_v26  ;;  %v5870_v48 = vadd.f32 %v5869_v55, %v5839_v28  ;;  %v8294_v15 = vpop.f32.mrb[134].mxu1 }
0x116b   :  { %v5771_v1 = vpop.f32.mrb[135].mxu1  ;;  %v5843_v4 = vadd.f32 %v8294_v15, %v5835_v41 }
0x116c   :  { %v5871_v22 = vadd.f32 %v5870_v48, %v5840_v61  ;;  %v5841_v60 = vadd.f32 %v5835_v41, %v5771_v1 }
0x116e   :  { %v5872_v44 = vadd.f32 %v5871_v22, %v5841_v60 }
0x1170   :  { %v5873_v21 = vadd.f32 %v5872_v44, %v5842_v3  ;;  %v8297_v50 = vpop.f32.mrb[136].mxu1 }
0x1171   :  { %v5784_v19 = vpop.f32.mrb[137].mxu1  ;;  %v5846_v23 = vadd.f32 %v8297_v50, %v5835_v41 }
0x1172   :  { %v5844_v5 = vadd.f32 %v5835_v41, %v5784_v19  ;;  %v5874_v0 = vadd.f32 %v5873_v21, %v5843_v4  ;;  %v8298_v32 = vpop.f32.mrb[138].mxu1 }
0x1173   :  { %v5787_v49 = vpop.f32.mrb[139].mxu1  ;;  %v5847_v59 = vadd.f32 %v8298_v32, %v5835_v41  ;;  %v5862_v9 = vmul.f32 0.0, %v5846_v23 }
0x1174   :  { %v5860_v34 = vmul.f32 0.0, %v5844_v5  ;;  %v5845_v14 = vadd.f32 %v5835_v41, %v5787_v49 }
0x1175   :  { %v5863_v57 = vmul.f32 0.0, %v5847_v59 }
0x1176   :  { %v5875_v13 = vadd.f32 %v5874_v0, %v5860_v34  ;;  %v5861_v7 = vmul.f32 0.0, %v5845_v14 }
0x1178   :  { %v5876_v31 = vadd.f32 %v5875_v13, %v5861_v7  ;;  %v8301_v42 = vpop.f32.mrb[140].mxu1 }
0x1179   :  { %v5800_v54 = vpop.f32.mrb[141].mxu1  ;;  %v5850_v17 = vadd.f32 %v8301_v42, %v5835_v41 }
0x117a   :  { %v5877_v46 = vadd.f32 %v5876_v31, %v5862_v9  ;;  %v5848_v63 = vadd.f32 %v5835_v41, %v5800_v54  ;;  %v8302_v39 = vpop.f32.mrb[142].mxu1 }
0x117b   :  { %v5803_v37 = vpop.f32.mrb[143].mxu1  ;;  %v5851_v11 = vadd.f32 %v8302_v39, %v5835_v41  ;;  %v5866_v33 = vmul.f32 0.0, %v5850_v17 }
0x117c   :  { %v5864_v10 = vmul.f32 0.0, %v5848_v63  ;;  %v5878_v16 = vadd.f32 %v5877_v46, %v5863_v57  ;;  %v5849_v52 = vadd.f32 %v5835_v41, %v5803_v37 }
0x117d   :  { %v5867_v18 = vmul.f32 0.0, %v5851_v11 }
0x117e   :  { %v5879_v45 = vadd.f32 %v5878_v16, %v5864_v10  ;;  %v5865_v27 = vmul.f32 0.0, %v5849_v52 }
0x1180   :  { %v5880_v53 = vadd.f32 %v5879_v45, %v5865_v27 }
0x1182   :  { %v5881_v62 = vadd.f32 %v5880_v53, %v5866_v33 }
0x1184   :  { %v5882_v40 = vadd.f32 %v5881_v62, %v5867_v18 }
0x1186   :  { %v5883_v25 = vrot.slane %v5882_v40, 4 }
0x1188   :  { %v5884_v12 = vadd.f32 %v5883_v25, %v5882_v40 }
0x118a   :  { %v5885_v43 = vrot.slane %v5884_v12, 2 }
0x118c   :  { %v5886_v47 = vadd.f32 %v5885_v43, %v5884_v12 }
0x118e   :  { %v5887_v8 = vrot.slane %v5886_v47, 1 }
0x1190   :  { %v5888_v20 = vadd.f32 %v5887_v8, %v5886_v47 }
0x1192   :  { %v5889_v36 = vmul.f32 0.015625, %v5888_v20 }
0x1194   :  { %v10401_v2 = vsub.f32 %v5836_v35, %v5889_v36  ;;  %v10403_v55 = vsub.f32 %v5837_v58, %v5889_v36  ;;  %v10405_v38 = vsub.f32 %v5838_v51, %v5889_v36  ;;  %v10407_v41 = vsub.f32 %v5839_v28, %v5889_v36 }
0x1195   :  { %v10409_v26 = vsub.f32 %v5840_v61, %v5889_v36  ;;  %v10411_v48 = vsub.f32 %v5841_v60, %v5889_v36  ;;  %v10413_v15 = vsub.f32 %v5842_v3, %v5889_v36  ;;  %v10415_v1 = vsub.f32 %v5843_v4, %v5889_v36 }
0x1196   :  { %v5898_v22 = vsub.f32 %v5860_v34, %v5889_v36  ;;  %v5899_v44 = vsub.f32 %v5861_v7, %v5889_v36  ;;  %v5900_v21 = vsub.f32 %v5862_v9, %v5889_v36  ;;  %v5901_v50 = vsub.f32 %v5863_v57, %v5889_v36 }
0x1197   :  { %v5902_v35 = vsub.f32 %v5864_v10, %v5889_v36  ;;  %v5903_v19 = vsub.f32 %v5865_v27, %v5889_v36  ;;  %v5904_v58 = vsub.f32 %v5866_v33, %v5889_v36  ;;  %v5905_v5 = vsub.f32 %v5867_v18, %v5889_v36 }
0x1198   :  { %v5922_v51 = vmul.f32 %v10401_v2, %v10401_v2  ;;  %v5923_v28 = vmul.f32 %v10403_v55, %v10403_v55  ;;  %v5924_v61 = vmul.f32 %v10405_v38, %v10405_v38  ;;  %v5925_v3 = vmul.f32 %v10407_v41, %v10407_v41 }
0x1199   :  { %v5926_v0 = vmul.f32 %v10409_v26, %v10409_v26  ;;  %v5927_v49 = vmul.f32 %v10411_v48, %v10411_v48  ;;  %v10429_v34 = vmul.f32 0.0, %v5898_v22  ;;  %v5928_v14 = vmul.f32 %v10413_v15, %v10413_v15 }
0x119a   :  { %v5938_v60 = vadd.f32 %v5923_v28, %v5922_v51  ;;  %v10433_v59 = vmul.f32 0.0, %v5899_v44  ;;  %v5929_v7 = vmul.f32 %v10415_v1, %v10415_v1  ;;  %v10437_v31 = vmul.f32 0.0, %v5900_v21 }
0x119b   :  { %v5930_v42 = vmul.f32 %v10429_v34, %v10429_v34  ;;  %v10441_v57 = vmul.f32 0.0, %v5901_v50  ;;  %v10445_v39 = vmul.f32 0.0, %v5902_v35  ;;  %v5919_v10 = vmul.f32 0.0, %v5903_v19 }
0x119c   :  { %v5939_v4 = vadd.f32 %v5938_v60, %v5924_v61  ;;  %v5931_v46 = vmul.f32 %v10433_v59, %v10433_v59  ;;  %v5932_v37 = vmul.f32 %v10437_v31, %v10437_v31  ;;  %v10451_v45 = vmul.f32 0.0, %v5904_v58 }
0x119d   :  { %v5933_v16 = vmul.f32 %v10441_v57, %v10441_v57  ;;  %v5934_v11 = vmul.f32 %v10445_v39, %v10445_v39  ;;  %v10455_v33 = vmul.f32 0.0, %v5905_v5  ;;  %v5935_v53 = vmul.f32 %v5919_v10, %v5919_v10 }
0x119e   :  { %v5940_v32 = vadd.f32 %v5939_v4, %v5925_v3  ;;  %v5936_v62 = vmul.f32 %v10451_v45, %v10451_v45  ;;  %v6001_v35 = vrot.slane %v10394_v6, %v9377_v56  ;;  %v10465_v19 = vrot.slane %v10394_v6, %v9380_v24 }
0x119f   :  { %v5937_v25 = vmul.f32 %v10455_v33, %v10455_v33 }
0x11a0   :  { %v5941_v23 = vadd.f32 %v5940_v32, %v5926_v0  ;;  %v10467_v5 = vmul.f32 0.0, %v6001_v35 }
0x11a2   :  { %v5942_v13 = vadd.f32 %v5941_v23, %v5927_v49 }
0x11a4   :  { %v5943_v9 = vadd.f32 %v5942_v13, %v5928_v14 }
0x11a6   :  { %v5944_v54 = vadd.f32 %v5943_v9, %v5929_v7 }
0x11a8   :  { %v5945_v63 = vadd.f32 %v5944_v54, %v5930_v42  ;;  %v10626_v42 = vld [vmem:[#allocation9_spill] sm:$0xff] }
0x11aa   :  { %v5946_v17 = vadd.f32 %v5945_v63, %v5931_v46  ;;  %v10627_v46 = vld [vmem:[#allocation11_spill] sm:$0xff] }
0x11ac   :  { %v5947_v52 = vadd.f32 %v5946_v17, %v5932_v37  ;;  %v10628_v37 = vld [vmem:[#allocation12_spill] sm:$0xff] }
0x11ae   :  { %v5948_v27 = vadd.f32 %v5947_v52, %v5933_v16  ;;  %v10629_v16 = vld [vmem:[#allocation10_spill] sm:$0xff] }
0x11b0   :  { %v5949_v18 = vadd.f32 %v5948_v27, %v5934_v11  ;;  %v10631_v27 = vld [vmem:[#allocation15_spill] sm:$0xff] }
0x11b2   :  { %v5950_v40 = vadd.f32 %v5949_v18, %v5935_v53 }
0x11b4   :  { %v5951_v12 = vadd.f32 %v5950_v40, %v5936_v62  ;;  %v10632_v40 = vld [vmem:[#allocation16_spill] sm:$0xff] }
0x11b6   :  { %v5952_v43 = vadd.f32 %v5951_v12, %v5937_v25 }
0x11b8   :  { %v5953_v47 = vrot.slane %v5952_v43, 4 }
0x11ba   :  { %v5954_v8 = vadd.f32 %v5953_v47, %v5952_v43 }
0x11bc   :  { %v5955_v20 = vrot.slane %v5954_v8, 2 }
0x11be   :  { %v5956_v36 = vadd.f32 %v5955_v20, %v5954_v8  ;;  %v10633_v20 = vld [vmem:[#allocation14_spill] sm:$0xff] }
0x11c0   :  { %v5957_v22 = vrot.slane %v5956_v36, 1 }
0x11c2   :  { %v5958_v44 = vadd.f32 %v5957_v22, %v5956_v36 }
0x11c4   :  { %v5959_v21 = vmul.f32 0.015625, %v5958_v44 }
0x11c6   :  { %v5960_v50 = vadd.f32 1e-05, %v5959_v21 }
0x11c8   :  { %8833 = vrsqrt.f32 %v5960_v50 }
0x11d2   :  { %v8834_v58 = vpop.eup %8833 }
0x11d3   :  { %v5975_v51 = vmul.f32 %v8834_v58, %v5919_v10  ;;  %v5962_v28 = vmul.f32 %v8834_v58, %v10401_v2  ;;  %v5963_v61 = vmul.f32 %v8834_v58, %v10403_v55  ;;  %v5964_v60 = vmul.f32 %v8834_v58, %v10405_v38 }
0x11d4   :  { %v5965_v3 = vmul.f32 %v8834_v58, %v10407_v41  ;;  %v5966_v4 = vmul.f32 %v8834_v58, %v10409_v26  ;;  %v5967_v56 = vmul.f32 %v8834_v58, %v10411_v48  ;;  %v5968_v0 = vmul.f32 %v8834_v58, %v10413_v15 }
0x11d5   :  { %v5995_v24 = vmul.f32 %v10465_v19, %v5975_v51  ;;  %v5982_v6 = vmul.f32 %v10465_v19, %v5962_v28  ;;  %v5983_v32 = vmul.f32 %v10465_v19, %v5963_v61  ;;  %v5984_v2 = vmul.f32 %v10465_v19, %v5964_v60  ;;  %v8818_v51 = vld [vmem:[#allocation2 + $0x448] sm:$0xff]  }
0x11d6   :  { %v5985_v55 = vmul.f32 %v10465_v19, %v5965_v3  ;;  %v5986_v38 = vmul.f32 %v10465_v19, %v5966_v4  ;;  %v5987_v41 = vmul.f32 %v10465_v19, %v5967_v56  ;;  %v5969_v26 = vmul.f32 %v8834_v58, %v10415_v1  ;;  %v10630_v1 = vld [vmem:[#allocation13_spill] sm:$0xff]  ;;  %v10634_v4 = vld [vmem:[#allocation23_spill] sm:$0xff] }
0x11d7   :  { %v6018_v49 = vadd.f32 %v6001_v35, %v5982_v6  ;;  %v6019_v48 = vadd.f32 %v6001_v35, %v5983_v32  ;;  %v6020_v23 = vadd.f32 %v6001_v35, %v5984_v2  ;;  %v5988_v15 = vmul.f32 %v10465_v19, %v5968_v0  ;;  %v10636_v32 = vld [vmem:[#allocation19_spill] sm:$0xff] }
0x11d8   :  { %v6021_v14 = vadd.f32 %v6001_v35, %v5985_v55  ;;  %v6022_v13 = vadd.f32 %v6001_v35, %v5986_v38  ;;  %v6023_v7 = vadd.f32 %v6001_v35, %v5987_v41  ;;  %v5989_v9 = vmul.f32 %v10465_v19, %v5969_v26  ;;  %v8819_v41 = vld [vmem:[#allocation2 + $0x450] sm:$0xff]   ;;  %v10637_v26 = vld [vmem:[#allocation20_spill] sm:$0xff] }
0x11d9   :  { %v6034_v54 = vadd.f32 %v6018_v49, %v10626_v42  ;;  %v6035_v63 = vadd.f32 %v6019_v48, %v10627_v46  ;;  %v6036_v17 = vadd.f32 %v6020_v23, %v10628_v37  ;;  %v6024_v10 = vadd.f32 %v6001_v35, %v5988_v15  ;;  %v10638_v23 = vld [vmem:[#allocation18_spill] sm:$0xff]  ;;  %v8820_v46 = vld [vmem:[#allocation2 + $0x458] sm:$0xff]  }
0x11da   :  { %v6037_v52 = vadd.f32 %v6021_v14, %v10629_v16  ;;  %v6038_v11 = vadd.f32 %v6022_v13, %v10630_v1  ;;  %v6039_v53 = vadd.f32 %v6023_v7, %v10631_v27  ;;  %v6025_v18 = vadd.f32 %v6001_v35, %v5989_v9  ;;  %v10640_v7 = vld [vmem:[#allocation24_spill] sm:$0xff]  ;;  %v8824_v16 = vld [vmem:[#allocation2 + $0x478] sm:$0xff]  }
0x11db   :  { %v6066_v62 = vpack.c.bf16 %v6035_v63, %v6034_v54  ;;  %v6040_v25 = vadd.f32 %v6024_v10, %v10632_v40  ;;  %v5970_v12 = vmul.f32 %v8834_v58, %v10429_v34  ;;  %v5971_v43 = vmul.f32 %v8834_v58, %v10433_v59  ;;  %v10641_v63 = vld [vmem:[#allocation22_spill] sm:$0xff]  ;;  %v8822_v10 = vld [vmem:[#allocation2 + $0x468] sm:$0xff]  }
0x11dc   :  { %v6067_v47 = vpack.c.bf16 %v6037_v52, %v6036_v17  ;;  %v6068_v8 = vpack.c.bf16 %v6039_v53, %v6038_v11  ;;  %v6041_v36 = vadd.f32 %v6025_v18, %v10633_v20  ;;  %v5972_v22 = vmul.f32 %v8834_v58, %v10437_v31  ;;  %v8821_v17 = vld [vmem:[#allocation2 + $0x460] sm:$0xff]   ;;  %v6074_v52 = vld [vmem:[%s10550_s5 + $0x38] sm:$0xff] }
0x11dd   :  { %8319 = vmatprep.mubr.bf16.mxu0 %v6066_v62  ;;  %v5990_v44 = vmul.f32 %v10465_v19, %v5970_v12  ;;  %v5991_v21 = vmul.f32 %v10465_v19, %v5971_v43  ;;  %v5973_v50 = vmul.f32 %v8834_v58, %v10441_v57  ;;  %v5974_v35 = vmul.f32 %v8834_v58, %v10445_v39 }
0x11de   :  { %8320 = vmatmul.mubr.bf16.vlgmr.msra.gmra.mrb[144].mxu0 %v6067_v47  ;;  %v6069_v34 = vpack.c.bf16 %v6041_v36, %v6040_v25  ;;  %v5992_v59 = vmul.f32 %v10465_v19, %v5972_v22  ;;  %v6031_v28 = vadd.f32 %v10467_v5, %v5995_v24  ;;  %v5976_v61 = vmul.f32 %v8834_v58, %v10451_v45  ;;  %v10635_v45 = vld [vmem:[#allocation17_spill] sm:$0xff] }
0x11df   :  { %8323 = vmatprep.mubr.bf16.mxu0 %v6068_v8  ;;  %v6026_v31 = vadd.f32 %v10467_v5, %v5990_v44  ;;  %v6027_v60 = vadd.f32 %v10467_v5, %v5991_v21  ;;  %v5993_v3 = vmul.f32 %v10465_v19, %v5973_v50  ;;  %v5994_v57 = vmul.f32 %v10465_v19, %v5974_v35 }
0x11e0   :  { %v6028_v39 = vadd.f32 %v10467_v5, %v5992_v59  ;;  %v6047_v56 = vadd.f32 %v6031_v28, %v10634_v4  ;;  %v5977_v0 = vmul.f32 %v8834_v58, %v10455_v33  ;;  %v5996_v6 = vmul.f32 %v10465_v19, %v5976_v61  ;;  %8336 = vmatpush3.bf16.msra.mxu0 %v10398_v30  ;;  %v10639_v30 = vld [vmem:[#allocation21_spill] sm:$0xff] }
0x11e1   :  { %v6042_v24 = vadd.f32 %v6026_v31, %v10635_v45  ;;  %v6043_v2 = vadd.f32 %v6027_v60, %v10636_v32  ;;  %v6029_v55 = vadd.f32 %v10467_v5, %v5993_v3  ;;  %v6030_v38 = vadd.f32 %v10467_v5, %v5994_v57  ;;  %8337 = vmatprep.subr.bf16.mxu0 %v8818_v51 }
0x11e2   :  { %v6044_v49 = vadd.f32 %v6028_v39, %v10637_v26  ;;  %v5997_v48 = vmul.f32 %v10465_v19, %v5977_v0  ;;  %v6032_v33 = vadd.f32 %v10467_v5, %v5996_v6  ;;  %v6078_v1 = vrot.slane %v6074_v52, %v10617_v29 }
0x11e3   :  { %v6070_v58 = vpack.c.bf16 %v6043_v2, %v6042_v24  ;;  %v6045_v15 = vadd.f32 %v6029_v55, %v10638_v23  ;;  %v6046_v14 = vadd.f32 %v6030_v38, %v10639_v30 }
0x11e4   :  { %v6033_v13 = vadd.f32 %v10467_v5, %v5997_v48  ;;  %v6048_v9 = vadd.f32 %v6032_v33, %v10640_v7  ;;  %8338 = vmatpush3.bf16.msra.mxu0 %v8818_v51  ;;  %v8823_v5 = vld [vmem:[#allocation2 + $0x470] sm:$0xff]  }
0x11e5   :  { %v6071_v42 = vpack.c.bf16 %v6045_v15, %v6044_v49  ;;  %v6072_v54 = vpack.c.bf16 %v6047_v56, %v6046_v14  ;;  %8339 = vmatprep.subr.bf16.mxu0 %v8819_v41 }
0x11e6   :  { %8324 = vmatmul.mubr.bf16.gmra.mrb[148].mxu0 %v6069_v34  ;;  %v6049_v37 = vadd.f32 %v6033_v13, %v10641_v63 }
0x11e7   :  { %8327 = vmatprep.mubr.bf16.mxu0 %v6070_v58 }
0x11e8   :  { %v6073_v19 = vpack.c.bf16 %v6049_v37, %v6048_v9  ;;  %8340 = vmatpush3.bf16.msra.mxu0 %v8819_v41 }
0x11e9   :  { %8341 = vmatprep.subr.bf16.mxu0 %v8820_v46 }
0x11ec   :  { %8342 = vmatpush3.bf16.msra.mxu0 %v8820_v46 }
0x11ed   :  { %8343 = vmatprep.subr.bf16.mxu0 %v8821_v17 }
0x11ee   :  { %8328 = vmatmul.mubr.bf16.gmra.mrb[152].mxu0 %v6071_v42 }
0x11ef   :  { %8331 = vmatprep.mubr.bf16.mxu0 %v6072_v54 }
0x11f0   :  { %8344 = vmatpush3.bf16.msra.mxu0 %v8821_v17 }
0x11f1   :  { %8345 = vmatprep.subr.bf16.mxu0 %v8822_v10 }
0x11f4   :  { %8346 = vmatpush3.bf16.msra.mxu0 %v8822_v10 }
0x11f5   :  { %8347 = vmatprep.subr.bf16.mxu0 %v8823_v5 }
0x11f6   :  { %8332 = vmatmul.mubr.bf16.gmra.mrb[156].mxu0 %v6073_v19  ;;  %v6264_v19 = vld [vmem:[%s10550_s5 + $0x40] sm:$0xff]  ;;  %s8904_s5 = smov [#allocation5]  }
0x11f7   :  { %v6268_v17 = vrot.slane %v6264_v19, %v10617_v29  ;;  %s6435_s10 = sshll.u32 %s8904_s5, 4  ;;  %s6436_s10 = int_to_ptr.vmem [resolvable:$true] %s6435_s10 }
0x11f8   :  { %8348 = vmatpush3.bf16.msra.mxu0 %v8823_v5  ;;  %s8873_s11 = scalar_lea.vmem %s6436_s10, 2048  ;;  %p8878_p9 = scmp.lt.s32.totalorder %s6436_s10, %s6436_s10 }
0x11f9   :  { %8349 = vmatprep.subr.bf16.mxu0 %v8824_v16  ;;  %p8874_p8 = scmp.ne.s32.totalorder %s6436_s10, %s8873_s11  ;;  %p8879_p10 = scmp.lt.s32.totalorder %s8873_s11, %s8873_s11 }
0x11fb   :  { %p8880_p11 = por %p8879_p10, %p8878_p9 }
0x11fc   :  { %8350 = vmatpush3.bf16.msra.mxu0 %v8824_v16 }
0x11fd   :  { %p8881_p12 = pnand %p8880_p11, %p8874_p8 }
0x12b1   :  { %v8321_v11 = vpop.f32.mrb[144].mxu0 }
0x12b2   :  { %v6170_v27 = vadd.f32 %v8321_v11, %v6078_v1  ;;  %v6161_v53 = vpop.f32.mrb[145].mxu0 }
0x12b3   :  { %v6162_v18 = vadd.f32 %v6161_v53, %v6078_v1  ;;  %v8322_v62 = vpop.f32.mrb[146].mxu0 }
0x12b4   :  { %v6173_v40 = vadd.f32 %v8322_v62, %v6078_v1  ;;  %v6164_v25 = vpop.f32.mrb[147].mxu0  ;;  %v6226_v43 = vmax.f32 %v6170_v27, 0.0 }
0x12b5   :  { %v6165_v12 = vadd.f32 %v6164_v25, %v6078_v1  ;;  %v6224_v8 = vmax.f32 %v6162_v18, 0.0 }
0x12b6   :  { %v6227_v47 = vmax.f32 %v6173_v40, 0.0 }
0x12b7   :  { %v6225_v20 = vmax.f32 %v6165_v12, 0.0 }
0x12b8   :  { %v6257_v36 = vpack.c.bf16 %v6227_v47, %v6226_v43 }
0x12b9   :  { %v6256_v22 = vpack.c.bf16 %v6225_v20, %v6224_v8  ;;  %v8325_v44 = vpop.f32.mrb[148].mxu0 }
0x12ba   :  { %v6186_v21 = vadd.f32 %v8325_v44, %v6078_v1  ;;  %v6177_v50 = vpop.f32.mrb[149].mxu0 }
0x12bb   :  { %v6178_v35 = vadd.f32 %v6177_v50, %v6078_v1  ;;  %v8326_v51 = vpop.f32.mrb[150].mxu0  ;;  %8351 = vmatprep.mubr.bf16.mxu0 %v6256_v22 }
0x12bc   :  { %v6189_v34 = vadd.f32 %v8326_v51, %v6078_v1  ;;  %v6180_v59 = vpop.f32.mrb[151].mxu0  ;;  %8352 = vmatmul.mubr.bf16.vlgmr.msra.gmra.mrb[160].mxu0 %v6257_v36  ;;  %v6230_v61 = vmax.f32 %v6186_v21, 0.0 }
0x12bd   :  { %v6181_v28 = vadd.f32 %v6180_v59, %v6078_v1  ;;  %v6228_v60 = vmax.f32 %v6178_v35, 0.0 }
0x12be   :  { %v6231_v31 = vmax.f32 %v6189_v34, 0.0 }
0x12bf   :  { %v6229_v3 = vmax.f32 %v6181_v28, 0.0 }
0x12c0   :  { %v6259_v57 = vpack.c.bf16 %v6231_v31, %v6230_v61 }
0x12c1   :  { %v6258_v39 = vpack.c.bf16 %v6229_v3, %v6228_v60  ;;  %v8329_v4 = vpop.f32.mrb[152].mxu0 }
0x12c2   :  { %v6202_v56 = vadd.f32 %v8329_v4, %v6078_v1  ;;  %v6193_v0 = vpop.f32.mrb[153].mxu0 }
0x12c3   :  { %v6194_v6 = vadd.f32 %v6193_v0, %v6078_v1  ;;  %v8330_v45 = vpop.f32.mrb[154].mxu0  ;;  %8355 = vmatprep.mubr.bf16.mxu0 %v6258_v39 }
0x12c4   :  { %v6205_v24 = vadd.f32 %v8330_v45, %v6078_v1  ;;  %v6196_v32 = vpop.f32.mrb[155].mxu0  ;;  %8356 = vmatmul.mubr.bf16.gmra.mrb[164].mxu0 %v6259_v57  ;;  %v6234_v55 = vmax.f32 %v6202_v56, 0.0 }
0x12c5   :  { %v6197_v2 = vadd.f32 %v6196_v32, %v6078_v1  ;;  %v6232_v41 = vmax.f32 %v6194_v6, 0.0 }
0x12c6   :  { %v6235_v38 = vmax.f32 %v6205_v24, 0.0 }
0x12c7   :  { %v6233_v26 = vmax.f32 %v6197_v2, 0.0 }
0x12c8   :  { %v6261_v49 = vpack.c.bf16 %v6235_v38, %v6234_v55 }
0x12c9   :  { %v6260_v48 = vpack.c.bf16 %v6233_v26, %v6232_v41  ;;  %v8333_v33 = vpop.f32.mrb[156].mxu0 }
0x12ca   :  { %v6218_v58 = vadd.f32 %v8333_v33, %v6078_v1  ;;  %v6209_v23 = vpop.f32.mrb[157].mxu0 }
0x12cb   :  { %v6210_v15 = vadd.f32 %v6209_v23, %v6078_v1  ;;  %v8334_v30 = vpop.f32.mrb[158].mxu0  ;;  %8359 = vmatprep.mubr.bf16.mxu0 %v6260_v48 }
0x12cc   :  { %v6221_v14 = vadd.f32 %v8334_v30, %v6078_v1  ;;  %v6212_v13 = vpop.f32.mrb[159].mxu0  ;;  %8360 = vmatmul.mubr.bf16.gmra.mrb[168].mxu0 %v6261_v49  ;;  %v6238_v9 = vmax.f32 %v6218_v58, 0.0 }
0x12cd   :  { %v6213_v7 = vadd.f32 %v6212_v13, %v6078_v1  ;;  %v6236_v54 = vmax.f32 %v6210_v15, 0.0 }
0x12ce   :  { %v6239_v42 = vmax.f32 %v6221_v14, 0.0 }
0x12cf   :  { %v6237_v46 = vmax.f32 %v6213_v7, 0.0 }
0x12d0   :  { %v6263_v63 = vpack.c.bf16 %v6239_v42, %v6238_v9 }
0x12d1   :  { %v6262_v37 = vpack.c.bf16 %v6237_v46, %v6236_v54 }
0x12d3   :  { %8363 = vmatprep.mubr.bf16.mxu0 %v6262_v37 }
0x12d4   :  { %8364 = vmatmul.mubr.bf16.gmra.mrb[172].mxu0 %v6263_v63 }
0x138f   :  { %v8353_v10 = vpop.f32.mrb[160].mxu0 }
0x1390   :  { %v6360_v5 = vadd.f32 %v8353_v10, %v6268_v17  ;;  %v6351_v16 = vpop.f32.mrb[161].mxu0 }
0x1391   :  { %v6352_v52 = vadd.f32 %v6351_v16, %v6268_v17  ;;  %v8354_v11 = vpop.f32.mrb[162].mxu0 }
0x1392   :  { %6416 = vst [vmem:[#allocation5 + $0x10] sm:$0xff] %v6360_v5  ;;  %v6363_v1 = vadd.f32 %v8354_v11, %v6268_v17  ;;  %v6354_v27 = vpop.f32.mrb[163].mxu0 }
0x1393   :  { %6414 = vst [vmem:[#allocation5] sm:$0xff] %v6352_v52  ;;  %v6355_v53 = vadd.f32 %v6354_v27, %v6268_v17 }
0x1394   :  { %6417 = vst [vmem:[#allocation5 + $0x18] sm:$0xff] %v6363_v1 }
0x1395   :  { %6415 = vst [vmem:[#allocation5 + $0x8] sm:$0xff] %v6355_v53 }
0x1397   :  { %v8357_v18 = vpop.f32.mrb[164].mxu0 }
0x1398   :  { %v6376_v62 = vadd.f32 %v8357_v18, %v6268_v17  ;;  %v6367_v40 = vpop.f32.mrb[165].mxu0 }
0x1399   :  { %v6368_v25 = vadd.f32 %v6367_v40, %v6268_v17  ;;  %v8358_v12 = vpop.f32.mrb[166].mxu0 }
0x139a   :  { %6420 = vst [vmem:[#allocation5 + $0x30] sm:$0xff] %v6376_v62  ;;  %v6379_v43 = vadd.f32 %v8358_v12, %v6268_v17  ;;  %v6370_v29 = vpop.f32.mrb[167].mxu0 }
0x139b   :  { %6418 = vst [vmem:[#allocation5 + $0x20] sm:$0xff] %v6368_v25  ;;  %v6371_v47 = vadd.f32 %v6370_v29, %v6268_v17 }
0x139c   :  { %6421 = vst [vmem:[#allocation5 + $0x38] sm:$0xff] %v6379_v43 }
0x139d   :  { %6419 = vst [vmem:[#allocation5 + $0x28] sm:$0xff] %v6371_v47 }
0x139f   :  { %v8361_v8 = vpop.f32.mrb[168].mxu0 }
0x13a0   :  { %v6392_v20 = vadd.f32 %v8361_v8, %v6268_v17  ;;  %v6383_v36 = vpop.f32.mrb[169].mxu0 }
0x13a1   :  { %v6384_v22 = vadd.f32 %v6383_v36, %v6268_v17  ;;  %v8362_v44 = vpop.f32.mrb[170].mxu0 }
0x13a2   :  { %6424 = vst [vmem:[#allocation5 + $0x50] sm:$0xff] %v6392_v20  ;;  %v6395_v21 = vadd.f32 %v8362_v44, %v6268_v17  ;;  %v6386_v50 = vpop.f32.mrb[171].mxu0 }
0x13a3   :  { %6422 = vst [vmem:[#allocation5 + $0x40] sm:$0xff] %v6384_v22  ;;  %v6387_v35 = vadd.f32 %v6386_v50, %v6268_v17 }
0x13a4   :  { %6425 = vst [vmem:[#allocation5 + $0x58] sm:$0xff] %v6395_v21 }
0x13a5   :  { %6423 = vst [vmem:[#allocation5 + $0x48] sm:$0xff] %v6387_v35 }
0x13a7   :  { %v8365_v51 = vpop.f32.mrb[172].mxu0 }
0x13a8   :  { %v6408_v34 = vadd.f32 %v8365_v51, %v6268_v17  ;;  %v6399_v59 = vpop.f32.mrb[173].mxu0 }
0x13a9   :  { %v6400_v28 = vadd.f32 %v6399_v59, %v6268_v17  ;;  %v8366_v61 = vpop.f32.mrb[174].mxu0 }
0x13aa   :  { %6428 = vst [vmem:[#allocation5 + $0x70] sm:$0xff] %v6408_v34  ;;  %v6411_v31 = vadd.f32 %v8366_v61, %v6268_v17  ;;  %v6402_v60 = vpop.f32.mrb[175].mxu0 }
0x13ab   :  { %6426 = vst [vmem:[#allocation5 + $0x60] sm:$0xff] %v6400_v28  ;;  %v6403_v3 = vadd.f32 %v6402_v60, %v6268_v17 }
0x13ac   :  { %6429 = vst [vmem:[#allocation5 + $0x78] sm:$0xff] %v6411_v31 }
0x13ad   :  { %6427 = vst [vmem:[#allocation5 + $0x68] sm:$0xff] %v6403_v3 }
0x13ae   :  { %8884 = shalt.err (!%p8881_p12)
}
0x13af   :  { %s8885_s4 = scalar_lea.hbm %s10551_s6, 2048 }
0x13b0   :  { %p8886_p13 = scmp.ne.s32.totalorder %s10551_s6, %s8885_s4  ;;  %p8889_p0 = scmp.lt.u32.totalorder %s8885_s4, %s10551_s6 }
0x13b2   :  { %p8891_p1 = pnand %p8889_p0, %p8886_p13 }
0x13b4   :  { %8894 = shalt.err (!%p8891_p1)
}
0x13b5   :  { %s8905_s3 = smov 128   ;;  %s8906_s17 = smov 8  }
0x13b6   :  { %6441 = dma.vmem_to_hbm [thread:$0]  %s6436_s10, 2048, %s10551_s6, [#allocation4], %s8905_s3, %s8905_s3, %s8906_s17  }
0x13b7   :  { %8897 = dma.done.wait [#allocation4], 2048  }
0x13b8   :  { %8898 = vsyncadd [#allocation4], 4294965248 }
0x13b9   :  { %6445 = vsyncpa [#allocation3], 1 }
0x13ba   :  { %6446 = vsyncpa [#allocation4], 1 }

</bundles_post_ra>
